<compile_context>
chip_gen: v6e
topology: v6e:2x2x1
jax: 0.10.0
libtpu: 0.0.40
codegen_flags: <defaults>
</compile_context>

<pallas_src>
import math

import jax
import jax.numpy as jnp
from jax.experimental import pallas as pl
from jax.experimental.pallas import tpu as pltpu

# ---- Small synthetic DistilBERT-like config ----
VOCAB = 100
MAX_POS = 64
DIM = 32           # hidden size (DistilBERT default 768, shrunk)
N_HEADS = 4        # (default 12, shrunk)
D_HEAD = DIM // N_HEADS
N_LAYERS = 2       # (default 6, shrunk)
HIDDEN = 64        # FFN inner dim (default 3072, shrunk)
LN_EPS = 1e-12
NEG_INF = float(jnp.finfo(jnp.float32).min)


# ---------------- in-kernel helpers ----------------
def _layernorm(x, g, b):
    mu = jnp.mean(x, axis=-1, keepdims=True)
    var = jnp.mean(jnp.square(x - mu), axis=-1, keepdims=True)  # biased, like torch LN
    return (x - mu) * jax.lax.rsqrt(var + LN_EPS) * g + b


def _gelu(x):
    # exact (erf-based) GELU, matching HF DistilBERT's "gelu" activation
    return 0.5 * x * (1.0 + jax.lax.erf(x * (1.0 / math.sqrt(2.0))))


# ---------------- fused Pallas kernel ----------------
def text_encoder_kernel(emb_ref, keep_ref, gemb_ref, bemb_ref,
                        wq_ref, bq_ref, wk_ref, bk_ref, wv_ref, bv_ref,
                        wo_ref, bo_ref, g1_ref, be1_ref,
                        w1_ref, bf1_ref, w2_ref, bf2_ref, g2_ref, be2_ref,
                        out_ref):
    N, D = emb_ref.shape                    # N = B*S flattened tokens
    B = out_ref.shape[0]
    S = N // B
    L, H, _, Dh = wq_ref.shape
    scale = 1.0 / math.sqrt(Dh)

    # hoisted once: block-diagonal (same batch) AND key-unmasked predicate
    keep = keep_ref[...] > 0.5              # (N, N) bool

    # embedding LayerNorm
    h = _layernorm(emb_ref[...], gemb_ref[...], bemb_ref[...])   # (N, D)

    for l in range(L):
        wq_l, bq_l = wq_ref[l], bq_ref[l]   # (H, D, Dh), (H, 1, Dh)
        wk_l, bk_l = wk_ref[l], bk_ref[l]
        wv_l, bv_l = wv_ref[l], bv_ref[l]
        wo_l = wo_ref[l]                    # (H, Dh, D)

        # ---- multi-head self-attention over the flattened token axis ----
        sa = jnp.zeros((N, D), jnp.float32)
        for hd in range(H):
            qh = jnp.dot(h, wq_l[hd], preferred_element_type=jnp.float32) + bq_l[hd]
            kh = jnp.dot(h, wk_l[hd], preferred_element_type=jnp.float32) + bk_l[hd]
            vh = jnp.dot(h, wv_l[hd], preferred_element_type=jnp.float32) + bv_l[hd]
            scores = jax.lax.dot_general(
                qh, kh, (((1,), (1,)), ((), ())),
                preferred_element_type=jnp.float32) * scale       # (N, N)
            scores = jnp.where(keep, scores, NEG_INF)
            smax = jnp.max(scores, axis=-1, keepdims=True)
            p = jnp.exp(scores - smax)
            inv = pl.reciprocal(jnp.sum(p, axis=-1, keepdims=True), approx=True)
            ctx = jnp.dot(p, vh, preferred_element_type=jnp.float32) * inv   # (N, Dh)
            # out-projection folded per head: sum_h ctx_h @ Wo_h == concat(ctx) @ Wo
            sa = sa + jnp.dot(ctx, wo_l[hd], preferred_element_type=jnp.float32)

        x1 = _layernorm(h + sa + bo_ref[l], g1_ref[l], be1_ref[l])   # sa_layer_norm

        # ---- FFN ----
        hdn = _gelu(jnp.dot(x1, w1_ref[l], preferred_element_type=jnp.float32)
                    + bf1_ref[l])
        ffn = jnp.dot(hdn, w2_ref[l], preferred_element_type=jnp.float32) + bf2_ref[l]
        h = _layernorm(x1 + ffn, g2_ref[l], be2_ref[l])              # output_layer_norm

    # write only the CLS rows (token 0 of every batch example)
    out_ref[...] = jnp.concatenate([h[b * S:b * S + 1, :] for b in range(B)], axis=0)


# ---------------- wrapper ----------------
def _stack(layers, name):
    return jnp.stack([lyr[name] for lyr in layers], axis=0)


def text_encoder_forward(params, input_ids, attention_mask):
    """Equivalent of TextEncoder.forward: returns last_hidden_state[:, 0, :]."""
    B, S = input_ids.shape
    layers = params["layers"]

    # embedding gather (glue, plain JAX), flattened to (B*S, D)
    emb = (jnp.take(params["word_emb"], input_ids, axis=0)
           + params["pos_emb"][:S][None, :, :]).astype(jnp.float32)
    emb2 = emb.reshape(B * S, DIM)

    # block-diagonal keep matrix: keep[b*S+i, b2*S+j] = (b == b2) & mask[b2, j]
    key_keep = attention_mask.astype(jnp.float32)                    # (B, S)
    same = jnp.eye(B, dtype=jnp.float32)                             # (B, B)
    keep = same[:, None, :, None] * key_keep[None, None, :, :]       # (B, 1, B, S)
    keep = jnp.broadcast_to(keep, (B, S, B, S)).reshape(B * S, B * S)

    # stack per-layer weights and pre-split heads (wrapper-side layout plumbing)
    wq = _stack(layers, "wq").reshape(N_LAYERS, DIM, N_HEADS, D_HEAD).transpose(0, 2, 1, 3)
    wk = _stack(layers, "wk").reshape(N_LAYERS, DIM, N_HEADS, D_HEAD).transpose(0, 2, 1, 3)
    wv = _stack(layers, "wv").reshape(N_LAYERS, DIM, N_HEADS, D_HEAD).transpose(0, 2, 1, 3)
    bq = _stack(layers, "bq").reshape(N_LAYERS, 1, N_HEADS, D_HEAD).transpose(0, 2, 1, 3)
    bk = _stack(layers, "bk").reshape(N_LAYERS, 1, N_HEADS, D_HEAD).transpose(0, 2, 1, 3)
    bv = _stack(layers, "bv").reshape(N_LAYERS, 1, N_HEADS, D_HEAD).transpose(0, 2, 1, 3)
    wo = _stack(layers, "wo").reshape(N_LAYERS, N_HEADS, D_HEAD, DIM)
    bo = _stack(layers, "bo")
    g1, be1 = _stack(layers, "ln1_g"), _stack(layers, "ln1_b")
    w1, b1 = _stack(layers, "w1"), _stack(layers, "b1")
    w2, b2 = _stack(layers, "w2"), _stack(layers, "b2")
    g2, be2 = _stack(layers, "ln2_g"), _stack(layers, "ln2_b")

    return pl.pallas_call(
        text_encoder_kernel,
        out_shape=jax.ShapeDtypeStruct((B, DIM), jnp.float32),
        compiler_params=pltpu.CompilerParams(vmem_limit_bytes=32 * 1024 * 1024),
    )(emb2, keep, params["emb_ln_g"], params["emb_ln_b"],
      wq, bq, wk, bk, wv, bv, wo, bo, g1, be1, w1, b1, w2, b2, g2, be2)


# ---------------- parameters ----------------
def init_params(key):
    keys = iter(jax.random.split(key, 8 + 8 * N_LAYERS))

    def nrm(shape):
        return (0.02 * jax.random.normal(next(keys), shape)).astype(jnp.float32)

    params = {
        "word_emb": nrm((VOCAB, DIM)),
        "pos_emb": nrm((MAX_POS, DIM)),
        "emb_ln_g": jnp.ones((1, DIM), jnp.float32),
        "emb_ln_b": jnp.zeros((1, DIM), jnp.float32),
        "layers": [],
    }
    for _ in range(N_LAYERS):
        params["layers"].append(dict(
            wq=nrm((DIM, DIM)), bq=jnp.zeros((1, DIM), jnp.float32),
            wk=nrm((DIM, DIM)), bk=jnp.zeros((1, DIM), jnp.float32),
            wv=nrm((DIM, DIM)), bv=jnp.zeros((1, DIM), jnp.float32),
            wo=nrm((DIM, DIM)), bo=jnp.zeros((1, DIM), jnp.float32),
            ln1_g=jnp.ones((1, DIM), jnp.float32), ln1_b=jnp.zeros((1, DIM), jnp.float32),
            w1=nrm((DIM, HIDDEN)), b1=jnp.zeros((1, HIDDEN), jnp.float32),
            w2=nrm((HIDDEN, DIM)), b2=jnp.zeros((1, DIM), jnp.float32),
            ln2_g=jnp.ones((1, DIM), jnp.float32), ln2_b=jnp.zeros((1, DIM), jnp.float32),
        ))
    return params


if __name__ == "__main__":
    key = jax.random.PRNGKey(0)
    k_param, k_ids = jax.random.split(key)

    B, S = 2, 8
    params = init_params(k_param)
    input_ids = jax.random.randint(k_ids, (B, S), 0, VOCAB, dtype=jnp.int32)
    attention_mask = jnp.array([[1, 1, 1, 1, 1, 1, 1, 1],
                                [1, 1, 1, 1, 1, 0, 0, 0]], dtype=jnp.int32)

    fwd = jax.jit(text_encoder_forward)
    out = fwd(params, input_ids, attention_mask)
    out = jax.block_until_ready(out)
    assert out.shape == (B, DIM) and out.dtype == jnp.float32
    assert bool(jnp.all(jnp.isfinite(out)))
    print("KERNEL_OK")
</pallas_src>

<mosaic_0001>
module attributes {stable_mosaic.version = 11 : i64} {
  func.func @text_encoder_kernel(%arg0: memref<16x32xf32, #tpu.memory_space<vmem>>, %arg1: memref<16x16xf32, #tpu.memory_space<vmem>>, %arg2: memref<1x32xf32, #tpu.memory_space<vmem>>, %arg3: memref<1x32xf32, #tpu.memory_space<vmem>>, %arg4: memref<2x4x32x8xf32, #tpu.memory_space<vmem>>, %arg5: memref<2x4x1x8xf32, #tpu.memory_space<vmem>>, %arg6: memref<2x4x32x8xf32, #tpu.memory_space<vmem>>, %arg7: memref<2x4x1x8xf32, #tpu.memory_space<vmem>>, %arg8: memref<2x4x32x8xf32, #tpu.memory_space<vmem>>, %arg9: memref<2x4x1x8xf32, #tpu.memory_space<vmem>>, %arg10: memref<2x4x8x32xf32, #tpu.memory_space<vmem>>, %arg11: memref<2x1x32xf32, #tpu.memory_space<vmem>>, %arg12: memref<2x1x32xf32, #tpu.memory_space<vmem>>, %arg13: memref<2x1x32xf32, #tpu.memory_space<vmem>>, %arg14: memref<2x32x64xf32, #tpu.memory_space<vmem>>, %arg15: memref<2x1x64xf32, #tpu.memory_space<vmem>>, %arg16: memref<2x64x32xf32, #tpu.memory_space<vmem>>, %arg17: memref<2x1x32xf32, #tpu.memory_space<vmem>>, %arg18: memref<2x1x32xf32, #tpu.memory_space<vmem>>, %arg19: memref<2x1x32xf32, #tpu.memory_space<vmem>>, %arg20: memref<2x32xf32, #tpu.memory_space<vmem>>) attributes {dimension_semantics = [], scalar_prefetch = 0 : i64, scratch_operands = 0 : i64, tpu.core_type = #tpu.core_type<tc>} {
    %c0 = arith.constant 0 : index
    %c0_0 = arith.constant 0 : index
    %0 = vector.load %arg1[%c0, %c0_0] : memref<16x16xf32, #tpu.memory_space<vmem>>, vector<16x16xf32>
    %cst = arith.constant 5.000000e-01 : f32
    %1 = vector.broadcast %cst : f32 to vector<16x16xf32>
    %2 = arith.cmpf ogt, %0, %1 : vector<16x16xf32>
    %c0_1 = arith.constant 0 : index
    %c0_2 = arith.constant 0 : index
    %3 = vector.load %arg0[%c0_1, %c0_2] : memref<16x32xf32, #tpu.memory_space<vmem>>, vector<16x32xf32>
    %c0_3 = arith.constant 0 : index
    %c0_4 = arith.constant 0 : index
    %4 = vector.load %arg2[%c0_3, %c0_4] : memref<1x32xf32, #tpu.memory_space<vmem>>, vector<1x32xf32>
    %c0_5 = arith.constant 0 : index
    %c0_6 = arith.constant 0 : index
    %5 = vector.load %arg3[%c0_5, %c0_6] : memref<1x32xf32, #tpu.memory_space<vmem>>, vector<1x32xf32>
    %cst_7 = arith.constant dense<0.000000e+00> : vector<16xf32>
    %6 = vector.multi_reduction <add>, %3, %cst_7 [1] : vector<16x32xf32> to vector<16xf32>
    %7 = vector.shape_cast %6 : vector<16xf32> to vector<16x1xf32>
    %cst_8 = arith.constant 3.200000e+01 : f32
    %8 = vector.broadcast %cst_8 : f32 to vector<16x1xf32>
    %9 = arith.divf %7, %8 : vector<16x1xf32>
    %10 = vector.broadcast %9 : vector<16x1xf32> to vector<16x32xf32>
    %11 = arith.subf %3, %10 : vector<16x32xf32>
    %12 = arith.mulf %11, %11 : vector<16x32xf32>
    %cst_9 = arith.constant dense<0.000000e+00> : vector<16xf32>
    %13 = vector.multi_reduction <add>, %12, %cst_9 [1] : vector<16x32xf32> to vector<16xf32>
    %14 = vector.shape_cast %13 : vector<16xf32> to vector<16x1xf32>
    %cst_10 = arith.constant 3.200000e+01 : f32
    %15 = vector.broadcast %cst_10 : f32 to vector<16x1xf32>
    %16 = arith.divf %14, %15 : vector<16x1xf32>
    %17 = vector.broadcast %9 : vector<16x1xf32> to vector<16x32xf32>
    %18 = arith.subf %3, %17 : vector<16x32xf32>
    %cst_11 = arith.constant 9.99999996E-13 : f32
    %19 = vector.broadcast %cst_11 : f32 to vector<16x1xf32>
    %20 = arith.addf %16, %19 : vector<16x1xf32>
    %21 = math.rsqrt %20 : vector<16x1xf32>
    %22 = vector.broadcast %21 : vector<16x1xf32> to vector<16x32xf32>
    %23 = arith.mulf %18, %22 : vector<16x32xf32>
    %24 = vector.broadcast %4 : vector<1x32xf32> to vector<16x32xf32>
    %25 = arith.mulf %23, %24 : vector<16x32xf32>
    %26 = vector.broadcast %5 : vector<1x32xf32> to vector<16x32xf32>
    %27 = arith.addf %25, %26 : vector<16x32xf32>
    %c0_12 = arith.constant 0 : index
    %c0_13 = arith.constant 0 : index
    %c0_14 = arith.constant 0 : index
    %c0_15 = arith.constant 0 : index
    %28 = vector.load %arg4[%c0_12, %c0_13, %c0_14, %c0_15] : memref<2x4x32x8xf32, #tpu.memory_space<vmem>>, vector<1x4x32x8xf32>
    %29 = vector.shape_cast %28 : vector<1x4x32x8xf32> to vector<4x32x8xf32>
    %c0_16 = arith.constant 0 : index
    %c0_17 = arith.constant 0 : index
    %c0_18 = arith.constant 0 : index
    %c0_19 = arith.constant 0 : index
    %30 = vector.load %arg5[%c0_16, %c0_17, %c0_18, %c0_19] : memref<2x4x1x8xf32, #tpu.memory_space<vmem>>, vector<1x4x1x8xf32>
    %31 = vector.shape_cast %30 : vector<1x4x1x8xf32> to vector<4x1x8xf32>
    %c0_20 = arith.constant 0 : index
    %c0_21 = arith.constant 0 : index
    %c0_22 = arith.constant 0 : index
    %c0_23 = arith.constant 0 : index
    %32 = vector.load %arg6[%c0_20, %c0_21, %c0_22, %c0_23] : memref<2x4x32x8xf32, #tpu.memory_space<vmem>>, vector<1x4x32x8xf32>
    %33 = vector.shape_cast %32 : vector<1x4x32x8xf32> to vector<4x32x8xf32>
    %c0_24 = arith.constant 0 : index
    %c0_25 = arith.constant 0 : index
    %c0_26 = arith.constant 0 : index
    %c0_27 = arith.constant 0 : index
    %34 = vector.load %arg7[%c0_24, %c0_25, %c0_26, %c0_27] : memref<2x4x1x8xf32, #tpu.memory_space<vmem>>, vector<1x4x1x8xf32>
    %35 = vector.shape_cast %34 : vector<1x4x1x8xf32> to vector<4x1x8xf32>
    %c0_28 = arith.constant 0 : index
    %c0_29 = arith.constant 0 : index
    %c0_30 = arith.constant 0 : index
    %c0_31 = arith.constant 0 : index
    %36 = vector.load %arg8[%c0_28, %c0_29, %c0_30, %c0_31] : memref<2x4x32x8xf32, #tpu.memory_space<vmem>>, vector<1x4x32x8xf32>
    %37 = vector.shape_cast %36 : vector<1x4x32x8xf32> to vector<4x32x8xf32>
    %c0_32 = arith.constant 0 : index
    %c0_33 = arith.constant 0 : index
    %c0_34 = arith.constant 0 : index
    %c0_35 = arith.constant 0 : index
    %38 = vector.load %arg9[%c0_32, %c0_33, %c0_34, %c0_35] : memref<2x4x1x8xf32, #tpu.memory_space<vmem>>, vector<1x4x1x8xf32>
    %39 = vector.shape_cast %38 : vector<1x4x1x8xf32> to vector<4x1x8xf32>
    %c0_36 = arith.constant 0 : index
    %c0_37 = arith.constant 0 : index
    %c0_38 = arith.constant 0 : index
    %c0_39 = arith.constant 0 : index
    %40 = vector.load %arg10[%c0_36, %c0_37, %c0_38, %c0_39] : memref<2x4x8x32xf32, #tpu.memory_space<vmem>>, vector<1x4x8x32xf32>
    %41 = vector.shape_cast %40 : vector<1x4x8x32xf32> to vector<4x8x32xf32>
    %cst_40 = arith.constant 0.000000e+00 : f32
    %42 = vector.broadcast %cst_40 : f32 to vector<16x32xf32>
    %43 = vector.extract_strided_slice %29 {offsets = [0, 0, 0], sizes = [1, 32, 8], strides = [1, 1, 1]} : vector<4x32x8xf32> to vector<1x32x8xf32>
    %44 = vector.shape_cast %43 : vector<1x32x8xf32> to vector<32x8xf32>
    %cst_41 = arith.constant dense<0.000000e+00> : vector<16x8xf32>
    %45 = tpu.matmul %27, %44, %cst_41 {dimension_numbers = #tpu.dot_dimension_numbers<[1], [0], [0], [1], [0, 0, 1, 1], [], []>} : vector<16x32xf32>, vector<32x8xf32>, vector<16x8xf32> -> vector<16x8xf32>
    %46 = vector.extract_strided_slice %31 {offsets = [0, 0, 0], sizes = [1, 1, 8], strides = [1, 1, 1]} : vector<4x1x8xf32> to vector<1x1x8xf32>
    %47 = vector.shape_cast %46 : vector<1x1x8xf32> to vector<1x8xf32>
    %48 = vector.broadcast %47 : vector<1x8xf32> to vector<16x8xf32>
    %49 = arith.addf %45, %48 : vector<16x8xf32>
    %50 = vector.extract_strided_slice %33 {offsets = [0, 0, 0], sizes = [1, 32, 8], strides = [1, 1, 1]} : vector<4x32x8xf32> to vector<1x32x8xf32>
    %51 = vector.shape_cast %50 : vector<1x32x8xf32> to vector<32x8xf32>
    %cst_42 = arith.constant dense<0.000000e+00> : vector<16x8xf32>
    %52 = tpu.matmul %27, %51, %cst_42 {dimension_numbers = #tpu.dot_dimension_numbers<[1], [0], [0], [1], [0, 0, 1, 1], [], []>} : vector<16x32xf32>, vector<32x8xf32>, vector<16x8xf32> -> vector<16x8xf32>
    %53 = vector.extract_strided_slice %35 {offsets = [0, 0, 0], sizes = [1, 1, 8], strides = [1, 1, 1]} : vector<4x1x8xf32> to vector<1x1x8xf32>
    %54 = vector.shape_cast %53 : vector<1x1x8xf32> to vector<1x8xf32>
    %55 = vector.broadcast %54 : vector<1x8xf32> to vector<16x8xf32>
    %56 = arith.addf %52, %55 : vector<16x8xf32>
    %57 = vector.extract_strided_slice %37 {offsets = [0, 0, 0], sizes = [1, 32, 8], strides = [1, 1, 1]} : vector<4x32x8xf32> to vector<1x32x8xf32>
    %58 = vector.shape_cast %57 : vector<1x32x8xf32> to vector<32x8xf32>
    %cst_43 = arith.constant dense<0.000000e+00> : vector<16x8xf32>
    %59 = tpu.matmul %27, %58, %cst_43 {dimension_numbers = #tpu.dot_dimension_numbers<[1], [0], [0], [1], [0, 0, 1, 1], [], []>} : vector<16x32xf32>, vector<32x8xf32>, vector<16x8xf32> -> vector<16x8xf32>
    %60 = vector.extract_strided_slice %39 {offsets = [0, 0, 0], sizes = [1, 1, 8], strides = [1, 1, 1]} : vector<4x1x8xf32> to vector<1x1x8xf32>
    %61 = vector.shape_cast %60 : vector<1x1x8xf32> to vector<1x8xf32>
    %62 = vector.broadcast %61 : vector<1x8xf32> to vector<16x8xf32>
    %63 = arith.addf %59, %62 : vector<16x8xf32>
    %cst_44 = arith.constant dense<0.000000e+00> : vector<16x16xf32>
    %64 = tpu.matmul %49, %56, %cst_44 {dimension_numbers = #tpu.dot_dimension_numbers<[1], [1], [0], [0], [0, 0, 1, 0], [], []>} : vector<16x8xf32>, vector<16x8xf32>, vector<16x16xf32> -> vector<16x16xf32>
    %cst_45 = arith.constant 0.353553385 : f32
    %65 = vector.broadcast %cst_45 : f32 to vector<16x16xf32>
    %66 = arith.mulf %64, %65 : vector<16x16xf32>
    %cst_46 = arith.constant -3.40282347E+38 : f32
    %67 = vector.broadcast %cst_46 : f32 to vector<16x16xf32>
    %68 = arith.select %2, %66, %67 : vector<16x16xi1>, vector<16x16xf32>
    %cst_47 = arith.constant dense<0xFF800000> : vector<16xf32>
    %69 = vector.multi_reduction <maximumf>, %68, %cst_47 [1] : vector<16x16xf32> to vector<16xf32>
    %70 = vector.shape_cast %69 : vector<16xf32> to vector<16x1xf32>
    %71 = vector.broadcast %70 : vector<16x1xf32> to vector<16x16xf32>
    %72 = arith.subf %68, %71 : vector<16x16xf32>
    %73 = math.exp %72 : vector<16x16xf32>
    %cst_48 = arith.constant dense<0.000000e+00> : vector<16xf32>
    %74 = vector.multi_reduction <add>, %73, %cst_48 [1] : vector<16x16xf32> to vector<16xf32>
    %75 = vector.shape_cast %74 : vector<16xf32> to vector<16x1xf32>
    %76 = tpu.reciprocal %75 {approx = true} : vector<16x1xf32> -> vector<16x1xf32>
    %cst_49 = arith.constant dense<0.000000e+00> : vector<16x8xf32>
    %77 = tpu.matmul %73, %63, %cst_49 {dimension_numbers = #tpu.dot_dimension_numbers<[1], [0], [0], [1], [0, 0, 1, 1], [], []>} : vector<16x16xf32>, vector<16x8xf32>, vector<16x8xf32> -> vector<16x8xf32>
    %78 = vector.broadcast %76 : vector<16x1xf32> to vector<16x8xf32>
    %79 = arith.mulf %77, %78 : vector<16x8xf32>
    %80 = vector.extract_strided_slice %41 {offsets = [0, 0, 0], sizes = [1, 8, 32], strides = [1, 1, 1]} : vector<4x8x32xf32> to vector<1x8x32xf32>
    %81 = vector.shape_cast %80 : vector<1x8x32xf32> to vector<8x32xf32>
    %cst_50 = arith.constant dense<0.000000e+00> : vector<16x32xf32>
    %82 = tpu.matmul %79, %81, %cst_50 {dimension_numbers = #tpu.dot_dimension_numbers<[1], [0], [0], [1], [0, 0, 1, 1], [], []>} : vector<16x8xf32>, vector<8x32xf32>, vector<16x32xf32> -> vector<16x32xf32>
    %83 = arith.addf %42, %82 : vector<16x32xf32>
    %84 = vector.extract_strided_slice %29 {offsets = [1, 0, 0], sizes = [1, 32, 8], strides = [1, 1, 1]} : vector<4x32x8xf32> to vector<1x32x8xf32>
    %85 = vector.shape_cast %84 : vector<1x32x8xf32> to vector<32x8xf32>
    %cst_51 = arith.constant dense<0.000000e+00> : vector<16x8xf32>
    %86 = tpu.matmul %27, %85, %cst_51 {dimension_numbers = #tpu.dot_dimension_numbers<[1], [0], [0], [1], [0, 0, 1, 1], [], []>} : vector<16x32xf32>, vector<32x8xf32>, vector<16x8xf32> -> vector<16x8xf32>
    %87 = vector.extract_strided_slice %31 {offsets = [1, 0, 0], sizes = [1, 1, 8], strides = [1, 1, 1]} : vector<4x1x8xf32> to vector<1x1x8xf32>
    %88 = vector.shape_cast %87 : vector<1x1x8xf32> to vector<1x8xf32>
    %89 = vector.broadcast %88 : vector<1x8xf32> to vector<16x8xf32>
    %90 = arith.addf %86, %89 : vector<16x8xf32>
    %91 = vector.extract_strided_slice %33 {offsets = [1, 0, 0], sizes = [1, 32, 8], strides = [1, 1, 1]} : vector<4x32x8xf32> to vector<1x32x8xf32>
    %92 = vector.shape_cast %91 : vector<1x32x8xf32> to vector<32x8xf32>
    %cst_52 = arith.constant dense<0.000000e+00> : vector<16x8xf32>
    %93 = tpu.matmul %27, %92, %cst_52 {dimension_numbers = #tpu.dot_dimension_numbers<[1], [0], [0], [1], [0, 0, 1, 1], [], []>} : vector<16x32xf32>, vector<32x8xf32>, vector<16x8xf32> -> vector<16x8xf32>
    %94 = vector.extract_strided_slice %35 {offsets = [1, 0, 0], sizes = [1, 1, 8], strides = [1, 1, 1]} : vector<4x1x8xf32> to vector<1x1x8xf32>
    %95 = vector.shape_cast %94 : vector<1x1x8xf32> to vector<1x8xf32>
    %96 = vector.broadcast %95 : vector<1x8xf32> to vector<16x8xf32>
    %97 = arith.addf %93, %96 : vector<16x8xf32>
    %98 = vector.extract_strided_slice %37 {offsets = [1, 0, 0], sizes = [1, 32, 8], strides = [1, 1, 1]} : vector<4x32x8xf32> to vector<1x32x8xf32>
    %99 = vector.shape_cast %98 : vector<1x32x8xf32> to vector<32x8xf32>
    %cst_53 = arith.constant dense<0.000000e+00> : vector<16x8xf32>
    %100 = tpu.matmul %27, %99, %cst_53 {dimension_numbers = #tpu.dot_dimension_numbers<[1], [0], [0], [1], [0, 0, 1, 1], [], []>} : vector<16x32xf32>, vector<32x8xf32>, vector<16x8xf32> -> vector<16x8xf32>
    %101 = vector.extract_strided_slice %39 {offsets = [1, 0, 0], sizes = [1, 1, 8], strides = [1, 1, 1]} : vector<4x1x8xf32> to vector<1x1x8xf32>
    %102 = vector.shape_cast %101 : vector<1x1x8xf32> to vector<1x8xf32>
    %103 = vector.broadcast %102 : vector<1x8xf32> to vector<16x8xf32>
    %104 = arith.addf %100, %103 : vector<16x8xf32>
    %cst_54 = arith.constant dense<0.000000e+00> : vector<16x16xf32>
    %105 = tpu.matmul %90, %97, %cst_54 {dimension_numbers = #tpu.dot_dimension_numbers<[1], [1], [0], [0], [0, 0, 1, 0], [], []>} : vector<16x8xf32>, vector<16x8xf32>, vector<16x16xf32> -> vector<16x16xf32>
    %cst_55 = arith.constant 0.353553385 : f32
    %106 = vector.broadcast %cst_55 : f32 to vector<16x16xf32>
    %107 = arith.mulf %105, %106 : vector<16x16xf32>
    %cst_56 = arith.constant -3.40282347E+38 : f32
    %108 = vector.broadcast %cst_56 : f32 to vector<16x16xf32>
    %109 = arith.select %2, %107, %108 : vector<16x16xi1>, vector<16x16xf32>
    %cst_57 = arith.constant dense<0xFF800000> : vector<16xf32>
    %110 = vector.multi_reduction <maximumf>, %109, %cst_57 [1] : vector<16x16xf32> to vector<16xf32>
    %111 = vector.shape_cast %110 : vector<16xf32> to vector<16x1xf32>
    %112 = vector.broadcast %111 : vector<16x1xf32> to vector<16x16xf32>
    %113 = arith.subf %109, %112 : vector<16x16xf32>
    %114 = math.exp %113 : vector<16x16xf32>
    %cst_58 = arith.constant dense<0.000000e+00> : vector<16xf32>
    %115 = vector.multi_reduction <add>, %114, %cst_58 [1] : vector<16x16xf32> to vector<16xf32>
    %116 = vector.shape_cast %115 : vector<16xf32> to vector<16x1xf32>
    %117 = tpu.reciprocal %116 {approx = true} : vector<16x1xf32> -> vector<16x1xf32>
    %cst_59 = arith.constant dense<0.000000e+00> : vector<16x8xf32>
    %118 = tpu.matmul %114, %104, %cst_59 {dimension_numbers = #tpu.dot_dimension_numbers<[1], [0], [0], [1], [0, 0, 1, 1], [], []>} : vector<16x16xf32>, vector<16x8xf32>, vector<16x8xf32> -> vector<16x8xf32>
    %119 = vector.broadcast %117 : vector<16x1xf32> to vector<16x8xf32>
    %120 = arith.mulf %118, %119 : vector<16x8xf32>
    %121 = vector.extract_strided_slice %41 {offsets = [1, 0, 0], sizes = [1, 8, 32], strides = [1, 1, 1]} : vector<4x8x32xf32> to vector<1x8x32xf32>
    %122 = vector.shape_cast %121 : vector<1x8x32xf32> to vector<8x32xf32>
    %cst_60 = arith.constant dense<0.000000e+00> : vector<16x32xf32>
    %123 = tpu.matmul %120, %122, %cst_60 {dimension_numbers = #tpu.dot_dimension_numbers<[1], [0], [0], [1], [0, 0, 1, 1], [], []>} : vector<16x8xf32>, vector<8x32xf32>, vector<16x32xf32> -> vector<16x32xf32>
    %124 = arith.addf %83, %123 : vector<16x32xf32>
    %125 = vector.extract_strided_slice %29 {offsets = [2, 0, 0], sizes = [1, 32, 8], strides = [1, 1, 1]} : vector<4x32x8xf32> to vector<1x32x8xf32>
    %126 = vector.shape_cast %125 : vector<1x32x8xf32> to vector<32x8xf32>
    %cst_61 = arith.constant dense<0.000000e+00> : vector<16x8xf32>
    %127 = tpu.matmul %27, %126, %cst_61 {dimension_numbers = #tpu.dot_dimension_numbers<[1], [0], [0], [1], [0, 0, 1, 1], [], []>} : vector<16x32xf32>, vector<32x8xf32>, vector<16x8xf32> -> vector<16x8xf32>
    %128 = vector.extract_strided_slice %31 {offsets = [2, 0, 0], sizes = [1, 1, 8], strides = [1, 1, 1]} : vector<4x1x8xf32> to vector<1x1x8xf32>
    %129 = vector.shape_cast %128 : vector<1x1x8xf32> to vector<1x8xf32>
    %130 = vector.broadcast %129 : vector<1x8xf32> to vector<16x8xf32>
    %131 = arith.addf %127, %130 : vector<16x8xf32>
    %132 = vector.extract_strided_slice %33 {offsets = [2, 0, 0], sizes = [1, 32, 8], strides = [1, 1, 1]} : vector<4x32x8xf32> to vector<1x32x8xf32>
    %133 = vector.shape_cast %132 : vector<1x32x8xf32> to vector<32x8xf32>
    %cst_62 = arith.constant dense<0.000000e+00> : vector<16x8xf32>
    %134 = tpu.matmul %27, %133, %cst_62 {dimension_numbers = #tpu.dot_dimension_numbers<[1], [0], [0], [1], [0, 0, 1, 1], [], []>} : vector<16x32xf32>, vector<32x8xf32>, vector<16x8xf32> -> vector<16x8xf32>
    %135 = vector.extract_strided_slice %35 {offsets = [2, 0, 0], sizes = [1, 1, 8], strides = [1, 1, 1]} : vector<4x1x8xf32> to vector<1x1x8xf32>
    %136 = vector.shape_cast %135 : vector<1x1x8xf32> to vector<1x8xf32>
    %137 = vector.broadcast %136 : vector<1x8xf32> to vector<16x8xf32>
    %138 = arith.addf %134, %137 : vector<16x8xf32>
    %139 = vector.extract_strided_slice %37 {offsets = [2, 0, 0], sizes = [1, 32, 8], strides = [1, 1, 1]} : vector<4x32x8xf32> to vector<1x32x8xf32>
    %140 = vector.shape_cast %139 : vector<1x32x8xf32> to vector<32x8xf32>
    %cst_63 = arith.constant dense<0.000000e+00> : vector<16x8xf32>
    %141 = tpu.matmul %27, %140, %cst_63 {dimension_numbers = #tpu.dot_dimension_numbers<[1], [0], [0], [1], [0, 0, 1, 1], [], []>} : vector<16x32xf32>, vector<32x8xf32>, vector<16x8xf32> -> vector<16x8xf32>
    %142 = vector.extract_strided_slice %39 {offsets = [2, 0, 0], sizes = [1, 1, 8], strides = [1, 1, 1]} : vector<4x1x8xf32> to vector<1x1x8xf32>
    %143 = vector.shape_cast %142 : vector<1x1x8xf32> to vector<1x8xf32>
    %144 = vector.broadcast %143 : vector<1x8xf32> to vector<16x8xf32>
    %145 = arith.addf %141, %144 : vector<16x8xf32>
    %cst_64 = arith.constant dense<0.000000e+00> : vector<16x16xf32>
    %146 = tpu.matmul %131, %138, %cst_64 {dimension_numbers = #tpu.dot_dimension_numbers<[1], [1], [0], [0], [0, 0, 1, 0], [], []>} : vector<16x8xf32>, vector<16x8xf32>, vector<16x16xf32> -> vector<16x16xf32>
    %cst_65 = arith.constant 0.353553385 : f32
    %147 = vector.broadcast %cst_65 : f32 to vector<16x16xf32>
    %148 = arith.mulf %146, %147 : vector<16x16xf32>
    %cst_66 = arith.constant -3.40282347E+38 : f32
    %149 = vector.broadcast %cst_66 : f32 to vector<16x16xf32>
    %150 = arith.select %2, %148, %149 : vector<16x16xi1>, vector<16x16xf32>
    %cst_67 = arith.constant dense<0xFF800000> : vector<16xf32>
    %151 = vector.multi_reduction <maximumf>, %150, %cst_67 [1] : vector<16x16xf32> to vector<16xf32>
    %152 = vector.shape_cast %151 : vector<16xf32> to vector<16x1xf32>
    %153 = vector.broadcast %152 : vector<16x1xf32> to vector<16x16xf32>
    %154 = arith.subf %150, %153 : vector<16x16xf32>
    %155 = math.exp %154 : vector<16x16xf32>
    %cst_68 = arith.constant dense<0.000000e+00> : vector<16xf32>
    %156 = vector.multi_reduction <add>, %155, %cst_68 [1] : vector<16x16xf32> to vector<16xf32>
    %157 = vector.shape_cast %156 : vector<16xf32> to vector<16x1xf32>
    %158 = tpu.reciprocal %157 {approx = true} : vector<16x1xf32> -> vector<16x1xf32>
    %cst_69 = arith.constant dense<0.000000e+00> : vector<16x8xf32>
    %159 = tpu.matmul %155, %145, %cst_69 {dimension_numbers = #tpu.dot_dimension_numbers<[1], [0], [0], [1], [0, 0, 1, 1], [], []>} : vector<16x16xf32>, vector<16x8xf32>, vector<16x8xf32> -> vector<16x8xf32>
    %160 = vector.broadcast %158 : vector<16x1xf32> to vector<16x8xf32>
    %161 = arith.mulf %159, %160 : vector<16x8xf32>
    %162 = vector.extract_strided_slice %41 {offsets = [2, 0, 0], sizes = [1, 8, 32], strides = [1, 1, 1]} : vector<4x8x32xf32> to vector<1x8x32xf32>
    %163 = vector.shape_cast %162 : vector<1x8x32xf32> to vector<8x32xf32>
    %cst_70 = arith.constant dense<0.000000e+00> : vector<16x32xf32>
    %164 = tpu.matmul %161, %163, %cst_70 {dimension_numbers = #tpu.dot_dimension_numbers<[1], [0], [0], [1], [0, 0, 1, 1], [], []>} : vector<16x8xf32>, vector<8x32xf32>, vector<16x32xf32> -> vector<16x32xf32>
    %165 = arith.addf %124, %164 : vector<16x32xf32>
    %166 = vector.extract_strided_slice %29 {offsets = [3, 0, 0], sizes = [1, 32, 8], strides = [1, 1, 1]} : vector<4x32x8xf32> to vector<1x32x8xf32>
    %167 = vector.shape_cast %166 : vector<1x32x8xf32> to vector<32x8xf32>
    %cst_71 = arith.constant dense<0.000000e+00> : vector<16x8xf32>
    %168 = tpu.matmul %27, %167, %cst_71 {dimension_numbers = #tpu.dot_dimension_numbers<[1], [0], [0], [1], [0, 0, 1, 1], [], []>} : vector<16x32xf32>, vector<32x8xf32>, vector<16x8xf32> -> vector<16x8xf32>
    %169 = vector.extract_strided_slice %31 {offsets = [3, 0, 0], sizes = [1, 1, 8], strides = [1, 1, 1]} : vector<4x1x8xf32> to vector<1x1x8xf32>
    %170 = vector.shape_cast %169 : vector<1x1x8xf32> to vector<1x8xf32>
    %171 = vector.broadcast %170 : vector<1x8xf32> to vector<16x8xf32>
    %172 = arith.addf %168, %171 : vector<16x8xf32>
    %173 = vector.extract_strided_slice %33 {offsets = [3, 0, 0], sizes = [1, 32, 8], strides = [1, 1, 1]} : vector<4x32x8xf32> to vector<1x32x8xf32>
    %174 = vector.shape_cast %173 : vector<1x32x8xf32> to vector<32x8xf32>
    %cst_72 = arith.constant dense<0.000000e+00> : vector<16x8xf32>
    %175 = tpu.matmul %27, %174, %cst_72 {dimension_numbers = #tpu.dot_dimension_numbers<[1], [0], [0], [1], [0, 0, 1, 1], [], []>} : vector<16x32xf32>, vector<32x8xf32>, vector<16x8xf32> -> vector<16x8xf32>
    %176 = vector.extract_strided_slice %35 {offsets = [3, 0, 0], sizes = [1, 1, 8], strides = [1, 1, 1]} : vector<4x1x8xf32> to vector<1x1x8xf32>
    %177 = vector.shape_cast %176 : vector<1x1x8xf32> to vector<1x8xf32>
    %178 = vector.broadcast %177 : vector<1x8xf32> to vector<16x8xf32>
    %179 = arith.addf %175, %178 : vector<16x8xf32>
    %180 = vector.extract_strided_slice %37 {offsets = [3, 0, 0], sizes = [1, 32, 8], strides = [1, 1, 1]} : vector<4x32x8xf32> to vector<1x32x8xf32>
    %181 = vector.shape_cast %180 : vector<1x32x8xf32> to vector<32x8xf32>
    %cst_73 = arith.constant dense<0.000000e+00> : vector<16x8xf32>
    %182 = tpu.matmul %27, %181, %cst_73 {dimension_numbers = #tpu.dot_dimension_numbers<[1], [0], [0], [1], [0, 0, 1, 1], [], []>} : vector<16x32xf32>, vector<32x8xf32>, vector<16x8xf32> -> vector<16x8xf32>
    %183 = vector.extract_strided_slice %39 {offsets = [3, 0, 0], sizes = [1, 1, 8], strides = [1, 1, 1]} : vector<4x1x8xf32> to vector<1x1x8xf32>
    %184 = vector.shape_cast %183 : vector<1x1x8xf32> to vector<1x8xf32>
    %185 = vector.broadcast %184 : vector<1x8xf32> to vector<16x8xf32>
    %186 = arith.addf %182, %185 : vector<16x8xf32>
    %cst_74 = arith.constant dense<0.000000e+00> : vector<16x16xf32>
    %187 = tpu.matmul %172, %179, %cst_74 {dimension_numbers = #tpu.dot_dimension_numbers<[1], [1], [0], [0], [0, 0, 1, 0], [], []>} : vector<16x8xf32>, vector<16x8xf32>, vector<16x16xf32> -> vector<16x16xf32>
    %cst_75 = arith.constant 0.353553385 : f32
    %188 = vector.broadcast %cst_75 : f32 to vector<16x16xf32>
    %189 = arith.mulf %187, %188 : vector<16x16xf32>
    %cst_76 = arith.constant -3.40282347E+38 : f32
    %190 = vector.broadcast %cst_76 : f32 to vector<16x16xf32>
    %191 = arith.select %2, %189, %190 : vector<16x16xi1>, vector<16x16xf32>
    %cst_77 = arith.constant dense<0xFF800000> : vector<16xf32>
    %192 = vector.multi_reduction <maximumf>, %191, %cst_77 [1] : vector<16x16xf32> to vector<16xf32>
    %193 = vector.shape_cast %192 : vector<16xf32> to vector<16x1xf32>
    %194 = vector.broadcast %193 : vector<16x1xf32> to vector<16x16xf32>
    %195 = arith.subf %191, %194 : vector<16x16xf32>
    %196 = math.exp %195 : vector<16x16xf32>
    %cst_78 = arith.constant dense<0.000000e+00> : vector<16xf32>
    %197 = vector.multi_reduction <add>, %196, %cst_78 [1] : vector<16x16xf32> to vector<16xf32>
    %198 = vector.shape_cast %197 : vector<16xf32> to vector<16x1xf32>
    %199 = tpu.reciprocal %198 {approx = true} : vector<16x1xf32> -> vector<16x1xf32>
    %cst_79 = arith.constant dense<0.000000e+00> : vector<16x8xf32>
    %200 = tpu.matmul %196, %186, %cst_79 {dimension_numbers = #tpu.dot_dimension_numbers<[1], [0], [0], [1], [0, 0, 1, 1], [], []>} : vector<16x16xf32>, vector<16x8xf32>, vector<16x8xf32> -> vector<16x8xf32>
    %201 = vector.broadcast %199 : vector<16x1xf32> to vector<16x8xf32>
    %202 = arith.mulf %200, %201 : vector<16x8xf32>
    %203 = vector.extract_strided_slice %41 {offsets = [3, 0, 0], sizes = [1, 8, 32], strides = [1, 1, 1]} : vector<4x8x32xf32> to vector<1x8x32xf32>
    %204 = vector.shape_cast %203 : vector<1x8x32xf32> to vector<8x32xf32>
    %cst_80 = arith.constant dense<0.000000e+00> : vector<16x32xf32>
    %205 = tpu.matmul %202, %204, %cst_80 {dimension_numbers = #tpu.dot_dimension_numbers<[1], [0], [0], [1], [0, 0, 1, 1], [], []>} : vector<16x8xf32>, vector<8x32xf32>, vector<16x32xf32> -> vector<16x32xf32>
    %206 = arith.addf %165, %205 : vector<16x32xf32>
    %207 = arith.addf %27, %206 : vector<16x32xf32>
    %c0_81 = arith.constant 0 : index
    %c0_82 = arith.constant 0 : index
    %c0_83 = arith.constant 0 : index
    %208 = vector.load %arg11[%c0_81, %c0_82, %c0_83] : memref<2x1x32xf32, #tpu.memory_space<vmem>>, vector<1x1x32xf32>
    %209 = vector.shape_cast %208 : vector<1x1x32xf32> to vector<1x32xf32>
    %210 = vector.broadcast %209 : vector<1x32xf32> to vector<16x32xf32>
    %211 = arith.addf %207, %210 : vector<16x32xf32>
    %c0_84 = arith.constant 0 : index
    %c0_85 = arith.constant 0 : index
    %c0_86 = arith.constant 0 : index
    %212 = vector.load %arg12[%c0_84, %c0_85, %c0_86] : memref<2x1x32xf32, #tpu.memory_space<vmem>>, vector<1x1x32xf32>
    %213 = vector.shape_cast %212 : vector<1x1x32xf32> to vector<1x32xf32>
    %c0_87 = arith.constant 0 : index
    %c0_88 = arith.constant 0 : index
    %c0_89 = arith.constant 0 : index
    %214 = vector.load %arg13[%c0_87, %c0_88, %c0_89] : memref<2x1x32xf32, #tpu.memory_space<vmem>>, vector<1x1x32xf32>
    %215 = vector.shape_cast %214 : vector<1x1x32xf32> to vector<1x32xf32>
    %cst_90 = arith.constant dense<0.000000e+00> : vector<16xf32>
    %216 = vector.multi_reduction <add>, %211, %cst_90 [1] : vector<16x32xf32> to vector<16xf32>
    %217 = vector.shape_cast %216 : vector<16xf32> to vector<16x1xf32>
    %cst_91 = arith.constant 3.200000e+01 : f32
    %218 = vector.broadcast %cst_91 : f32 to vector<16x1xf32>
    %219 = arith.divf %217, %218 : vector<16x1xf32>
    %220 = vector.broadcast %219 : vector<16x1xf32> to vector<16x32xf32>
    %221 = arith.subf %211, %220 : vector<16x32xf32>
    %222 = arith.mulf %221, %221 : vector<16x32xf32>
    %cst_92 = arith.constant dense<0.000000e+00> : vector<16xf32>
    %223 = vector.multi_reduction <add>, %222, %cst_92 [1] : vector<16x32xf32> to vector<16xf32>
    %224 = vector.shape_cast %223 : vector<16xf32> to vector<16x1xf32>
    %cst_93 = arith.constant 3.200000e+01 : f32
    %225 = vector.broadcast %cst_93 : f32 to vector<16x1xf32>
    %226 = arith.divf %224, %225 : vector<16x1xf32>
    %227 = vector.broadcast %219 : vector<16x1xf32> to vector<16x32xf32>
    %228 = arith.subf %211, %227 : vector<16x32xf32>
    %cst_94 = arith.constant 9.99999996E-13 : f32
    %229 = vector.broadcast %cst_94 : f32 to vector<16x1xf32>
    %230 = arith.addf %226, %229 : vector<16x1xf32>
    %231 = math.rsqrt %230 : vector<16x1xf32>
    %232 = vector.broadcast %231 : vector<16x1xf32> to vector<16x32xf32>
    %233 = arith.mulf %228, %232 : vector<16x32xf32>
    %234 = vector.broadcast %213 : vector<1x32xf32> to vector<16x32xf32>
    %235 = arith.mulf %233, %234 : vector<16x32xf32>
    %236 = vector.broadcast %215 : vector<1x32xf32> to vector<16x32xf32>
    %237 = arith.addf %235, %236 : vector<16x32xf32>
    %c0_95 = arith.constant 0 : index
    %c0_96 = arith.constant 0 : index
    %c0_97 = arith.constant 0 : index
    %238 = vector.load %arg14[%c0_95, %c0_96, %c0_97] : memref<2x32x64xf32, #tpu.memory_space<vmem>>, vector<1x32x64xf32>
    %239 = vector.shape_cast %238 : vector<1x32x64xf32> to vector<32x64xf32>
    %cst_98 = arith.constant dense<0.000000e+00> : vector<16x64xf32>
    %240 = tpu.matmul %237, %239, %cst_98 {dimension_numbers = #tpu.dot_dimension_numbers<[1], [0], [0], [1], [0, 0, 1, 1], [], []>} : vector<16x32xf32>, vector<32x64xf32>, vector<16x64xf32> -> vector<16x64xf32>
    %c0_99 = arith.constant 0 : index
    %c0_100 = arith.constant 0 : index
    %c0_101 = arith.constant 0 : index
    %241 = vector.load %arg15[%c0_99, %c0_100, %c0_101] : memref<2x1x64xf32, #tpu.memory_space<vmem>>, vector<1x1x64xf32>
    %242 = vector.shape_cast %241 : vector<1x1x64xf32> to vector<1x64xf32>
    %243 = vector.broadcast %242 : vector<1x64xf32> to vector<16x64xf32>
    %244 = arith.addf %240, %243 : vector<16x64xf32>
    %cst_102 = arith.constant 5.000000e-01 : f32
    %245 = vector.broadcast %cst_102 : f32 to vector<16x64xf32>
    %246 = arith.mulf %245, %244 : vector<16x64xf32>
    %cst_103 = arith.constant 0.707106769 : f32
    %247 = vector.broadcast %cst_103 : f32 to vector<16x64xf32>
    %248 = arith.mulf %244, %247 : vector<16x64xf32>
    %249 = math.erf %248 : vector<16x64xf32>
    %cst_104 = arith.constant 1.000000e+00 : f32
    %250 = vector.broadcast %cst_104 : f32 to vector<16x64xf32>
    %251 = arith.addf %250, %249 : vector<16x64xf32>
    %252 = arith.mulf %246, %251 : vector<16x64xf32>
    %c0_105 = arith.constant 0 : index
    %c0_106 = arith.constant 0 : index
    %c0_107 = arith.constant 0 : index
    %253 = vector.load %arg16[%c0_105, %c0_106, %c0_107] : memref<2x64x32xf32, #tpu.memory_space<vmem>>, vector<1x64x32xf32>
    %254 = vector.shape_cast %253 : vector<1x64x32xf32> to vector<64x32xf32>
    %cst_108 = arith.constant dense<0.000000e+00> : vector<16x32xf32>
    %255 = tpu.matmul %252, %254, %cst_108 {dimension_numbers = #tpu.dot_dimension_numbers<[1], [0], [0], [1], [0, 0, 1, 1], [], []>} : vector<16x64xf32>, vector<64x32xf32>, vector<16x32xf32> -> vector<16x32xf32>
    %c0_109 = arith.constant 0 : index
    %c0_110 = arith.constant 0 : index
    %c0_111 = arith.constant 0 : index
    %256 = vector.load %arg17[%c0_109, %c0_110, %c0_111] : memref<2x1x32xf32, #tpu.memory_space<vmem>>, vector<1x1x32xf32>
    %257 = vector.shape_cast %256 : vector<1x1x32xf32> to vector<1x32xf32>
    %258 = vector.broadcast %257 : vector<1x32xf32> to vector<16x32xf32>
    %259 = arith.addf %255, %258 : vector<16x32xf32>
    %260 = arith.addf %237, %259 : vector<16x32xf32>
    %c0_112 = arith.constant 0 : index
    %c0_113 = arith.constant 0 : index
    %c0_114 = arith.constant 0 : index
    %261 = vector.load %arg18[%c0_112, %c0_113, %c0_114] : memref<2x1x32xf32, #tpu.memory_space<vmem>>, vector<1x1x32xf32>
    %262 = vector.shape_cast %261 : vector<1x1x32xf32> to vector<1x32xf32>
    %c0_115 = arith.constant 0 : index
    %c0_116 = arith.constant 0 : index
    %c0_117 = arith.constant 0 : index
    %263 = vector.load %arg19[%c0_115, %c0_116, %c0_117] : memref<2x1x32xf32, #tpu.memory_space<vmem>>, vector<1x1x32xf32>
    %264 = vector.shape_cast %263 : vector<1x1x32xf32> to vector<1x32xf32>
    %cst_118 = arith.constant dense<0.000000e+00> : vector<16xf32>
    %265 = vector.multi_reduction <add>, %260, %cst_118 [1] : vector<16x32xf32> to vector<16xf32>
    %266 = vector.shape_cast %265 : vector<16xf32> to vector<16x1xf32>
    %cst_119 = arith.constant 3.200000e+01 : f32
    %267 = vector.broadcast %cst_119 : f32 to vector<16x1xf32>
    %268 = arith.divf %266, %267 : vector<16x1xf32>
    %269 = vector.broadcast %268 : vector<16x1xf32> to vector<16x32xf32>
    %270 = arith.subf %260, %269 : vector<16x32xf32>
    %271 = arith.mulf %270, %270 : vector<16x32xf32>
    %cst_120 = arith.constant dense<0.000000e+00> : vector<16xf32>
    %272 = vector.multi_reduction <add>, %271, %cst_120 [1] : vector<16x32xf32> to vector<16xf32>
    %273 = vector.shape_cast %272 : vector<16xf32> to vector<16x1xf32>
    %cst_121 = arith.constant 3.200000e+01 : f32
    %274 = vector.broadcast %cst_121 : f32 to vector<16x1xf32>
    %275 = arith.divf %273, %274 : vector<16x1xf32>
    %276 = vector.broadcast %268 : vector<16x1xf32> to vector<16x32xf32>
    %277 = arith.subf %260, %276 : vector<16x32xf32>
    %cst_122 = arith.constant 9.99999996E-13 : f32
    %278 = vector.broadcast %cst_122 : f32 to vector<16x1xf32>
    %279 = arith.addf %275, %278 : vector<16x1xf32>
    %280 = math.rsqrt %279 : vector<16x1xf32>
    %281 = vector.broadcast %280 : vector<16x1xf32> to vector<16x32xf32>
    %282 = arith.mulf %277, %281 : vector<16x32xf32>
    %283 = vector.broadcast %262 : vector<1x32xf32> to vector<16x32xf32>
    %284 = arith.mulf %282, %283 : vector<16x32xf32>
    %285 = vector.broadcast %264 : vector<1x32xf32> to vector<16x32xf32>
    %286 = arith.addf %284, %285 : vector<16x32xf32>
    %c1 = arith.constant 1 : index
    %c0_123 = arith.constant 0 : index
    %c0_124 = arith.constant 0 : index
    %c0_125 = arith.constant 0 : index
    %287 = vector.load %arg4[%c1, %c0_123, %c0_124, %c0_125] : memref<2x4x32x8xf32, #tpu.memory_space<vmem>>, vector<1x4x32x8xf32>
    %288 = vector.shape_cast %287 : vector<1x4x32x8xf32> to vector<4x32x8xf32>
    %c1_126 = arith.constant 1 : index
    %c0_127 = arith.constant 0 : index
    %c0_128 = arith.constant 0 : index
    %c0_129 = arith.constant 0 : index
    %289 = vector.load %arg5[%c1_126, %c0_127, %c0_128, %c0_129] : memref<2x4x1x8xf32, #tpu.memory_space<vmem>>, vector<1x4x1x8xf32>
    %290 = vector.shape_cast %289 : vector<1x4x1x8xf32> to vector<4x1x8xf32>
    %c1_130 = arith.constant 1 : index
    %c0_131 = arith.constant 0 : index
    %c0_132 = arith.constant 0 : index
    %c0_133 = arith.constant 0 : index
    %291 = vector.load %arg6[%c1_130, %c0_131, %c0_132, %c0_133] : memref<2x4x32x8xf32, #tpu.memory_space<vmem>>, vector<1x4x32x8xf32>
    %292 = vector.shape_cast %291 : vector<1x4x32x8xf32> to vector<4x32x8xf32>
    %c1_134 = arith.constant 1 : index
    %c0_135 = arith.constant 0 : index
    %c0_136 = arith.constant 0 : index
    %c0_137 = arith.constant 0 : index
    %293 = vector.load %arg7[%c1_134, %c0_135, %c0_136, %c0_137] : memref<2x4x1x8xf32, #tpu.memory_space<vmem>>, vector<1x4x1x8xf32>
    %294 = vector.shape_cast %293 : vector<1x4x1x8xf32> to vector<4x1x8xf32>
    %c1_138 = arith.constant 1 : index
    %c0_139 = arith.constant 0 : index
    %c0_140 = arith.constant 0 : index
    %c0_141 = arith.constant 0 : index
    %295 = vector.load %arg8[%c1_138, %c0_139, %c0_140, %c0_141] : memref<2x4x32x8xf32, #tpu.memory_space<vmem>>, vector<1x4x32x8xf32>
    %296 = vector.shape_cast %295 : vector<1x4x32x8xf32> to vector<4x32x8xf32>
    %c1_142 = arith.constant 1 : index
    %c0_143 = arith.constant 0 : index
    %c0_144 = arith.constant 0 : index
    %c0_145 = arith.constant 0 : index
    %297 = vector.load %arg9[%c1_142, %c0_143, %c0_144, %c0_145] : memref<2x4x1x8xf32, #tpu.memory_space<vmem>>, vector<1x4x1x8xf32>
    %298 = vector.shape_cast %297 : vector<1x4x1x8xf32> to vector<4x1x8xf32>
    %c1_146 = arith.constant 1 : index
    %c0_147 = arith.constant 0 : index
    %c0_148 = arith.constant 0 : index
    %c0_149 = arith.constant 0 : index
    %299 = vector.load %arg10[%c1_146, %c0_147, %c0_148, %c0_149] : memref<2x4x8x32xf32, #tpu.memory_space<vmem>>, vector<1x4x8x32xf32>
    %300 = vector.shape_cast %299 : vector<1x4x8x32xf32> to vector<4x8x32xf32>
    %cst_150 = arith.constant 0.000000e+00 : f32
    %301 = vector.broadcast %cst_150 : f32 to vector<16x32xf32>
    %302 = vector.extract_strided_slice %288 {offsets = [0, 0, 0], sizes = [1, 32, 8], strides = [1, 1, 1]} : vector<4x32x8xf32> to vector<1x32x8xf32>
    %303 = vector.shape_cast %302 : vector<1x32x8xf32> to vector<32x8xf32>
    %cst_151 = arith.constant dense<0.000000e+00> : vector<16x8xf32>
    %304 = tpu.matmul %286, %303, %cst_151 {dimension_numbers = #tpu.dot_dimension_numbers<[1], [0], [0], [1], [0, 0, 1, 1], [], []>} : vector<16x32xf32>, vector<32x8xf32>, vector<16x8xf32> -> vector<16x8xf32>
    %305 = vector.extract_strided_slice %290 {offsets = [0, 0, 0], sizes = [1, 1, 8], strides = [1, 1, 1]} : vector<4x1x8xf32> to vector<1x1x8xf32>
    %306 = vector.shape_cast %305 : vector<1x1x8xf32> to vector<1x8xf32>
    %307 = vector.broadcast %306 : vector<1x8xf32> to vector<16x8xf32>
    %308 = arith.addf %304, %307 : vector<16x8xf32>
    %309 = vector.extract_strided_slice %292 {offsets = [0, 0, 0], sizes = [1, 32, 8], strides = [1, 1, 1]} : vector<4x32x8xf32> to vector<1x32x8xf32>
    %310 = vector.shape_cast %309 : vector<1x32x8xf32> to vector<32x8xf32>
    %cst_152 = arith.constant dense<0.000000e+00> : vector<16x8xf32>
    %311 = tpu.matmul %286, %310, %cst_152 {dimension_numbers = #tpu.dot_dimension_numbers<[1], [0], [0], [1], [0, 0, 1, 1], [], []>} : vector<16x32xf32>, vector<32x8xf32>, vector<16x8xf32> -> vector<16x8xf32>
    %312 = vector.extract_strided_slice %294 {offsets = [0, 0, 0], sizes = [1, 1, 8], strides = [1, 1, 1]} : vector<4x1x8xf32> to vector<1x1x8xf32>
    %313 = vector.shape_cast %312 : vector<1x1x8xf32> to vector<1x8xf32>
    %314 = vector.broadcast %313 : vector<1x8xf32> to vector<16x8xf32>
    %315 = arith.addf %311, %314 : vector<16x8xf32>
    %316 = vector.extract_strided_slice %296 {offsets = [0, 0, 0], sizes = [1, 32, 8], strides = [1, 1, 1]} : vector<4x32x8xf32> to vector<1x32x8xf32>
    %317 = vector.shape_cast %316 : vector<1x32x8xf32> to vector<32x8xf32>
    %cst_153 = arith.constant dense<0.000000e+00> : vector<16x8xf32>
    %318 = tpu.matmul %286, %317, %cst_153 {dimension_numbers = #tpu.dot_dimension_numbers<[1], [0], [0], [1], [0, 0, 1, 1], [], []>} : vector<16x32xf32>, vector<32x8xf32>, vector<16x8xf32> -> vector<16x8xf32>
    %319 = vector.extract_strided_slice %298 {offsets = [0, 0, 0], sizes = [1, 1, 8], strides = [1, 1, 1]} : vector<4x1x8xf32> to vector<1x1x8xf32>
    %320 = vector.shape_cast %319 : vector<1x1x8xf32> to vector<1x8xf32>
    %321 = vector.broadcast %320 : vector<1x8xf32> to vector<16x8xf32>
    %322 = arith.addf %318, %321 : vector<16x8xf32>
    %cst_154 = arith.constant dense<0.000000e+00> : vector<16x16xf32>
    %323 = tpu.matmul %308, %315, %cst_154 {dimension_numbers = #tpu.dot_dimension_numbers<[1], [1], [0], [0], [0, 0, 1, 0], [], []>} : vector<16x8xf32>, vector<16x8xf32>, vector<16x16xf32> -> vector<16x16xf32>
    %cst_155 = arith.constant 0.353553385 : f32
    %324 = vector.broadcast %cst_155 : f32 to vector<16x16xf32>
    %325 = arith.mulf %323, %324 : vector<16x16xf32>
    %cst_156 = arith.constant -3.40282347E+38 : f32
    %326 = vector.broadcast %cst_156 : f32 to vector<16x16xf32>
    %327 = arith.select %2, %325, %326 : vector<16x16xi1>, vector<16x16xf32>
    %cst_157 = arith.constant dense<0xFF800000> : vector<16xf32>
    %328 = vector.multi_reduction <maximumf>, %327, %cst_157 [1] : vector<16x16xf32> to vector<16xf32>
    %329 = vector.shape_cast %328 : vector<16xf32> to vector<16x1xf32>
    %330 = vector.broadcast %329 : vector<16x1xf32> to vector<16x16xf32>
    %331 = arith.subf %327, %330 : vector<16x16xf32>
    %332 = math.exp %331 : vector<16x16xf32>
    %cst_158 = arith.constant dense<0.000000e+00> : vector<16xf32>
    %333 = vector.multi_reduction <add>, %332, %cst_158 [1] : vector<16x16xf32> to vector<16xf32>
    %334 = vector.shape_cast %333 : vector<16xf32> to vector<16x1xf32>
    %335 = tpu.reciprocal %334 {approx = true} : vector<16x1xf32> -> vector<16x1xf32>
    %cst_159 = arith.constant dense<0.000000e+00> : vector<16x8xf32>
    %336 = tpu.matmul %332, %322, %cst_159 {dimension_numbers = #tpu.dot_dimension_numbers<[1], [0], [0], [1], [0, 0, 1, 1], [], []>} : vector<16x16xf32>, vector<16x8xf32>, vector<16x8xf32> -> vector<16x8xf32>
    %337 = vector.broadcast %335 : vector<16x1xf32> to vector<16x8xf32>
    %338 = arith.mulf %336, %337 : vector<16x8xf32>
    %339 = vector.extract_strided_slice %300 {offsets = [0, 0, 0], sizes = [1, 8, 32], strides = [1, 1, 1]} : vector<4x8x32xf32> to vector<1x8x32xf32>
    %340 = vector.shape_cast %339 : vector<1x8x32xf32> to vector<8x32xf32>
    %cst_160 = arith.constant dense<0.000000e+00> : vector<16x32xf32>
    %341 = tpu.matmul %338, %340, %cst_160 {dimension_numbers = #tpu.dot_dimension_numbers<[1], [0], [0], [1], [0, 0, 1, 1], [], []>} : vector<16x8xf32>, vector<8x32xf32>, vector<16x32xf32> -> vector<16x32xf32>
    %342 = arith.addf %301, %341 : vector<16x32xf32>
    %343 = vector.extract_strided_slice %288 {offsets = [1, 0, 0], sizes = [1, 32, 8], strides = [1, 1, 1]} : vector<4x32x8xf32> to vector<1x32x8xf32>
    %344 = vector.shape_cast %343 : vector<1x32x8xf32> to vector<32x8xf32>
    %cst_161 = arith.constant dense<0.000000e+00> : vector<16x8xf32>
    %345 = tpu.matmul %286, %344, %cst_161 {dimension_numbers = #tpu.dot_dimension_numbers<[1], [0], [0], [1], [0, 0, 1, 1], [], []>} : vector<16x32xf32>, vector<32x8xf32>, vector<16x8xf32> -> vector<16x8xf32>
    %346 = vector.extract_strided_slice %290 {offsets = [1, 0, 0], sizes = [1, 1, 8], strides = [1, 1, 1]} : vector<4x1x8xf32> to vector<1x1x8xf32>
    %347 = vector.shape_cast %346 : vector<1x1x8xf32> to vector<1x8xf32>
    %348 = vector.broadcast %347 : vector<1x8xf32> to vector<16x8xf32>
    %349 = arith.addf %345, %348 : vector<16x8xf32>
    %350 = vector.extract_strided_slice %292 {offsets = [1, 0, 0], sizes = [1, 32, 8], strides = [1, 1, 1]} : vector<4x32x8xf32> to vector<1x32x8xf32>
    %351 = vector.shape_cast %350 : vector<1x32x8xf32> to vector<32x8xf32>
    %cst_162 = arith.constant dense<0.000000e+00> : vector<16x8xf32>
    %352 = tpu.matmul %286, %351, %cst_162 {dimension_numbers = #tpu.dot_dimension_numbers<[1], [0], [0], [1], [0, 0, 1, 1], [], []>} : vector<16x32xf32>, vector<32x8xf32>, vector<16x8xf32> -> vector<16x8xf32>
    %353 = vector.extract_strided_slice %294 {offsets = [1, 0, 0], sizes = [1, 1, 8], strides = [1, 1, 1]} : vector<4x1x8xf32> to vector<1x1x8xf32>
    %354 = vector.shape_cast %353 : vector<1x1x8xf32> to vector<1x8xf32>
    %355 = vector.broadcast %354 : vector<1x8xf32> to vector<16x8xf32>
    %356 = arith.addf %352, %355 : vector<16x8xf32>
    %357 = vector.extract_strided_slice %296 {offsets = [1, 0, 0], sizes = [1, 32, 8], strides = [1, 1, 1]} : vector<4x32x8xf32> to vector<1x32x8xf32>
    %358 = vector.shape_cast %357 : vector<1x32x8xf32> to vector<32x8xf32>
    %cst_163 = arith.constant dense<0.000000e+00> : vector<16x8xf32>
    %359 = tpu.matmul %286, %358, %cst_163 {dimension_numbers = #tpu.dot_dimension_numbers<[1], [0], [0], [1], [0, 0, 1, 1], [], []>} : vector<16x32xf32>, vector<32x8xf32>, vector<16x8xf32> -> vector<16x8xf32>
    %360 = vector.extract_strided_slice %298 {offsets = [1, 0, 0], sizes = [1, 1, 8], strides = [1, 1, 1]} : vector<4x1x8xf32> to vector<1x1x8xf32>
    %361 = vector.shape_cast %360 : vector<1x1x8xf32> to vector<1x8xf32>
    %362 = vector.broadcast %361 : vector<1x8xf32> to vector<16x8xf32>
    %363 = arith.addf %359, %362 : vector<16x8xf32>
    %cst_164 = arith.constant dense<0.000000e+00> : vector<16x16xf32>
    %364 = tpu.matmul %349, %356, %cst_164 {dimension_numbers = #tpu.dot_dimension_numbers<[1], [1], [0], [0], [0, 0, 1, 0], [], []>} : vector<16x8xf32>, vector<16x8xf32>, vector<16x16xf32> -> vector<16x16xf32>
    %cst_165 = arith.constant 0.353553385 : f32
    %365 = vector.broadcast %cst_165 : f32 to vector<16x16xf32>
    %366 = arith.mulf %364, %365 : vector<16x16xf32>
    %cst_166 = arith.constant -3.40282347E+38 : f32
    %367 = vector.broadcast %cst_166 : f32 to vector<16x16xf32>
    %368 = arith.select %2, %366, %367 : vector<16x16xi1>, vector<16x16xf32>
    %cst_167 = arith.constant dense<0xFF800000> : vector<16xf32>
    %369 = vector.multi_reduction <maximumf>, %368, %cst_167 [1] : vector<16x16xf32> to vector<16xf32>
    %370 = vector.shape_cast %369 : vector<16xf32> to vector<16x1xf32>
    %371 = vector.broadcast %370 : vector<16x1xf32> to vector<16x16xf32>
    %372 = arith.subf %368, %371 : vector<16x16xf32>
    %373 = math.exp %372 : vector<16x16xf32>
    %cst_168 = arith.constant dense<0.000000e+00> : vector<16xf32>
    %374 = vector.multi_reduction <add>, %373, %cst_168 [1] : vector<16x16xf32> to vector<16xf32>
    %375 = vector.shape_cast %374 : vector<16xf32> to vector<16x1xf32>
    %376 = tpu.reciprocal %375 {approx = true} : vector<16x1xf32> -> vector<16x1xf32>
    %cst_169 = arith.constant dense<0.000000e+00> : vector<16x8xf32>
    %377 = tpu.matmul %373, %363, %cst_169 {dimension_numbers = #tpu.dot_dimension_numbers<[1], [0], [0], [1], [0, 0, 1, 1], [], []>} : vector<16x16xf32>, vector<16x8xf32>, vector<16x8xf32> -> vector<16x8xf32>
    %378 = vector.broadcast %376 : vector<16x1xf32> to vector<16x8xf32>
    %379 = arith.mulf %377, %378 : vector<16x8xf32>
    %380 = vector.extract_strided_slice %300 {offsets = [1, 0, 0], sizes = [1, 8, 32], strides = [1, 1, 1]} : vector<4x8x32xf32> to vector<1x8x32xf32>
    %381 = vector.shape_cast %380 : vector<1x8x32xf32> to vector<8x32xf32>
    %cst_170 = arith.constant dense<0.000000e+00> : vector<16x32xf32>
    %382 = tpu.matmul %379, %381, %cst_170 {dimension_numbers = #tpu.dot_dimension_numbers<[1], [0], [0], [1], [0, 0, 1, 1], [], []>} : vector<16x8xf32>, vector<8x32xf32>, vector<16x32xf32> -> vector<16x32xf32>
    %383 = arith.addf %342, %382 : vector<16x32xf32>
    %384 = vector.extract_strided_slice %288 {offsets = [2, 0, 0], sizes = [1, 32, 8], strides = [1, 1, 1]} : vector<4x32x8xf32> to vector<1x32x8xf32>
    %385 = vector.shape_cast %384 : vector<1x32x8xf32> to vector<32x8xf32>
    %cst_171 = arith.constant dense<0.000000e+00> : vector<16x8xf32>
    %386 = tpu.matmul %286, %385, %cst_171 {dimension_numbers = #tpu.dot_dimension_numbers<[1], [0], [0], [1], [0, 0, 1, 1], [], []>} : vector<16x32xf32>, vector<32x8xf32>, vector<16x8xf32> -> vector<16x8xf32>
    %387 = vector.extract_strided_slice %290 {offsets = [2, 0, 0], sizes = [1, 1, 8], strides = [1, 1, 1]} : vector<4x1x8xf32> to vector<1x1x8xf32>
    %388 = vector.shape_cast %387 : vector<1x1x8xf32> to vector<1x8xf32>
    %389 = vector.broadcast %388 : vector<1x8xf32> to vector<16x8xf32>
    %390 = arith.addf %386, %389 : vector<16x8xf32>
    %391 = vector.extract_strided_slice %292 {offsets = [2, 0, 0], sizes = [1, 32, 8], strides = [1, 1, 1]} : vector<4x32x8xf32> to vector<1x32x8xf32>
    %392 = vector.shape_cast %391 : vector<1x32x8xf32> to vector<32x8xf32>
    %cst_172 = arith.constant dense<0.000000e+00> : vector<16x8xf32>
    %393 = tpu.matmul %286, %392, %cst_172 {dimension_numbers = #tpu.dot_dimension_numbers<[1], [0], [0], [1], [0, 0, 1, 1], [], []>} : vector<16x32xf32>, vector<32x8xf32>, vector<16x8xf32> -> vector<16x8xf32>
    %394 = vector.extract_strided_slice %294 {offsets = [2, 0, 0], sizes = [1, 1, 8], strides = [1, 1, 1]} : vector<4x1x8xf32> to vector<1x1x8xf32>
    %395 = vector.shape_cast %394 : vector<1x1x8xf32> to vector<1x8xf32>
    %396 = vector.broadcast %395 : vector<1x8xf32> to vector<16x8xf32>
    %397 = arith.addf %393, %396 : vector<16x8xf32>
    %398 = vector.extract_strided_slice %296 {offsets = [2, 0, 0], sizes = [1, 32, 8], strides = [1, 1, 1]} : vector<4x32x8xf32> to vector<1x32x8xf32>
    %399 = vector.shape_cast %398 : vector<1x32x8xf32> to vector<32x8xf32>
    %cst_173 = arith.constant dense<0.000000e+00> : vector<16x8xf32>
    %400 = tpu.matmul %286, %399, %cst_173 {dimension_numbers = #tpu.dot_dimension_numbers<[1], [0], [0], [1], [0, 0, 1, 1], [], []>} : vector<16x32xf32>, vector<32x8xf32>, vector<16x8xf32> -> vector<16x8xf32>
    %401 = vector.extract_strided_slice %298 {offsets = [2, 0, 0], sizes = [1, 1, 8], strides = [1, 1, 1]} : vector<4x1x8xf32> to vector<1x1x8xf32>
    %402 = vector.shape_cast %401 : vector<1x1x8xf32> to vector<1x8xf32>
    %403 = vector.broadcast %402 : vector<1x8xf32> to vector<16x8xf32>
    %404 = arith.addf %400, %403 : vector<16x8xf32>
    %cst_174 = arith.constant dense<0.000000e+00> : vector<16x16xf32>
    %405 = tpu.matmul %390, %397, %cst_174 {dimension_numbers = #tpu.dot_dimension_numbers<[1], [1], [0], [0], [0, 0, 1, 0], [], []>} : vector<16x8xf32>, vector<16x8xf32>, vector<16x16xf32> -> vector<16x16xf32>
    %cst_175 = arith.constant 0.353553385 : f32
    %406 = vector.broadcast %cst_175 : f32 to vector<16x16xf32>
    %407 = arith.mulf %405, %406 : vector<16x16xf32>
    %cst_176 = arith.constant -3.40282347E+38 : f32
    %408 = vector.broadcast %cst_176 : f32 to vector<16x16xf32>
    %409 = arith.select %2, %407, %408 : vector<16x16xi1>, vector<16x16xf32>
    %cst_177 = arith.constant dense<0xFF800000> : vector<16xf32>
    %410 = vector.multi_reduction <maximumf>, %409, %cst_177 [1] : vector<16x16xf32> to vector<16xf32>
    %411 = vector.shape_cast %410 : vector<16xf32> to vector<16x1xf32>
    %412 = vector.broadcast %411 : vector<16x1xf32> to vector<16x16xf32>
    %413 = arith.subf %409, %412 : vector<16x16xf32>
    %414 = math.exp %413 : vector<16x16xf32>
    %cst_178 = arith.constant dense<0.000000e+00> : vector<16xf32>
    %415 = vector.multi_reduction <add>, %414, %cst_178 [1] : vector<16x16xf32> to vector<16xf32>
    %416 = vector.shape_cast %415 : vector<16xf32> to vector<16x1xf32>
    %417 = tpu.reciprocal %416 {approx = true} : vector<16x1xf32> -> vector<16x1xf32>
    %cst_179 = arith.constant dense<0.000000e+00> : vector<16x8xf32>
    %418 = tpu.matmul %414, %404, %cst_179 {dimension_numbers = #tpu.dot_dimension_numbers<[1], [0], [0], [1], [0, 0, 1, 1], [], []>} : vector<16x16xf32>, vector<16x8xf32>, vector<16x8xf32> -> vector<16x8xf32>
    %419 = vector.broadcast %417 : vector<16x1xf32> to vector<16x8xf32>
    %420 = arith.mulf %418, %419 : vector<16x8xf32>
    %421 = vector.extract_strided_slice %300 {offsets = [2, 0, 0], sizes = [1, 8, 32], strides = [1, 1, 1]} : vector<4x8x32xf32> to vector<1x8x32xf32>
    %422 = vector.shape_cast %421 : vector<1x8x32xf32> to vector<8x32xf32>
    %cst_180 = arith.constant dense<0.000000e+00> : vector<16x32xf32>
    %423 = tpu.matmul %420, %422, %cst_180 {dimension_numbers = #tpu.dot_dimension_numbers<[1], [0], [0], [1], [0, 0, 1, 1], [], []>} : vector<16x8xf32>, vector<8x32xf32>, vector<16x32xf32> -> vector<16x32xf32>
    %424 = arith.addf %383, %423 : vector<16x32xf32>
    %425 = vector.extract_strided_slice %288 {offsets = [3, 0, 0], sizes = [1, 32, 8], strides = [1, 1, 1]} : vector<4x32x8xf32> to vector<1x32x8xf32>
    %426 = vector.shape_cast %425 : vector<1x32x8xf32> to vector<32x8xf32>
    %cst_181 = arith.constant dense<0.000000e+00> : vector<16x8xf32>
    %427 = tpu.matmul %286, %426, %cst_181 {dimension_numbers = #tpu.dot_dimension_numbers<[1], [0], [0], [1], [0, 0, 1, 1], [], []>} : vector<16x32xf32>, vector<32x8xf32>, vector<16x8xf32> -> vector<16x8xf32>
    %428 = vector.extract_strided_slice %290 {offsets = [3, 0, 0], sizes = [1, 1, 8], strides = [1, 1, 1]} : vector<4x1x8xf32> to vector<1x1x8xf32>
    %429 = vector.shape_cast %428 : vector<1x1x8xf32> to vector<1x8xf32>
    %430 = vector.broadcast %429 : vector<1x8xf32> to vector<16x8xf32>
    %431 = arith.addf %427, %430 : vector<16x8xf32>
    %432 = vector.extract_strided_slice %292 {offsets = [3, 0, 0], sizes = [1, 32, 8], strides = [1, 1, 1]} : vector<4x32x8xf32> to vector<1x32x8xf32>
    %433 = vector.shape_cast %432 : vector<1x32x8xf32> to vector<32x8xf32>
    %cst_182 = arith.constant dense<0.000000e+00> : vector<16x8xf32>
    %434 = tpu.matmul %286, %433, %cst_182 {dimension_numbers = #tpu.dot_dimension_numbers<[1], [0], [0], [1], [0, 0, 1, 1], [], []>} : vector<16x32xf32>, vector<32x8xf32>, vector<16x8xf32> -> vector<16x8xf32>
    %435 = vector.extract_strided_slice %294 {offsets = [3, 0, 0], sizes = [1, 1, 8], strides = [1, 1, 1]} : vector<4x1x8xf32> to vector<1x1x8xf32>
    %436 = vector.shape_cast %435 : vector<1x1x8xf32> to vector<1x8xf32>
    %437 = vector.broadcast %436 : vector<1x8xf32> to vector<16x8xf32>
    %438 = arith.addf %434, %437 : vector<16x8xf32>
    %439 = vector.extract_strided_slice %296 {offsets = [3, 0, 0], sizes = [1, 32, 8], strides = [1, 1, 1]} : vector<4x32x8xf32> to vector<1x32x8xf32>
    %440 = vector.shape_cast %439 : vector<1x32x8xf32> to vector<32x8xf32>
    %cst_183 = arith.constant dense<0.000000e+00> : vector<16x8xf32>
    %441 = tpu.matmul %286, %440, %cst_183 {dimension_numbers = #tpu.dot_dimension_numbers<[1], [0], [0], [1], [0, 0, 1, 1], [], []>} : vector<16x32xf32>, vector<32x8xf32>, vector<16x8xf32> -> vector<16x8xf32>
    %442 = vector.extract_strided_slice %298 {offsets = [3, 0, 0], sizes = [1, 1, 8], strides = [1, 1, 1]} : vector<4x1x8xf32> to vector<1x1x8xf32>
    %443 = vector.shape_cast %442 : vector<1x1x8xf32> to vector<1x8xf32>
    %444 = vector.broadcast %443 : vector<1x8xf32> to vector<16x8xf32>
    %445 = arith.addf %441, %444 : vector<16x8xf32>
    %cst_184 = arith.constant dense<0.000000e+00> : vector<16x16xf32>
    %446 = tpu.matmul %431, %438, %cst_184 {dimension_numbers = #tpu.dot_dimension_numbers<[1], [1], [0], [0], [0, 0, 1, 0], [], []>} : vector<16x8xf32>, vector<16x8xf32>, vector<16x16xf32> -> vector<16x16xf32>
    %cst_185 = arith.constant 0.353553385 : f32
    %447 = vector.broadcast %cst_185 : f32 to vector<16x16xf32>
    %448 = arith.mulf %446, %447 : vector<16x16xf32>
    %cst_186 = arith.constant -3.40282347E+38 : f32
    %449 = vector.broadcast %cst_186 : f32 to vector<16x16xf32>
    %450 = arith.select %2, %448, %449 : vector<16x16xi1>, vector<16x16xf32>
    %cst_187 = arith.constant dense<0xFF800000> : vector<16xf32>
    %451 = vector.multi_reduction <maximumf>, %450, %cst_187 [1] : vector<16x16xf32> to vector<16xf32>
    %452 = vector.shape_cast %451 : vector<16xf32> to vector<16x1xf32>
    %453 = vector.broadcast %452 : vector<16x1xf32> to vector<16x16xf32>
    %454 = arith.subf %450, %453 : vector<16x16xf32>
    %455 = math.exp %454 : vector<16x16xf32>
    %cst_188 = arith.constant dense<0.000000e+00> : vector<16xf32>
    %456 = vector.multi_reduction <add>, %455, %cst_188 [1] : vector<16x16xf32> to vector<16xf32>
    %457 = vector.shape_cast %456 : vector<16xf32> to vector<16x1xf32>
    %458 = tpu.reciprocal %457 {approx = true} : vector<16x1xf32> -> vector<16x1xf32>
    %cst_189 = arith.constant dense<0.000000e+00> : vector<16x8xf32>
    %459 = tpu.matmul %455, %445, %cst_189 {dimension_numbers = #tpu.dot_dimension_numbers<[1], [0], [0], [1], [0, 0, 1, 1], [], []>} : vector<16x16xf32>, vector<16x8xf32>, vector<16x8xf32> -> vector<16x8xf32>
    %460 = vector.broadcast %458 : vector<16x1xf32> to vector<16x8xf32>
    %461 = arith.mulf %459, %460 : vector<16x8xf32>
    %462 = vector.extract_strided_slice %300 {offsets = [3, 0, 0], sizes = [1, 8, 32], strides = [1, 1, 1]} : vector<4x8x32xf32> to vector<1x8x32xf32>
    %463 = vector.shape_cast %462 : vector<1x8x32xf32> to vector<8x32xf32>
    %cst_190 = arith.constant dense<0.000000e+00> : vector<16x32xf32>
    %464 = tpu.matmul %461, %463, %cst_190 {dimension_numbers = #tpu.dot_dimension_numbers<[1], [0], [0], [1], [0, 0, 1, 1], [], []>} : vector<16x8xf32>, vector<8x32xf32>, vector<16x32xf32> -> vector<16x32xf32>
    %465 = arith.addf %424, %464 : vector<16x32xf32>
    %466 = arith.addf %286, %465 : vector<16x32xf32>
    %c1_191 = arith.constant 1 : index
    %c0_192 = arith.constant 0 : index
    %c0_193 = arith.constant 0 : index
    %467 = vector.load %arg11[%c1_191, %c0_192, %c0_193] : memref<2x1x32xf32, #tpu.memory_space<vmem>>, vector<1x1x32xf32>
    %468 = vector.shape_cast %467 : vector<1x1x32xf32> to vector<1x32xf32>
    %469 = vector.broadcast %468 : vector<1x32xf32> to vector<16x32xf32>
    %470 = arith.addf %466, %469 : vector<16x32xf32>
    %c1_194 = arith.constant 1 : index
    %c0_195 = arith.constant 0 : index
    %c0_196 = arith.constant 0 : index
    %471 = vector.load %arg12[%c1_194, %c0_195, %c0_196] : memref<2x1x32xf32, #tpu.memory_space<vmem>>, vector<1x1x32xf32>
    %472 = vector.shape_cast %471 : vector<1x1x32xf32> to vector<1x32xf32>
    %c1_197 = arith.constant 1 : index
    %c0_198 = arith.constant 0 : index
    %c0_199 = arith.constant 0 : index
    %473 = vector.load %arg13[%c1_197, %c0_198, %c0_199] : memref<2x1x32xf32, #tpu.memory_space<vmem>>, vector<1x1x32xf32>
    %474 = vector.shape_cast %473 : vector<1x1x32xf32> to vector<1x32xf32>
    %cst_200 = arith.constant dense<0.000000e+00> : vector<16xf32>
    %475 = vector.multi_reduction <add>, %470, %cst_200 [1] : vector<16x32xf32> to vector<16xf32>
    %476 = vector.shape_cast %475 : vector<16xf32> to vector<16x1xf32>
    %cst_201 = arith.constant 3.200000e+01 : f32
    %477 = vector.broadcast %cst_201 : f32 to vector<16x1xf32>
    %478 = arith.divf %476, %477 : vector<16x1xf32>
    %479 = vector.broadcast %478 : vector<16x1xf32> to vector<16x32xf32>
    %480 = arith.subf %470, %479 : vector<16x32xf32>
    %481 = arith.mulf %480, %480 : vector<16x32xf32>
    %cst_202 = arith.constant dense<0.000000e+00> : vector<16xf32>
    %482 = vector.multi_reduction <add>, %481, %cst_202 [1] : vector<16x32xf32> to vector<16xf32>
    %483 = vector.shape_cast %482 : vector<16xf32> to vector<16x1xf32>
    %cst_203 = arith.constant 3.200000e+01 : f32
    %484 = vector.broadcast %cst_203 : f32 to vector<16x1xf32>
    %485 = arith.divf %483, %484 : vector<16x1xf32>
    %486 = vector.broadcast %478 : vector<16x1xf32> to vector<16x32xf32>
    %487 = arith.subf %470, %486 : vector<16x32xf32>
    %cst_204 = arith.constant 9.99999996E-13 : f32
    %488 = vector.broadcast %cst_204 : f32 to vector<16x1xf32>
    %489 = arith.addf %485, %488 : vector<16x1xf32>
    %490 = math.rsqrt %489 : vector<16x1xf32>
    %491 = vector.broadcast %490 : vector<16x1xf32> to vector<16x32xf32>
    %492 = arith.mulf %487, %491 : vector<16x32xf32>
    %493 = vector.broadcast %472 : vector<1x32xf32> to vector<16x32xf32>
    %494 = arith.mulf %492, %493 : vector<16x32xf32>
    %495 = vector.broadcast %474 : vector<1x32xf32> to vector<16x32xf32>
    %496 = arith.addf %494, %495 : vector<16x32xf32>
    %c1_205 = arith.constant 1 : index
    %c0_206 = arith.constant 0 : index
    %c0_207 = arith.constant 0 : index
    %497 = vector.load %arg14[%c1_205, %c0_206, %c0_207] : memref<2x32x64xf32, #tpu.memory_space<vmem>>, vector<1x32x64xf32>
    %498 = vector.shape_cast %497 : vector<1x32x64xf32> to vector<32x64xf32>
    %cst_208 = arith.constant dense<0.000000e+00> : vector<16x64xf32>
    %499 = tpu.matmul %496, %498, %cst_208 {dimension_numbers = #tpu.dot_dimension_numbers<[1], [0], [0], [1], [0, 0, 1, 1], [], []>} : vector<16x32xf32>, vector<32x64xf32>, vector<16x64xf32> -> vector<16x64xf32>
    %c1_209 = arith.constant 1 : index
    %c0_210 = arith.constant 0 : index
    %c0_211 = arith.constant 0 : index
    %500 = vector.load %arg15[%c1_209, %c0_210, %c0_211] : memref<2x1x64xf32, #tpu.memory_space<vmem>>, vector<1x1x64xf32>
    %501 = vector.shape_cast %500 : vector<1x1x64xf32> to vector<1x64xf32>
    %502 = vector.broadcast %501 : vector<1x64xf32> to vector<16x64xf32>
    %503 = arith.addf %499, %502 : vector<16x64xf32>
    %cst_212 = arith.constant 5.000000e-01 : f32
    %504 = vector.broadcast %cst_212 : f32 to vector<16x64xf32>
    %505 = arith.mulf %504, %503 : vector<16x64xf32>
    %cst_213 = arith.constant 0.707106769 : f32
    %506 = vector.broadcast %cst_213 : f32 to vector<16x64xf32>
    %507 = arith.mulf %503, %506 : vector<16x64xf32>
    %508 = math.erf %507 : vector<16x64xf32>
    %cst_214 = arith.constant 1.000000e+00 : f32
    %509 = vector.broadcast %cst_214 : f32 to vector<16x64xf32>
    %510 = arith.addf %509, %508 : vector<16x64xf32>
    %511 = arith.mulf %505, %510 : vector<16x64xf32>
    %c1_215 = arith.constant 1 : index
    %c0_216 = arith.constant 0 : index
    %c0_217 = arith.constant 0 : index
    %512 = vector.load %arg16[%c1_215, %c0_216, %c0_217] : memref<2x64x32xf32, #tpu.memory_space<vmem>>, vector<1x64x32xf32>
    %513 = vector.shape_cast %512 : vector<1x64x32xf32> to vector<64x32xf32>
    %cst_218 = arith.constant dense<0.000000e+00> : vector<16x32xf32>
    %514 = tpu.matmul %511, %513, %cst_218 {dimension_numbers = #tpu.dot_dimension_numbers<[1], [0], [0], [1], [0, 0, 1, 1], [], []>} : vector<16x64xf32>, vector<64x32xf32>, vector<16x32xf32> -> vector<16x32xf32>
    %c1_219 = arith.constant 1 : index
    %c0_220 = arith.constant 0 : index
    %c0_221 = arith.constant 0 : index
    %515 = vector.load %arg17[%c1_219, %c0_220, %c0_221] : memref<2x1x32xf32, #tpu.memory_space<vmem>>, vector<1x1x32xf32>
    %516 = vector.shape_cast %515 : vector<1x1x32xf32> to vector<1x32xf32>
    %517 = vector.broadcast %516 : vector<1x32xf32> to vector<16x32xf32>
    %518 = arith.addf %514, %517 : vector<16x32xf32>
    %519 = arith.addf %496, %518 : vector<16x32xf32>
    %c1_222 = arith.constant 1 : index
    %c0_223 = arith.constant 0 : index
    %c0_224 = arith.constant 0 : index
    %520 = vector.load %arg18[%c1_222, %c0_223, %c0_224] : memref<2x1x32xf32, #tpu.memory_space<vmem>>, vector<1x1x32xf32>
    %521 = vector.shape_cast %520 : vector<1x1x32xf32> to vector<1x32xf32>
    %c1_225 = arith.constant 1 : index
    %c0_226 = arith.constant 0 : index
    %c0_227 = arith.constant 0 : index
    %522 = vector.load %arg19[%c1_225, %c0_226, %c0_227] : memref<2x1x32xf32, #tpu.memory_space<vmem>>, vector<1x1x32xf32>
    %523 = vector.shape_cast %522 : vector<1x1x32xf32> to vector<1x32xf32>
    %cst_228 = arith.constant dense<0.000000e+00> : vector<16xf32>
    %524 = vector.multi_reduction <add>, %519, %cst_228 [1] : vector<16x32xf32> to vector<16xf32>
    %525 = vector.shape_cast %524 : vector<16xf32> to vector<16x1xf32>
    %cst_229 = arith.constant 3.200000e+01 : f32
    %526 = vector.broadcast %cst_229 : f32 to vector<16x1xf32>
    %527 = arith.divf %525, %526 : vector<16x1xf32>
    %528 = vector.broadcast %527 : vector<16x1xf32> to vector<16x32xf32>
    %529 = arith.subf %519, %528 : vector<16x32xf32>
    %530 = arith.mulf %529, %529 : vector<16x32xf32>
    %cst_230 = arith.constant dense<0.000000e+00> : vector<16xf32>
    %531 = vector.multi_reduction <add>, %530, %cst_230 [1] : vector<16x32xf32> to vector<16xf32>
    %532 = vector.shape_cast %531 : vector<16xf32> to vector<16x1xf32>
    %cst_231 = arith.constant 3.200000e+01 : f32
    %533 = vector.broadcast %cst_231 : f32 to vector<16x1xf32>
    %534 = arith.divf %532, %533 : vector<16x1xf32>
    %535 = vector.broadcast %527 : vector<16x1xf32> to vector<16x32xf32>
    %536 = arith.subf %519, %535 : vector<16x32xf32>
    %cst_232 = arith.constant 9.99999996E-13 : f32
    %537 = vector.broadcast %cst_232 : f32 to vector<16x1xf32>
    %538 = arith.addf %534, %537 : vector<16x1xf32>
    %539 = math.rsqrt %538 : vector<16x1xf32>
    %540 = vector.broadcast %539 : vector<16x1xf32> to vector<16x32xf32>
    %541 = arith.mulf %536, %540 : vector<16x32xf32>
    %542 = vector.broadcast %521 : vector<1x32xf32> to vector<16x32xf32>
    %543 = arith.mulf %541, %542 : vector<16x32xf32>
    %544 = vector.broadcast %523 : vector<1x32xf32> to vector<16x32xf32>
    %545 = arith.addf %543, %544 : vector<16x32xf32>
    %546 = vector.extract_strided_slice %545 {offsets = [0, 0], sizes = [1, 32], strides = [1, 1]} : vector<16x32xf32> to vector<1x32xf32>
    %547 = vector.extract_strided_slice %545 {offsets = [8, 0], sizes = [1, 32], strides = [1, 1]} : vector<16x32xf32> to vector<1x32xf32>
    %548 = tpu.concatenate %546, %547 in 0 : vector<1x32xf32>, vector<1x32xf32> -> vector<2x32xf32>
    %c0_233 = arith.constant 0 : index
    %c0_234 = arith.constant 0 : index
    %549 = vector.load %arg20[%c0_233, %c0_234] : memref<2x32xf32, #tpu.memory_space<vmem>>, vector<2x32xf32>
    tpu.vector_store %arg20[%c0_233, %c0_234], %548 {strides = array<i32>} : memref<2x32xf32, #tpu.memory_space<vmem>>, vector<2x32xf32>,
    return
  }
}

</mosaic_0001>

<bundles_post_ra>
// kernel: text_encoder_forward.1
= control target key start
LH: loop header
LB: loop body
LE: loop exit
PB: predicated region body
PF: predicated region fallthrough
CT: control target
= control target key end

     0   :  { %s7084_s0 = inlined_call_operand.vmem [shape: f32[16,32], index: 0, kind: input, shape index: {}]   ;;  %s7085_s1 = inlined_call_operand.vmem [shape: f32[16,16], index: 1, kind: input, shape index: {}]   ;;  %s7086_s2 = inlined_call_operand.vmem [shape: f32[1,32], index: 2, kind: input, shape index: {}]   ;;  %s7087_s3 = inlined_call_operand.vmem [shape: f32[1,32], index: 3, kind: input, shape index: {}]   ;;  %s7088_s4 = inlined_call_operand.vmem [shape: f32[2,4,32,8], index: 4, kind: input, shape index: {}]   ;;  %s7089_s5 = inlined_call_operand.vmem [shape: f32[2,4,1,8], index: 5, kind: input, shape index: {}]   ;;  %s7090_s6 = inlined_call_operand.vmem [shape: f32[2,4,32,8], index: 6, kind: input, shape index: {}]   ;;  %s7091_s7 = inlined_call_operand.vmem [shape: f32[2,4,1,8], index: 7, kind: input, shape index: {}]   ;;  %s7092_s8 = inlined_call_operand.vmem [shape: f32[2,4,32,8], index: 8, kind: input, shape index: {}]   ;;  %s7093_s9 = inlined_call_operand.vmem [shape: f32[2,4,1,8], index: 9, kind: input, shape index: {}]   ;;  %s7094_s10 = inlined_call_operand.vmem [shape: f32[2,4,8,32], index: 10, kind: input, shape index: {}]   ;;  %s7095_s11 = inlined_call_operand.vmem [shape: f32[2,1,32], index: 11, kind: input, shape index: {}]   ;;  %s7096_s12 = inlined_call_operand.vmem [shape: f32[2,1,32], index: 12, kind: input, shape index: {}]   ;;  %s7097_s13 = inlined_call_operand.vmem [shape: f32[2,1,32], index: 13, kind: input, shape index: {}]   ;;  %s7098_s14 = inlined_call_operand.vmem [shape: f32[2,32,64], index: 14, kind: input, shape index: {}]   ;;  %s7099_s15 = inlined_call_operand.vmem [shape: f32[2,1,64], index: 15, kind: input, shape index: {}]   ;;  %s7100_s16 = inlined_call_operand.vmem [shape: f32[2,64,32], index: 16, kind: input, shape index: {}]   ;;  %s7101_s17 = inlined_call_operand.vmem [shape: f32[2,1,32], index: 17, kind: input, shape index: {}]   ;;  %s7102_s18 = inlined_call_operand.vmem [shape: f32[2,1,32], index: 18, kind: input, shape index: {}]   ;;  %s7103_s19 = inlined_call_operand.vmem [shape: f32[2,1,32], index: 19, kind: input, shape index: {}]   ;;  %s7104_s20 = inlined_call_operand.hbm [shape: f32[2,32], index: 20, kind: output, shape index: {}]  }
   0x1   :  { %7108 = sst [smem:[#allocation5_spill]] %s7084_s0 }
   0x2   :  { %7109 = sst [smem:[#allocation6_spill]] %s7085_s1 }
   0x3   :  { %7110 = sst [smem:[#allocation7_spill]] %s7086_s2 }
   0x4   :  { %7111 = sst [smem:[#allocation8_spill]] %s7087_s3 }
   0x5   :  { %7112 = sst [smem:[#allocation9_spill]] %s7088_s4 }
   0x6   :  { %s7113_s23 = sld [smem:[#allocation5_spill]]  ;;  %vm74_vm0 = vcmask 261120  }
   0xc   :  { %v70_v0 = vld [vmem:[%s7113_s23] sm:$0xff]  ;;  %v71_v1 = vld [vmem:[%s7113_s23 + $0x8] sm:$0xff] }
   0xd   :  { %25 = vsyncpa [#allocation3], 0  ;;  %v75_v2 = vsel %vm74_vm0, %v70_v0, 0.0  ;;  %v78_v3 = vsel %vm74_vm0, %v71_v1, 0.0  ;;  %s7114_s26 = sld [smem:[#allocation9_spill]]  ;;  %v141_v15 = vld [vmem:[%s7090_s6 + $0x18] sm:$0xff] }
   0xe   :  { %76 = vadd.xlane.f32.xlu0 %v75_v2  ;;  %5566 = vmatprep.subr.mxu1 %v141_v15  ;;  %v140_v17 = vld [vmem:[%s7090_s6 + $0x10] sm:$0xff]  ;;  %v139_v19 = vld [vmem:[%s7090_s6 + $0x8] sm:$0xff]  ;;  %v138_v21 = vld [vmem:[%s7090_s6] sm:$0xff]  ;;  %s7115_s30 = sld [smem:[#allocation7_spill]]  ;;  %vm431_vm1 = vcmask 64512   ;;  %vm523_vm3 = vcmask 130048  }
   0xf   :  { %5567 = vmatpush3.msra.mxu1 %v141_v15  ;;  %v161_v22 = vld [vmem:[%s7092_s8 + $0x18] sm:$0xff]  ;;  %s7116_s1 = sld [smem:[#allocation8_spill]]  ;;  %v160_v39 = vld [vmem:[%s7092_s8 + $0x10] sm:$0xff]  ;;  %v159_v40 = vld [vmem:[%s7092_s8 + $0x8] sm:$0xff]  ;;  %vm2438_vm5 = vcmask 523264   ;;  %s6146_s23 = smov [#allocation2]  }
  0x10   :  { %5568 = vmatprep.subr.mxu1 %v140_v17  ;;  %v158_v41 = vld [vmem:[%s7092_s8] sm:$0xff]  ;;  %v165_v61 = vld [vmem:[%s7092_s8 + $0x38] sm:$0xff]  ;;  %v164_v62 = vld [vmem:[%s7092_s8 + $0x30] sm:$0xff]  ;;  %s7117_s24 = sld [smem:[#allocation6_spill]]  ;;  %vm5030_vm6 = vcmask 1040384   ;;  %vm5032_vm7 = vcmask 254976  }
  0x11   :  { %5569 = vmatpush3.msra.mxu1 %v140_v17  ;;  %v5053_v42 = vld [vmem:[%s7091_s7] ss:$0 sm:$0xff]  ;;  %v163_v63 = vld [vmem:[%s7092_s8 + $0x28] sm:$0xff] }
  0x12   :  { %79 = vadd.xlane.f32.xlu0 %v78_v3  ;;  %5570 = vmatprep.subr.mxu1 %v139_v19  ;;  %v5050_v46 = vld [vmem:[%s7089_s5] ss:$0 sm:$0xff] }
  0x13   :  { %v121_v14 = vld [vmem:[%s7114_s26 + $0x18] sm:$0xff]  ;;  %v120_v16 = vld [vmem:[%s7114_s26 + $0x10] sm:$0xff]  ;;  %v119_v18 = vld [vmem:[%s7114_s26 + $0x8] sm:$0xff]  ;;  %5571 = vmatpush3.msra.mxu1 %v139_v19 }
  0x14   :  { %5555 = vmatprep.subr.mxu0 %v121_v14  ;;  %v118_v20 = vld [vmem:[%s7114_s26] sm:$0xff]  ;;  %5572 = vmatprep.subr.mxu1 %v138_v21  ;;  %v125_v52 = vld [vmem:[%s7114_s26 + $0x38] sm:$0xff]  ;;  %v124_v58 = vld [vmem:[%s7114_s26 + $0x30] sm:$0xff] }
  0x15   :  { %5556 = vmatpush3.msra.mxu0 %v121_v14  ;;  %5573 = vmatpush3.msra.mxu1 %v138_v21  ;;  %v5048_v30 = vld [vmem:[%s7115_s30] ss:$0 sm:$0xff]  ;;  %v123_v59 = vld [vmem:[%s7114_s26 + $0x28] sm:$0xff]  ;;  %v145_v14 = vld [vmem:[%s7090_s6 + $0x38] sm:$0xff] }
  0x16   :  { %5557 = vmatprep.subr.mxu0 %v120_v16  ;;  %v5049_v32 = vld [vmem:[%s7116_s1] ss:$0 sm:$0xff] }
  0x17   :  { %5558 = vmatpush3.msra.mxu0 %v120_v16  ;;  %v5056_v51 = vld [vmem:[%s7093_s9] ss:$0 sm:$0xff] }
  0x18   :  { %5559 = vmatprep.subr.mxu0 %v119_v18  ;;  %v122_v60 = vld [vmem:[%s7114_s26 + $0x20] sm:$0xff] }
  0x19   :  { %5560 = vmatpush3.msra.mxu0 %v119_v18  ;;  %v6375_v2 = vld [vmem:[%s7117_s24] sm:$0xff] }
  0x1a   :  { %5561 = vmatprep.subr.mxu0 %v118_v20  ;;  %vm68_vm4 = vcmp.gt.f32.partialorder %v6375_v2, 0.5 }
  0x1b   :  { %5562 = vmatpush3.msra.mxu0 %v118_v20 }
  0x1c   :  { %5577 = vmatprep.subr.mxu0 %v161_v22 }
  0x97   :  { %v77_v4 = vpop.xlane.xlu0 %76 }
  0x98   :  { %v82_v5 = vmul.f32 0.03125, %v77_v4 }
  0x9a   :  { %v84_v6 = vsub.f32 %v70_v0, %v82_v5  ;;  %v162_v0 = vld [vmem:[%s7092_s8 + $0x20] sm:$0xff] }
  0x9b   :  { %v80_v7 = vpop.xlane.xlu0 %79 }
  0x9c   :  { %v83_v8 = vmul.f32 0.03125, %v80_v7  ;;  %v86_v9 = vmul.f32 %v84_v6, %v84_v6 }
  0x9e   :  { %v85_v10 = vsub.f32 %v71_v1, %v83_v8  ;;  %v88_v11 = vsel %vm74_vm0, %v86_v9, 0.0  ;;  %v6370_v1 = vld [vmem:[%s7117_s24 + $0x8] sm:$0xff]  ;;  %s5040_s24 = sshll.u32 %s6146_s23, 4  ;;  %s5041_s24 = int_to_ptr.vmem [resolvable:$true] %s5040_s24 }
  0x9f   :  { %89 = vadd.xlane.f32.xlu1 %v88_v11  ;;  %vm69_vm2 = vcmp.gt.f32.partialorder %v6370_v1, 0.5  ;;  %v5065_v11 = vld [vmem:[%s7089_s5 + $0x1] ss:$0 sm:$0xff]  ;;  %p6129_p1 = scmp.lt.s32.totalorder %s5041_s24, %s5041_s24 }
  0xa0   :  { %v87_v12 = vmul.f32 %v85_v10, %v85_v10 }
  0xa2   :  { %v91_v13 = vsel %vm74_vm0, %v87_v12, 0.0 }
  0xa3   :  { %92 = vadd.xlane.f32.xlu1 %v91_v13 }
 0x128   :  { %v90_v23 = vpop.xlane.xlu1 %89 }
 0x129   :  { %v94_v24 = vmul.f32 0.03125, %v90_v23  ;;  %v144_v23 = vld [vmem:[%s7090_s6 + $0x30] sm:$0xff] }
 0x12b   :  { %v96_v25 = vadd.f32 1e-12, %v94_v24  ;;  %v143_v24 = vld [vmem:[%s7090_s6 + $0x28] sm:$0xff] }
 0x12c   :  { %v93_v26 = vpop.xlane.xlu1 %92 }
 0x12d   :  { %6032 = vrsqrt.f32 %v96_v25  ;;  %v95_v27 = vmul.f32 0.03125, %v93_v26  ;;  %v142_v25 = vld [vmem:[%s7090_s6 + $0x20] sm:$0xff] }
 0x12f   :  { %v97_v28 = vadd.f32 1e-12, %v95_v27 }
 0x131   :  { %6034 = vrsqrt.f32 %v97_v28 }
 0x13a   :  { %v6033_v29 = vpop.eup %6032 }
 0x13b   :  { %v100_v31 = vmul.f32 %v6033_v29, %v84_v6 }
 0x13d   :  { %v108_v33 = vmul.f32 %v5048_v30, %v100_v31 }
 0x13e   :  { %v6035_v34 = vpop.eup %6034 }
 0x13f   :  { %v6295_v35 = vadd.f32 %v5049_v32, %v108_v33  ;;  %v101_v36 = vmul.f32 %v6035_v34, %v85_v10 }
 0x141   :  { %v109_v37 = vmul.f32 %v5048_v30, %v101_v36  ;;  %5563 = vmatprep.mubr.msk.f32.mxu0 %vm74_vm0, %v6295_v35  ;;  %5574 = vmatprep.mubr.msk.f32.mxu1 %vm74_vm0, %v6295_v35  ;;  %v5068_v30 = vld [vmem:[%s7091_s7 + $0x1] ss:$0 sm:$0xff] }
 0x143   :  { %v6301_v38 = vadd.f32 %v5049_v32, %v109_v37  ;;  %v5071_v37 = vld [vmem:[%s7093_s9 + $0x1] ss:$0 sm:$0xff] }
 0x145   :  { %5564 = vmatmul.mubr.msk.f32.vlgmr.msra.gmra.mxu0 %vm74_vm0, %v6301_v38  ;;  %5575 = vmatmul.mubr.msk.f32.vlgmr.msra.gmra.mxu1 %vm74_vm0, %v6301_v38 }
 0x146   :  { %5578 = vmatpush3.msra.mxu0 %v161_v22  ;;  %5585 = vmatprep.mubr.msk.f32.mxu0 %vm74_vm0, %v6295_v35 }
 0x147   :  { %5579 = vmatprep.subr.mxu0 %v160_v39 }
 0x148   :  { %5580 = vmatpush3.msra.mxu0 %v160_v39 }
 0x149   :  { %5581 = vmatprep.subr.mxu0 %v159_v40 }
 0x14a   :  { %5582 = vmatpush3.msra.mxu0 %v159_v40 }
 0x14b   :  { %5583 = vmatprep.subr.mxu0 %v158_v41 }
 0x14c   :  { %5584 = vmatpush3.msra.mxu0 %v158_v41 }
 0x14d   :  { %5586 = vmatmul.mubr.msk.f32.vlgmr.msra.gmra.mxu0 %vm74_vm0, %v6301_v38 }
 0x205   :  { %v5565_v43 = vpop.f32.mrf.mxu0  ;;  %v5576_v44 = vpop.f32.mrf.mxu1 }
 0x206   :  { %v347_v45 = vadd.f32 %v5576_v44, %v5053_v42  ;;  %v266_v54 = vadd.f32 %v5565_v43, %v5050_v46 }
 0x207   :  { %v260_v47 = vpop.f32.mrf.mxu0  ;;  %v341_v48 = vpop.f32.mrf.mxu1 }
 0x208   :  { %v261_v49 = vadd.f32 %v5050_v46, %v260_v47  ;;  %v342_v50 = vadd.f32 %v5053_v42, %v341_v48  ;;  %5588 = vmatprep.subr.msk.mxu1 %vm431_vm1, %v347_v45 }
 0x209   :  { %5589 = vmatpush3.xpose.msk.msra.mxu1 %vm431_vm1, %v347_v45 }
 0x20a   :  { %5590 = vmatprep.subr.msk.mxu1 %vm431_vm1, %v342_v50  ;;  %5592 = vmatprep.mubr.msk.f32.mxu1 %vm431_vm1, %v261_v49 }
 0x20d   :  { %v5587_v53 = vpop.f32.mrf.mxu0  ;;  %5591 = vmatpush3.xpose.msk.msra.mxu1 %vm431_vm1, %v342_v50 }
 0x20e   :  { %v428_v55 = vadd.f32 %v5587_v53, %v5056_v51  ;;  %5602 = vmatprep.subr.mxu1 %v125_v52  ;;  %v149_v53 = vld [vmem:[%s7090_s6 + $0x58] sm:$0xff] }
 0x20f   :  { %v422_v56 = vpop.f32.mrf.mxu0 }
 0x210   :  { %v423_v57 = vadd.f32 %v5056_v51, %v422_v56  ;;  %5595 = vmatprep.subr.mxu0 %v428_v55  ;;  %5593 = vmatmul.mubr.msk.f32.vlgmr.msra.gmra.mxu1 %vm431_vm1, %v266_v54 }
 0x211   :  { %5596 = vmatpush3.msra.mxu0 %v428_v55  ;;  %5603 = vmatpush3.msra.mxu1 %v125_v52  ;;  %v178_v52 = vld [vmem:[%s7094_s10] sm:$0xff] }
 0x212   :  { %5597 = vmatprep.subr.mxu0 %v423_v57  ;;  %5610 = vmatprep.mubr.msk.f32.mxu1 %vm74_vm0, %v6295_v35 }
 0x213   :  { %5598 = vmatpush3.msra.mxu0 %v423_v57  ;;  %5604 = vmatprep.subr.mxu1 %v124_v58 }
 0x214   :  { %5605 = vmatpush3.msra.mxu1 %v124_v58  ;;  %5613 = vmatprep.subr.mxu0 %v145_v14 }
 0x215   :  { %5606 = vmatprep.subr.mxu1 %v123_v59 }
 0x216   :  { %5607 = vmatpush3.msra.mxu1 %v123_v59 }
 0x217   :  { %5608 = vmatprep.subr.mxu1 %v122_v60 }
 0x218   :  { %5609 = vmatpush3.msra.mxu1 %v122_v60 }
 0x219   :  { %5611 = vmatmul.mubr.msk.f32.vlgmr.msra.gmra.mxu1 %vm74_vm0, %v6301_v38  ;;  %5624 = vmatprep.subr.mxu1 %v165_v61 }
 0x21a   :  { %5625 = vmatpush3.msra.mxu1 %v165_v61  ;;  %5632 = vmatprep.mubr.msk.f32.mxu1 %vm74_vm0, %v6295_v35 }
 0x21b   :  { %5626 = vmatprep.subr.mxu1 %v164_v62 }
 0x21c   :  { %5627 = vmatpush3.msra.mxu1 %v164_v62 }
 0x21d   :  { %5628 = vmatprep.subr.mxu1 %v163_v63 }
 0x21e   :  { %5629 = vmatpush3.msra.mxu1 %v163_v63 }
 0x21f   :  { %5630 = vmatprep.subr.mxu1 %v162_v0 }
 0x220   :  { %5631 = vmatpush3.msra.mxu1 %v162_v0 }
 0x221   :  { %5633 = vmatmul.mubr.msk.f32.vlgmr.msra.gmra.mxu1 %vm74_vm0, %v6301_v38  ;;  %5654 = vmatprep.subr.mxu1 %v178_v52 }
 0x222   :  { %5655 = vmatpush3.msra.mxu1 %v178_v52 }
 0x223   :  { %5670 = vmatprep.subr.mxu1 %v149_v53 }
 0x2d0   :  { %v5594_v3 = vpop.f32.mrf.mxu1 }
 0x2d1   :  { %v520_v4 = vmul.f32 0.35355338, %v5594_v3 }
 0x2d2   :  { %v510_v5 = vpop.f32.mrf.mxu1 }
 0x2d3   :  { %v519_v6 = vmul.f32 0.35355338, %v510_v5  ;;  %v522_v7 = vsel %vm69_vm2, %v520_v4, -3.4028235e+38 }
 0x2d4   :  { %v527_v8 = vsel %vm523_vm3, %v522_v7, -inf }
 0x2d5   :  { %528 = vmax.xlane.f32.xlu1 %v527_v8  ;;  %v521_v9 = vsel %vm68_vm4, %v519_v6, -3.4028235e+38  ;;  %v148_v8 = vld [vmem:[%s7090_s6 + $0x50] sm:$0xff] }
 0x2d6   :  { %v524_v10 = vsel %vm523_vm3, %v521_v9, -inf }
 0x2d7   :  { %525 = vmax.xlane.f32.xlu0 %v524_v10  ;;  %v146_v10 = vld [vmem:[%s7090_s6 + $0x40] sm:$0xff] }
 0x2d9   :  { %v5612_v12 = vpop.f32.mrf.mxu1 }
 0x2da   :  { %v705_v13 = vadd.f32 %v5612_v12, %v5065_v11  ;;  %v129_v12 = vld [vmem:[%s7114_s26 + $0x58] sm:$0xff] }
 0x2db   :  { %v699_v26 = vpop.f32.mrf.mxu1 }
 0x2dc   :  { %v700_v27 = vadd.f32 %v5065_v11, %v699_v26  ;;  %v179_v11 = vld [vmem:[%s7094_s10 + $0x8] sm:$0xff]  ;;  %v126_v26 = vld [vmem:[%s7114_s26 + $0x40] sm:$0xff] }
 0x2e1   :  { %v5634_v36 = vpop.f32.mrf.mxu1 }
 0x2e2   :  { %v867_v39 = vadd.f32 %v5634_v36, %v5071_v37 }
 0x2e3   :  { %v861_v40 = vpop.f32.mrf.mxu1 }
 0x2e4   :  { %v862_v41 = vadd.f32 %v5071_v37, %v861_v40  ;;  %v5084_v40 = vld [vmem:[%s7089_s5 + $0x2] ss:$0 sm:$0xff] }
 0x35e   :  { %v529_v15 = vpop.xlane.xlu1 %528 }
 0x35f   :  { %v531_v16 = vsub.f32 %v522_v7, %v529_v15 }
 0x360   :  { %v526_v17 = vpop.xlane.xlu0 %525 }
 0x361   :  { %v530_v18 = vsub.f32 %v521_v9, %v526_v17  ;;  %v534_v19 = vmul.f32 1.442695, %v531_v16  ;;  %v147_v9 = vld [vmem:[%s7090_s6 + $0x48] sm:$0xff] }
 0x363   :  { %v532_v20 = vmul.f32 1.442695, %v530_v18 }
 0x365   :  { %6036 = vpow2.f32 %v532_v20 }
 0x366   :  { %6038 = vpow2.f32 %v534_v19 }
 0x372   :  { %v6037_v21 = vpop.eup %6036 }
 0x373   :  { %v6039_v22 = vpop.eup %6038  ;;  %5599 = vmatprep.mubr.msk.f32.mxu0 %vm523_vm3, %v6037_v21  ;;  %v536_v51 = vsel %vm523_vm3, %v6037_v21, 0.0 }
 0x374   :  { %5600 = vmatmul.mubr.msk.f32.vlgmr.msra.gmra.mxu0 %vm523_vm3, %v6039_v22  ;;  %v539_v50 = vsel %vm523_vm3, %v6039_v22, 0.0  ;;  %v128_v22 = vld [vmem:[%s7114_s26 + $0x50] sm:$0xff] }
 0x375   :  { %5614 = vmatpush3.msra.mxu0 %v145_v14  ;;  %5621 = vmatprep.mubr.msk.f32.mxu0 %vm74_vm0, %v6295_v35 }
 0x376   :  { %5615 = vmatprep.subr.mxu0 %v144_v23 }
 0x377   :  { %5616 = vmatpush3.msra.mxu0 %v144_v23  ;;  %v127_v23 = vld [vmem:[%s7114_s26 + $0x48] sm:$0xff] }
 0x378   :  { %5617 = vmatprep.subr.mxu0 %v143_v24 }
 0x379   :  { %5618 = vmatpush3.msra.mxu0 %v143_v24 }
 0x37a   :  { %5619 = vmatprep.subr.mxu0 %v142_v25 }
 0x37b   :  { %5620 = vmatpush3.msra.mxu0 %v142_v25  ;;  %v5087_v25 = vld [vmem:[%s7091_s7 + $0x2] ss:$0 sm:$0xff] }
 0x37c   :  { %5622 = vmatmul.mubr.msk.f32.vlgmr.msra.gmra.mxu0 %vm74_vm0, %v6301_v38 }
 0x37d   :  { %5639 = vmatprep.mubr.msk.f32.mxu0 %vm431_vm1, %v700_v27 }
 0x434   :  { %v6407_v28 = vpop.f32.mrf.mxu0 }
 0x436   :  { %v616_v29 = vpop.f32.mrf.mxu0 }
 0x43c   :  { %v5623_v31 = vpop.f32.mrf.mxu0 }
 0x43d   :  { %v786_v32 = vadd.f32 %v5623_v31, %v5068_v30 }
 0x43e   :  { %v780_v33 = vpop.f32.mrf.mxu0 }
 0x43f   :  { %v781_v34 = vadd.f32 %v5068_v30, %v780_v33  ;;  %5635 = vmatprep.subr.msk.mxu0 %vm431_vm1, %v786_v32  ;;  %v167_v33 = vld [vmem:[%s7092_s8 + $0x48] sm:$0xff] }
 0x440   :  { %5636 = vmatpush3.xpose.msk.msra.mxu0 %vm431_vm1, %v786_v32  ;;  %v168_v32 = vld [vmem:[%s7092_s8 + $0x50] sm:$0xff] }
 0x441   :  { %5637 = vmatprep.subr.msk.mxu0 %vm431_vm1, %v781_v34 }
 0x444   :  { %5638 = vmatpush3.xpose.msk.msra.mxu0 %vm431_vm1, %v781_v34  ;;  %v166_v34 = vld [vmem:[%s7092_s8 + $0x40] sm:$0xff] }
 0x445   :  { %5642 = vmatprep.subr.mxu0 %v867_v39 }
 0x447   :  { %5640 = vmatmul.mubr.msk.f32.vlgmr.msra.gmra.mxu0 %vm431_vm1, %v705_v13 }
 0x448   :  { %5643 = vmatpush3.msra.mxu0 %v867_v39 }
 0x449   :  { %5644 = vmatprep.subr.mxu0 %v862_v41 }
 0x44a   :  { %5645 = vmatpush3.msra.mxu0 %v862_v41 }
 0x44b   :  { %5649 = vmatprep.subr.mxu0 %v179_v11 }
 0x507   :  { %v5641_v42 = vpop.f32.mrf.mxu0 }
 0x508   :  { %v958_v43 = vmul.f32 0.35355338, %v5641_v42 }
 0x509   :  { %v948_v44 = vpop.f32.mrf.mxu0 }
 0x50a   :  { %v957_v45 = vmul.f32 0.35355338, %v948_v44  ;;  %v960_v46 = vsel %vm69_vm2, %v958_v43, -3.4028235e+38  ;;  %v5090_v44 = vld [vmem:[%s7093_s9 + $0x2] ss:$0 sm:$0xff] }
 0x50b   :  { %v964_v47 = vsel %vm523_vm3, %v960_v46, -inf }
 0x50c   :  { %965 = vmax.xlane.f32.xlu1 %v964_v47  ;;  %v959_v48 = vsel %vm68_vm4, %v957_v45, -3.4028235e+38 }
 0x50d   :  { %v961_v49 = vsel %vm523_vm3, %v959_v48, -inf }
 0x50e   :  { %962 = vmax.xlane.f32.xlu0 %v961_v49 }
 0x510   :  { %540 = vadd.xlane.f32.xlu1 %v539_v50 }
 0x512   :  { %537 = vadd.xlane.f32.xlu0 %v536_v51 }
 0x595   :  { %v966_v54 = vpop.xlane.xlu1 %965 }
 0x596   :  { %v968_v55 = vsub.f32 %v960_v46, %v966_v54 }
 0x597   :  { %v963_v56 = vpop.xlane.xlu0 %962 }
 0x598   :  { %v971_v57 = vmul.f32 1.442695, %v968_v55  ;;  %v967_v58 = vsub.f32 %v959_v48, %v963_v56 }
 0x599   :  { %v541_v59 = vpop.xlane.xlu1 %540 }
 0x59a   :  { %6040 = vpow2.f32 %v971_v57  ;;  %v969_v60 = vmul.f32 1.442695, %v967_v58  ;;  %v133_v57 = vld [vmem:[%s7114_s26 + $0x78] sm:$0xff] }
 0x59b   :  { %6042 = vrcp.f32 %v541_v59  ;;  %v538_v61 = vpop.xlane.xlu0 %537 }
 0x59c   :  { %6044 = vpow2.f32 %v969_v60 }
 0x59d   :  { %6046 = vrcp.f32 %v538_v61 }
 0x5a7   :  { %v6041_v62 = vpop.eup %6040 }
 0x5a8   :  { %v6043_v63 = vpop.eup %6042  ;;  %v976_v0 = vsel %vm523_vm3, %v6041_v62, 0.0 }
 0x5a9   :  { %v6045_v3 = vpop.eup %6044  ;;  %977 = vadd.xlane.f32.xlu1 %v976_v0  ;;  %v626_v7 = vmul.f32 %v6043_v63, %v6407_v28 }
 0x5aa   :  { %v6047_v4 = vpop.eup %6046  ;;  %5646 = vmatprep.mubr.msk.f32.mxu0 %vm523_vm3, %v6045_v3  ;;  %v973_v5 = vsel %vm523_vm3, %v6045_v3, 0.0 }
 0x5ab   :  { %5647 = vmatmul.mubr.msk.f32.vlgmr.msra.gmra.mxu0 %vm523_vm3, %v6041_v62  ;;  %974 = vadd.xlane.f32.xlu0 %v973_v5  ;;  %v625_v6 = vmul.f32 %v6047_v4, %v616_v29  ;;  %v169_v29 = vld [vmem:[%s7092_s8 + $0x58] sm:$0xff] }
 0x5ac   :  { %5650 = vmatpush3.msra.mxu0 %v179_v11  ;;  %v171_v11 = vld [vmem:[%s7092_s8 + $0x68] sm:$0xff] }
 0x5ad   :  { %5656 = vmatprep.mubr.msk.f32.mxu1 %vm431_vm1, %v625_v6  ;;  %5659 = vmatprep.subr.mxu0 %v129_v12  ;;  %v132_v6 = vld [vmem:[%s7114_s26 + $0x70] sm:$0xff] }
 0x5ae   :  { %5657 = vmatmul.mubr.msk.f32.vlgmr.msra.gmra.mxu1 %vm431_vm1, %v626_v7  ;;  %v131_v7 = vld [vmem:[%s7114_s26 + $0x68] sm:$0xff] }
 0x5af   :  { %5671 = vmatpush3.msra.mxu1 %v149_v53  ;;  %5678 = vmatprep.mubr.msk.f32.mxu1 %vm74_vm0, %v6295_v35 }
 0x5b0   :  { %5672 = vmatprep.subr.mxu1 %v148_v8 }
 0x5b1   :  { %5673 = vmatpush3.msra.mxu1 %v148_v8  ;;  %v130_v8 = vld [vmem:[%s7114_s26 + $0x60] sm:$0xff] }
 0x5b2   :  { %5674 = vmatprep.subr.mxu1 %v147_v9 }
 0x5b3   :  { %5675 = vmatpush3.msra.mxu1 %v147_v9  ;;  %v173_v9 = vld [vmem:[%s7092_s8 + $0x78] sm:$0xff] }
 0x5b4   :  { %5676 = vmatprep.subr.mxu1 %v146_v10 }
 0x5b5   :  { %5677 = vmatpush3.msra.mxu1 %v146_v10  ;;  %v172_v10 = vld [vmem:[%s7092_s8 + $0x70] sm:$0xff] }
 0x5b6   :  { %5679 = vmatmul.mubr.msk.f32.vlgmr.msra.gmra.mxu1 %vm74_vm0, %v6301_v38 }
 0x632   :  { %v978_v14 = vpop.xlane.xlu1 %977 }
 0x634   :  { %v975_v13 = vpop.xlane.xlu0 %974 }
 0x635   :  { %6048 = vrcp.f32 %v975_v13  ;;  %v180_v13 = vld [vmem:[%s7094_s10 + $0x10] sm:$0xff] }
 0x636   :  { %6050 = vrcp.f32 %v978_v14  ;;  %v153_v14 = vld [vmem:[%s7090_s6 + $0x78] sm:$0xff] }
 0x642   :  { %v6049_v16 = vpop.eup %6048 }
 0x643   :  { %v6051_v18 = vpop.eup %6050 }
 0x66b   :  { %v5648_v15 = vpop.f32.mrf.mxu0 }
 0x66c   :  { %v1063_v20 = vmul.f32 %v6051_v18, %v5648_v15 }
 0x66d   :  { %v1053_v17 = vpop.f32.mrf.mxu0 }
 0x66e   :  { %v1062_v19 = vmul.f32 %v6049_v16, %v1053_v17  ;;  %v6460_v21 = vpop.f32.mrf.mxu1 }
 0x670   :  { %5651 = vmatprep.mubr.msk.f32.mxu0 %vm431_vm1, %v1062_v19  ;;  %v6472_v24 = vpop.f32.mrf.mxu1 }
 0x671   :  { %5652 = vmatmul.mubr.msk.f32.vlgmr.msra.gmra.mxu0 %vm431_vm1, %v1063_v20 }
 0x672   :  { %5660 = vmatpush3.msra.mxu0 %v129_v12  ;;  %5667 = vmatprep.mubr.msk.f32.mxu0 %vm74_vm0, %v6295_v35  ;;  %v170_v12 = vld [vmem:[%s7092_s8 + $0x60] sm:$0xff] }
 0x673   :  { %5661 = vmatprep.subr.mxu0 %v128_v22 }
 0x674   :  { %5662 = vmatpush3.msra.mxu0 %v128_v22 }
 0x675   :  { %5663 = vmatprep.subr.mxu0 %v127_v23 }
 0x676   :  { %v5680_v27 = vpop.f32.mrf.mxu1  ;;  %5664 = vmatpush3.msra.mxu0 %v127_v23 }
 0x677   :  { %v1385_v28 = vadd.f32 %v5680_v27, %v5087_v25  ;;  %5665 = vmatprep.subr.mxu0 %v126_v26  ;;  %v151_v27 = vld [vmem:[%s7090_s6 + $0x68] sm:$0xff] }
 0x678   :  { %v1379_v30 = vpop.f32.mrf.mxu1  ;;  %5666 = vmatpush3.msra.mxu0 %v126_v26  ;;  %v5101_v26 = vld [vmem:[%s7089_s5 + $0x3] ss:$0 sm:$0xff] }
 0x679   :  { %v1380_v31 = vadd.f32 %v5087_v25, %v1379_v30  ;;  %5692 = vmatprep.subr.msk.mxu1 %vm431_vm1, %v1385_v28  ;;  %5668 = vmatmul.mubr.msk.f32.vlgmr.msra.gmra.mxu0 %vm74_vm0, %v6301_v38  ;;  %v152_v25 = vld [vmem:[%s7090_s6 + $0x70] sm:$0xff]  ;;  %v150_v30 = vld [vmem:[%s7090_s6 + $0x60] sm:$0xff] }
 0x67a   :  { %5681 = vmatprep.subr.mxu0 %v169_v29  ;;  %5693 = vmatpush3.xpose.msk.msra.mxu1 %vm431_vm1, %v1385_v28 }
 0x67b   :  { %5682 = vmatpush3.msra.mxu0 %v169_v29  ;;  %5689 = vmatprep.mubr.msk.f32.mxu0 %vm74_vm0, %v6295_v35 }
 0x67c   :  { %5694 = vmatprep.subr.msk.mxu1 %vm431_vm1, %v1380_v31  ;;  %5683 = vmatprep.subr.mxu0 %v168_v32 }
 0x67d   :  { %5684 = vmatpush3.msra.mxu0 %v168_v32 }
 0x67e   :  { %5685 = vmatprep.subr.mxu0 %v167_v33  ;;  %5695 = vmatpush3.xpose.msk.msra.mxu1 %vm431_vm1, %v1380_v31 }
 0x67f   :  { %5686 = vmatpush3.msra.mxu0 %v167_v33  ;;  %5706 = vmatprep.subr.mxu1 %v180_v13  ;;  %v5107_v33 = vld [vmem:[%s7093_s9 + $0x3] ss:$0 sm:$0xff] }
 0x680   :  { %5687 = vmatprep.subr.mxu0 %v166_v34 }
 0x681   :  { %5688 = vmatpush3.msra.mxu0 %v166_v34 }
 0x682   :  { %5690 = vmatmul.mubr.msk.f32.vlgmr.msra.gmra.mxu0 %vm74_vm0, %v6301_v38 }
 0x731   :  { %v6502_v36 = vpop.f32.mrf.mxu0 }
 0x733   :  { %v6504_v37 = vpop.f32.mrf.mxu0 }
 0x739   :  { %v5669_v39 = vpop.f32.mrf.mxu0 }
 0x73a   :  { %v1304_v43 = vadd.f32 %v5669_v39, %v5084_v40 }
 0x73b   :  { %v1298_v41 = vpop.f32.mrf.mxu0 }
 0x73c   :  { %v1299_v42 = vadd.f32 %v5084_v40, %v1298_v41 }
 0x73e   :  { %5696 = vmatprep.mubr.msk.f32.mxu1 %vm431_vm1, %v1299_v42  ;;  %v1223_v42 = vadd.f32 %v6460_v21, %v6502_v36 }
 0x73f   :  { %5697 = vmatmul.mubr.msk.f32.vlgmr.msra.gmra.mxu1 %vm431_vm1, %v1304_v43 }
 0x740   :  { %5707 = vmatpush3.msra.mxu1 %v180_v13 }
 0x741   :  { %5722 = vmatprep.subr.mxu1 %v153_v14 }
 0x742   :  { %v5691_v45 = vpop.f32.mrf.mxu0 }
 0x743   :  { %v1466_v46 = vadd.f32 %v5691_v45, %v5090_v44 }
 0x744   :  { %v1460_v47 = vpop.f32.mrf.mxu0 }
 0x745   :  { %v1461_v48 = vadd.f32 %v5090_v44, %v1460_v47  ;;  %5699 = vmatprep.subr.mxu0 %v1466_v46  ;;  %v1218_v44 = vadd.f32 %v6472_v24, %v6504_v37 }
 0x746   :  { %5700 = vmatpush3.msra.mxu0 %v1466_v46 }
 0x747   :  { %5701 = vmatprep.subr.mxu0 %v1461_v48 }
 0x748   :  { %5702 = vmatpush3.msra.mxu0 %v1461_v48  ;;  %v5104_v48 = vld [vmem:[%s7091_s7 + $0x3] ss:$0 sm:$0xff] }
 0x749   :  { %5711 = vmatprep.subr.mxu0 %v133_v57 }
 0x7ff   :  { %v5698_v49 = vpop.f32.mrf.mxu1 }
 0x800   :  { %v1557_v50 = vmul.f32 0.35355338, %v5698_v49 }
 0x801   :  { %v1547_v51 = vpop.f32.mrf.mxu1 }
 0x802   :  { %v1556_v52 = vmul.f32 0.35355338, %v1547_v51  ;;  %v1559_v53 = vsel %vm69_vm2, %v1557_v50, -3.4028235e+38 }
 0x803   :  { %v1563_v54 = vsel %vm523_vm3, %v1559_v53, -inf }
 0x804   :  { %1564 = vmax.xlane.f32.xlu1 %v1563_v54  ;;  %v1558_v55 = vsel %vm68_vm4, %v1556_v52, -3.4028235e+38 }
 0x805   :  { %v1560_v56 = vsel %vm523_vm3, %v1558_v55, -inf }
 0x806   :  { %1561 = vmax.xlane.f32.xlu0 %v1560_v56 }
 0x88d   :  { %v1565_v58 = vpop.xlane.xlu1 %1564 }
 0x88e   :  { %v1567_v59 = vsub.f32 %v1559_v53, %v1565_v58 }
 0x88f   :  { %v1562_v60 = vpop.xlane.xlu0 %1561 }
 0x890   :  { %v1570_v61 = vmul.f32 1.442695, %v1567_v59  ;;  %v1566_v62 = vsub.f32 %v1558_v55, %v1562_v60 }
 0x892   :  { %6052 = vpow2.f32 %v1570_v61  ;;  %v1568_v63 = vmul.f32 1.442695, %v1566_v62 }
 0x894   :  { %6054 = vpow2.f32 %v1568_v63 }
 0x89f   :  { %v6053_v0 = vpop.eup %6052 }
 0x8a0   :  { %v1575_v3 = vsel %vm523_vm3, %v6053_v0, 0.0 }
 0x8a1   :  { %v6055_v4 = vpop.eup %6054  ;;  %1576 = vadd.xlane.f32.xlu1 %v1575_v3 }
 0x8a2   :  { %5703 = vmatprep.mubr.msk.f32.mxu0 %vm523_vm3, %v6055_v4  ;;  %v1572_v5 = vsel %vm523_vm3, %v6055_v4, 0.0 }
 0x8a3   :  { %5704 = vmatmul.mubr.msk.f32.vlgmr.msra.gmra.mxu0 %vm523_vm3, %v6053_v0  ;;  %1573 = vadd.xlane.f32.xlu0 %v1572_v5  ;;  %v181_v5 = vld [vmem:[%s7094_s10 + $0x18] sm:$0xff] }
 0x8a4   :  { %5712 = vmatpush3.msra.mxu0 %v133_v57  ;;  %5719 = vmatprep.mubr.msk.f32.mxu0 %vm74_vm0, %v6295_v35 }
 0x8a5   :  { %5713 = vmatprep.subr.mxu0 %v132_v6 }
 0x8a6   :  { %5714 = vmatpush3.msra.mxu0 %v132_v6 }
 0x8a7   :  { %5715 = vmatprep.subr.mxu0 %v131_v7 }
 0x8a8   :  { %5716 = vmatpush3.msra.mxu0 %v131_v7 }
 0x8a9   :  { %5717 = vmatprep.subr.mxu0 %v130_v8 }
 0x8aa   :  { %5718 = vmatpush3.msra.mxu0 %v130_v8 }
 0x8ab   :  { %5720 = vmatmul.mubr.msk.f32.vlgmr.msra.gmra.mxu0 %vm74_vm0, %v6301_v38  ;;  %5733 = vmatprep.subr.mxu0 %v173_v9 }
 0x8ac   :  { %5734 = vmatpush3.msra.mxu0 %v173_v9  ;;  %5741 = vmatprep.mubr.msk.f32.mxu0 %vm74_vm0, %v6295_v35 }
 0x8ad   :  { %5735 = vmatprep.subr.mxu0 %v172_v10 }
 0x8ae   :  { %5736 = vmatpush3.msra.mxu0 %v172_v10 }
 0x8af   :  { %5737 = vmatprep.subr.mxu0 %v171_v11 }
 0x8b0   :  { %5738 = vmatpush3.msra.mxu0 %v171_v11 }
 0x8b1   :  { %5739 = vmatprep.subr.mxu0 %v170_v12 }
 0x8b2   :  { %5740 = vmatpush3.msra.mxu0 %v170_v12 }
 0x8b3   :  { %5742 = vmatmul.mubr.msk.f32.vlgmr.msra.gmra.mxu0 %vm74_vm0, %v6301_v38 }
 0x92a   :  { %v1577_v16 = vpop.xlane.xlu1 %1576 }
 0x92c   :  { %v1574_v15 = vpop.xlane.xlu0 %1573 }
 0x92d   :  { %6056 = vrcp.f32 %v1574_v15 }
 0x92e   :  { %6058 = vrcp.f32 %v1577_v16 }
 0x93a   :  { %v6057_v18 = vpop.eup %6056 }
 0x93b   :  { %v6059_v20 = vpop.eup %6058 }
 0x963   :  { %v5705_v17 = vpop.f32.mrf.mxu0 }
 0x964   :  { %v1662_v23 = vmul.f32 %v6059_v20, %v5705_v17  ;;  %v5118_v17 = vld [vmem:[%s7095_s11] ss:$0 sm:$0xff] }
 0x965   :  { %v1652_v19 = vpop.f32.mrf.mxu0 }
 0x966   :  { %v1661_v22 = vmul.f32 %v6057_v18, %v1652_v19 }
 0x968   :  { %5708 = vmatprep.mubr.msk.f32.mxu1 %vm431_vm1, %v1661_v22 }
 0x969   :  { %5709 = vmatmul.mubr.msk.f32.vlgmr.msra.gmra.mxu1 %vm431_vm1, %v1662_v23 }
 0x96a   :  { %5723 = vmatpush3.msra.mxu1 %v153_v14  ;;  %5730 = vmatprep.mubr.msk.f32.mxu1 %vm74_vm0, %v6295_v35 }
 0x96b   :  { %v5721_v28 = vpop.f32.mrf.mxu0  ;;  %5724 = vmatprep.subr.mxu1 %v152_v25 }
 0x96c   :  { %v1824_v29 = vadd.f32 %v5721_v28, %v5101_v26  ;;  %5725 = vmatpush3.msra.mxu1 %v152_v25 }
 0x96d   :  { %v1818_v31 = vpop.f32.mrf.mxu0  ;;  %5726 = vmatprep.subr.mxu1 %v151_v27 }
 0x96e   :  { %5727 = vmatpush3.msra.mxu1 %v151_v27  ;;  %v1819_v32 = vadd.f32 %v5101_v26, %v1818_v31 }
 0x96f   :  { %5728 = vmatprep.subr.mxu1 %v150_v30 }
 0x970   :  { %5729 = vmatpush3.msra.mxu1 %v150_v30 }
 0x971   :  { %5731 = vmatmul.mubr.msk.f32.vlgmr.msra.gmra.mxu1 %vm74_vm0, %v6301_v38 }
 0x972   :  { %5748 = vmatprep.mubr.msk.f32.mxu1 %vm431_vm1, %v1819_v32 }
 0x973   :  { %v5743_v34 = vpop.f32.mrf.mxu0 }
 0x974   :  { %v1986_v39 = vadd.f32 %v5743_v34, %v5107_v33 }
 0x975   :  { %v1980_v40 = vpop.f32.mrf.mxu0 }
 0x976   :  { %v1981_v41 = vadd.f32 %v5107_v33, %v1980_v40  ;;  %5751 = vmatprep.subr.mxu0 %v1986_v39  ;;  %v2323_v40 = vld [vmem:[%s7098_s14 + $0x10] sm:$0xff] }
 0x977   :  { %5752 = vmatpush3.msra.mxu0 %v1986_v39  ;;  %v2324_v39 = vld [vmem:[%s7098_s14 + $0x18] sm:$0xff] }
 0x978   :  { %5753 = vmatprep.subr.mxu0 %v1981_v41 }
 0x979   :  { %5754 = vmatpush3.msra.mxu0 %v1981_v41  ;;  %v2322_v41 = vld [vmem:[%s7098_s14 + $0x8] sm:$0xff] }
 0x97a   :  { %5763 = vmatprep.subr.mxu0 %v2324_v39 }
 0xa29   :  { %v5710_v43 = vpop.f32.mrf.mxu1 }
 0xa2a   :  { %v1745_v45 = vadd.f32 %v5710_v43, %v1223_v42  ;;  %v2321_v42 = vld [vmem:[%s7098_s14] sm:$0xff] }
 0xa2b   :  { %v1735_v46 = vpop.f32.mrf.mxu1 }
 0xa2c   :  { %v1744_v47 = vadd.f32 %v1735_v46, %v1218_v44 }
 0xa31   :  { %v5732_v49 = vpop.f32.mrf.mxu1 }
 0xa32   :  { %v1905_v50 = vadd.f32 %v5732_v49, %v5104_v48 }
 0xa33   :  { %v1899_v51 = vpop.f32.mrf.mxu1 }
 0xa34   :  { %v1900_v52 = vadd.f32 %v5104_v48, %v1899_v51  ;;  %5744 = vmatprep.subr.msk.mxu1 %vm431_vm1, %v1905_v50 }
 0xa35   :  { %5745 = vmatpush3.xpose.msk.msra.mxu1 %vm431_vm1, %v1905_v50  ;;  %v5119_v50 = vld [vmem:[%s7096_s12] ss:$0 sm:$0xff] }
 0xa36   :  { %5746 = vmatprep.subr.msk.mxu1 %vm431_vm1, %v1900_v52 }
 0xa39   :  { %5747 = vmatpush3.xpose.msk.msra.mxu1 %vm431_vm1, %v1900_v52 }
 0xa3a   :  { %5758 = vmatprep.subr.mxu1 %v181_v5 }
 0xa3c   :  { %5749 = vmatmul.mubr.msk.f32.vlgmr.msra.gmra.mxu1 %vm431_vm1, %v1824_v29 }
 0xa3d   :  { %5759 = vmatpush3.msra.mxu1 %v181_v5 }
 0xafc   :  { %v5750_v21 = vpop.f32.mrf.mxu1 }
 0xafd   :  { %v2077_v24 = vmul.f32 0.35355338, %v5750_v21 }
 0xafe   :  { %v2067_v36 = vpop.f32.mrf.mxu1 }
 0xaff   :  { %v2076_v37 = vmul.f32 0.35355338, %v2067_v36  ;;  %v2079_v53 = vsel %vm69_vm2, %v2077_v24, -3.4028235e+38  ;;  %v5120_v36 = vld [vmem:[%s7097_s13] ss:$0 sm:$0xff] }
 0xb00   :  { %v2083_v54 = vsel %vm523_vm3, %v2079_v53, -inf }
 0xb01   :  { %2084 = vmax.xlane.f32.xlu1 %v2083_v54  ;;  %v2078_v55 = vsel %vm68_vm4, %v2076_v37, -3.4028235e+38 }
 0xb02   :  { %v2080_v56 = vsel %vm523_vm3, %v2078_v55, -inf }
 0xb03   :  { %2081 = vmax.xlane.f32.xlu0 %v2080_v56  ;;  %v2429_v56 = vld [vmem:[%s7100_s16 + $0x30] sm:$0xff] }
 0xb8a   :  { %v2085_v57 = vpop.xlane.xlu1 %2084 }
 0xb8b   :  { %v2087_v58 = vsub.f32 %v2079_v53, %v2085_v57  ;;  %v2428_v57 = vld [vmem:[%s7100_s16 + $0x28] sm:$0xff] }
 0xb8c   :  { %v2082_v59 = vpop.xlane.xlu0 %2081 }
 0xb8d   :  { %v2090_v60 = vmul.f32 1.442695, %v2087_v58  ;;  %v2086_v61 = vsub.f32 %v2078_v55, %v2082_v59  ;;  %v2430_v55 = vld [vmem:[%s7100_s16 + $0x38] sm:$0xff]  ;;  %v2427_v58 = vld [vmem:[%s7100_s16 + $0x20] sm:$0xff] }
 0xb8e   :  { %5774 = vmatprep.subr.mxu1 %v2430_v55  ;;  %v2426_v59 = vld [vmem:[%s7100_s16 + $0x18] sm:$0xff] }
 0xb8f   :  { %6060 = vpow2.f32 %v2090_v60  ;;  %v2088_v62 = vmul.f32 1.442695, %v2086_v61  ;;  %v2425_v60 = vld [vmem:[%s7100_s16 + $0x10] sm:$0xff]  ;;  %v2424_v61 = vld [vmem:[%s7100_s16 + $0x8] sm:$0xff] }
 0xb91   :  { %6062 = vpow2.f32 %v2088_v62  ;;  %v2423_v62 = vld [vmem:[%s7100_s16] sm:$0xff] }
 0xb9c   :  { %v6061_v63 = vpop.eup %6060 }
 0xb9d   :  { %v2095_v0 = vsel %vm523_vm3, %v6061_v63, 0.0 }
 0xb9e   :  { %v6063_v3 = vpop.eup %6062  ;;  %2096 = vadd.xlane.f32.xlu1 %v2095_v0 }
 0xb9f   :  { %5755 = vmatprep.mubr.msk.f32.mxu0 %vm523_vm3, %v6063_v3  ;;  %v2092_v4 = vsel %vm523_vm3, %v6063_v3, 0.0 }
 0xba0   :  { %5756 = vmatmul.mubr.msk.f32.vlgmr.msra.gmra.mxu0 %vm523_vm3, %v6061_v63  ;;  %2093 = vadd.xlane.f32.xlu0 %v2092_v4  ;;  %v5121_v63 = vld [vmem:[%s7099_s15] ss:$0 sm:$0xff] }
 0xba1   :  { %5764 = vmatpush3.msra.mxu0 %v2324_v39  ;;  %v5132_v39 = vld [vmem:[%s7114_s26 + $0x98] sm:$0xff] }
 0xba2   :  { %5765 = vmatprep.subr.mxu0 %v2323_v40 }
 0xba3   :  { %5766 = vmatpush3.msra.mxu0 %v2323_v40  ;;  %v5172_v40 = vld [vmem:[%s7092_s8 + $0x98] sm:$0xff] }
 0xba4   :  { %5767 = vmatprep.subr.mxu0 %v2322_v41 }
 0xba5   :  { %5768 = vmatpush3.msra.mxu0 %v2322_v41  ;;  %v5131_v41 = vld [vmem:[%s7114_s26 + $0x90] sm:$0xff] }
 0xba6   :  { %5769 = vmatprep.subr.mxu0 %v2321_v42 }
 0xba7   :  { %5770 = vmatpush3.msra.mxu0 %v2321_v42  ;;  %v5171_v42 = vld [vmem:[%s7092_s8 + $0x90] sm:$0xff] }
 0xba8   :  { %5793 = vmatprep.subr.mxu0 %v5132_v39 }
 0xc27   :  { %v2097_v7 = vpop.xlane.xlu1 %2096 }
 0xc29   :  { %v2094_v6 = vpop.xlane.xlu0 %2093 }
 0xc2a   :  { %6064 = vrcp.f32 %v2094_v6 }
 0xc2b   :  { %6066 = vrcp.f32 %v2097_v7 }
 0xc37   :  { %v6065_v9 = vpop.eup %6064 }
 0xc38   :  { %v6067_v11 = vpop.eup %6066 }
 0xc60   :  { %v5757_v8 = vpop.f32.mrf.mxu0 }
 0xc61   :  { %v2182_v13 = vmul.f32 %v6067_v11, %v5757_v8 }
 0xc62   :  { %v2172_v10 = vpop.f32.mrf.mxu0 }
 0xc63   :  { %v2181_v12 = vmul.f32 %v6065_v9, %v2172_v10 }
 0xc65   :  { %5760 = vmatprep.mubr.msk.f32.mxu1 %vm431_vm1, %v2181_v12 }
 0xc66   :  { %5761 = vmatmul.mubr.msk.f32.vlgmr.msra.gmra.mxu1 %vm431_vm1, %v2182_v13 }
 0xc67   :  { %5775 = vmatpush3.msra.mxu1 %v2430_v55 }
 0xc68   :  { %5776 = vmatprep.subr.mxu1 %v2429_v56 }
 0xc69   :  { %5777 = vmatpush3.msra.mxu1 %v2429_v56  ;;  %v5128_v56 = vld [vmem:[%s7103_s19] ss:$0 sm:$0xff] }
 0xc6a   :  { %5778 = vmatprep.subr.mxu1 %v2428_v57 }
 0xc6b   :  { %5779 = vmatpush3.msra.mxu1 %v2428_v57 }
 0xc6c   :  { %5780 = vmatprep.subr.mxu1 %v2427_v58 }
 0xc6d   :  { %5781 = vmatpush3.msra.mxu1 %v2427_v58 }
 0xc6e   :  { %5782 = vmatprep.subr.mxu1 %v2426_v59 }
 0xc6f   :  { %5783 = vmatpush3.msra.mxu1 %v2426_v59 }
 0xc70   :  { %5784 = vmatprep.subr.mxu1 %v2425_v60 }
 0xc71   :  { %5785 = vmatpush3.msra.mxu1 %v2425_v60  ;;  %v5151_v60 = vld [vmem:[%s7090_s6 + $0x90] sm:$0xff] }
 0xc72   :  { %5786 = vmatprep.subr.mxu1 %v2424_v61 }
 0xc73   :  { %5787 = vmatpush3.msra.mxu1 %v2424_v61  ;;  %v5150_v61 = vld [vmem:[%s7090_s6 + $0x88] sm:$0xff] }
 0xc74   :  { %5788 = vmatprep.subr.mxu1 %v2423_v62 }
 0xc75   :  { %5789 = vmatpush3.msra.mxu1 %v2423_v62  ;;  %v5149_v62 = vld [vmem:[%s7090_s6 + $0x80] sm:$0xff] }
 0xc76   :  { %5815 = vmatprep.subr.mxu1 %v5172_v40 }
 0xd26   :  { %v5762_v14 = vpop.f32.mrf.mxu1 }
 0xd27   :  { %v2265_v15 = vadd.f32 %v5762_v14, %v1745_v45 }
 0xd28   :  { %v2255_v16 = vpop.f32.mrf.mxu1 }
 0xd29   :  { %v2267_v18 = vadd.f32 %v2265_v15, %v6301_v38  ;;  %v2264_v19 = vadd.f32 %v2255_v16, %v1744_v47  ;;  %v5124_v16 = vld [vmem:[%s7101_s17] ss:$0 sm:$0xff] }
 0xd2b   :  { %v2266_v20 = vadd.f32 %v2264_v19, %v6295_v35  ;;  %v2276_v22 = vadd.f32 %v5118_v17, %v2267_v18 }
 0xd2d   :  { %v2282_v23 = vsel %vm74_vm0, %v2276_v22, 0.0  ;;  %v2275_v25 = vadd.f32 %v5118_v17, %v2266_v20 }
 0xd2e   :  { %2283 = vadd.xlane.f32.xlu1 %v2282_v23 }
 0xd2f   :  { %v2279_v26 = vsel %vm74_vm0, %v2275_v25, 0.0 }
 0xd30   :  { %2280 = vadd.xlane.f32.xlu0 %v2279_v26 }
 0xdb7   :  { %v2284_v27 = vpop.xlane.xlu1 %2283 }
 0xdb8   :  { %v2286_v28 = vmul.f32 0.03125, %v2284_v27 }
 0xdb9   :  { %v2281_v29 = vpop.xlane.xlu0 %2280 }
 0xdba   :  { %v2288_v30 = vsub.f32 %v2276_v22, %v2286_v28  ;;  %v2285_v31 = vmul.f32 0.03125, %v2281_v29 }
 0xdbc   :  { %v2287_v32 = vsub.f32 %v2275_v25, %v2285_v31  ;;  %v2290_v33 = vmul.f32 %v2288_v30, %v2288_v30 }
 0xdbe   :  { %v2294_v38 = vsel %vm74_vm0, %v2290_v33, 0.0  ;;  %v2289_v34 = vmul.f32 %v2287_v32, %v2287_v32 }
 0xdbf   :  { %2295 = vadd.xlane.f32.xlu1 %v2294_v38 }
 0xdc0   :  { %v2291_v35 = vsel %vm74_vm0, %v2289_v34, 0.0 }
 0xdc1   :  { %2292 = vadd.xlane.f32.xlu0 %v2291_v35 }
 0xe48   :  { %v2296_v43 = vpop.xlane.xlu1 %2295 }
 0xe49   :  { %v2298_v44 = vmul.f32 0.03125, %v2296_v43  ;;  %v5130_v43 = vld [vmem:[%s7114_s26 + $0x88] sm:$0xff] }
 0xe4a   :  { %v2293_v45 = vpop.xlane.xlu0 %2292 }
 0xe4b   :  { %v2300_v46 = vadd.f32 1e-12, %v2298_v44  ;;  %v2297_v47 = vmul.f32 0.03125, %v2293_v45  ;;  %v5170_v44 = vld [vmem:[%s7092_s8 + $0x88] sm:$0xff]  ;;  %v5129_v45 = vld [vmem:[%s7114_s26 + $0x80] sm:$0xff] }
 0xe4d   :  { %6068 = vrsqrt.f32 %v2300_v46  ;;  %v2299_v48 = vadd.f32 1e-12, %v2297_v47  ;;  %v5169_v46 = vld [vmem:[%s7092_s8 + $0x80] sm:$0xff]  ;;  %v5152_v47 = vld [vmem:[%s7090_s6 + $0x98] sm:$0xff] }
 0xe4f   :  { %6070 = vrsqrt.f32 %v2299_v48 }
 0xe5a   :  { %v6069_v49 = vpop.eup %6068 }
 0xe5b   :  { %v2304_v51 = vmul.f32 %v6069_v49, %v2288_v30 }
 0xe5c   :  { %v6071_v52 = vpop.eup %6070 }
 0xe5d   :  { %v2303_v21 = vmul.f32 %v6071_v52, %v2287_v32  ;;  %v2312_v24 = vmul.f32 %v5119_v50, %v2304_v51 }
 0xe5f   :  { %v2311_v37 = vmul.f32 %v5119_v50, %v2303_v21  ;;  %v2320_v54 = vadd.f32 %v5120_v36, %v2312_v24 }
 0xe61   :  { %v2319_v53 = vadd.f32 %v5120_v36, %v2311_v37  ;;  %v5127_v36 = vld [vmem:[%s7102_s18] ss:$0 sm:$0xff] }
 0xe63   :  { %5771 = vmatprep.mubr.msk.f32.mxu0 %vm74_vm0, %v2319_v53 }
 0xe64   :  { %5772 = vmatmul.mubr.msk.f32.vlgmr.msra.gmra.mxu0 %vm74_vm0, %v2320_v54 }
 0xe65   :  { %5794 = vmatpush3.msra.mxu0 %v5132_v39 }
 0xe66   :  { %5795 = vmatprep.subr.mxu0 %v5131_v41 }
 0xe67   :  { %5796 = vmatpush3.msra.mxu0 %v5131_v41 }
 0xe68   :  { %5797 = vmatprep.subr.mxu0 %v5130_v43 }
 0xe69   :  { %5798 = vmatpush3.msra.mxu0 %v5130_v43 }
 0xe6a   :  { %5799 = vmatprep.subr.mxu0 %v5129_v45 }
 0xe6b   :  { %5800 = vmatpush3.msra.mxu0 %v5129_v45 }
 0xe6c   :  { %5804 = vmatprep.subr.mxu0 %v5152_v47 }
 0xf24   :  { %v5773_v0 = vpop.f32.mrf.mxu0 }
 0xf25   :  { %v2410_v3 = vadd.f32 %v5773_v0, %v5121_v63 }
 0xf26   :  { %v2404_v4 = vpop.f32.mrf.mxu0 }
 0xf27   :  { %v2416_v5 = vmul.f32 0.70710677, %v2410_v3  ;;  %v2405_v6 = vadd.f32 %v5121_v63, %v2404_v4  ;;  %v2414_v13 = vmul.f32 0.5, %v2410_v3  ;;  %v5199_v63 = vld [vmem:[%s7093_s9 + $0x4] ss:$0 sm:$0xff] }
 0xf29   :  { %6072 = verf.f32 %v2416_v5  ;;  %v2415_v7 = vmul.f32 0.70710677, %v2405_v6  ;;  %v2413_v11 = vmul.f32 0.5, %v2405_v6  ;;  %v5193_v5 = vld [vmem:[%s7089_s5 + $0x4] ss:$0 sm:$0xff] }
 0xf2b   :  { %6074 = verf.f32 %v2415_v7 }
 0xf36   :  { %v6073_v8 = vpop.eup %6072 }
 0xf37   :  { %v2420_v10 = vadd.f32 1.0, %v6073_v8 }
 0xf38   :  { %v6075_v9 = vpop.eup %6074 }
 0xf39   :  { %v2419_v12 = vadd.f32 1.0, %v6075_v9  ;;  %v2422_v15 = vmul.f32 %v2420_v10, %v2414_v13  ;;  %v5196_v10 = vld [vmem:[%s7091_s7 + $0x4] ss:$0 sm:$0xff] }
 0xf3b   :  { %v2421_v14 = vmul.f32 %v2419_v12, %v2413_v11 }
 0xf3d   :  { %5790 = vmatprep.mubr.msk.f32.mxu1 %vm2438_vm5, %v2421_v14 }
 0xf3e   :  { %5791 = vmatmul.mubr.msk.f32.vlgmr.msra.gmra.mxu1 %vm2438_vm5, %v2422_v15  ;;  %v5156_v15 = vld [vmem:[%s7090_s6 + $0xb8] sm:$0xff] }
 0xf3f   :  { %5816 = vmatpush3.msra.mxu1 %v5172_v40 }
 0xf40   :  { %5817 = vmatprep.subr.mxu1 %v5171_v42 }
 0xf41   :  { %5818 = vmatpush3.msra.mxu1 %v5171_v42 }
 0xf42   :  { %5819 = vmatprep.subr.mxu1 %v5170_v44 }
 0xf43   :  { %5820 = vmatpush3.msra.mxu1 %v5170_v44 }
 0xf44   :  { %5821 = vmatprep.subr.mxu1 %v5169_v46 }
 0xf45   :  { %5822 = vmatpush3.msra.mxu1 %v5169_v46  ;;  %v5135_v46 = vld [vmem:[%s7114_s26 + $0xb0] sm:$0xff] }
 0xffe   :  { %v5792_v17 = vpop.f32.mrf.mxu1 }
 0xfff   :  { %v2517_v18 = vadd.f32 %v5792_v17, %v5124_v16  ;;  %v5155_v17 = vld [vmem:[%s7090_s6 + $0xb0] sm:$0xff] }
0x1000   :  { %v2511_v19 = vpop.f32.mrf.mxu1 }
0x1001   :  { %v2512_v20 = vadd.f32 %v5124_v16, %v2511_v19  ;;  %v2521_v22 = vadd.f32 %v2517_v18, %v2320_v54  ;;  %v5154_v18 = vld [vmem:[%s7090_s6 + $0xa8] sm:$0xff]  ;;  %v5153_v19 = vld [vmem:[%s7090_s6 + $0xa0] sm:$0xff] }
0x1003   :  { %v2527_v23 = vsel %vm74_vm0, %v2521_v22, 0.0  ;;  %v2520_v25 = vadd.f32 %v2512_v20, %v2319_v53 }
0x1004   :  { %2528 = vadd.xlane.f32.xlu1 %v2527_v23 }
0x1005   :  { %v2524_v26 = vsel %vm74_vm0, %v2520_v25, 0.0 }
0x1006   :  { %2525 = vadd.xlane.f32.xlu0 %v2524_v26 }
0x108d   :  { %v2529_v27 = vpop.xlane.xlu1 %2528 }
0x108e   :  { %v2531_v28 = vmul.f32 0.03125, %v2529_v27 }
0x108f   :  { %v2526_v29 = vpop.xlane.xlu0 %2525 }
0x1090   :  { %v2533_v30 = vsub.f32 %v2521_v22, %v2531_v28  ;;  %v2530_v31 = vmul.f32 0.03125, %v2526_v29 }
0x1092   :  { %v2532_v32 = vsub.f32 %v2520_v25, %v2530_v31  ;;  %v2535_v33 = vmul.f32 %v2533_v30, %v2533_v30 }
0x1094   :  { %v2539_v38 = vsel %vm74_vm0, %v2535_v33, 0.0  ;;  %v2534_v34 = vmul.f32 %v2532_v32, %v2532_v32 }
0x1095   :  { %2540 = vadd.xlane.f32.xlu1 %v2539_v38 }
0x1096   :  { %v2536_v35 = vsel %vm74_vm0, %v2534_v34, 0.0  ;;  %v5136_v34 = vld [vmem:[%s7114_s26 + $0xb8] sm:$0xff] }
0x1097   :  { %2537 = vadd.xlane.f32.xlu0 %v2536_v35 }
0x111e   :  { %v2541_v48 = vpop.xlane.xlu1 %2540 }
0x111f   :  { %v2543_v49 = vmul.f32 0.03125, %v2541_v48  ;;  %v5133_v48 = vld [vmem:[%s7114_s26 + $0xa0] sm:$0xff] }
0x1120   :  { %v2538_v50 = vpop.xlane.xlu0 %2537 }
0x1121   :  { %v2545_v51 = vadd.f32 1e-12, %v2543_v49  ;;  %v2542_v52 = vmul.f32 0.03125, %v2538_v50  ;;  %v5176_v49 = vld [vmem:[%s7092_s8 + $0xb8] sm:$0xff]  ;;  %v5175_v50 = vld [vmem:[%s7092_s8 + $0xb0] sm:$0xff] }
0x1123   :  { %6076 = vrsqrt.f32 %v2545_v51  ;;  %v2544_v21 = vadd.f32 1e-12, %v2542_v52  ;;  %v5174_v51 = vld [vmem:[%s7092_s8 + $0xa8] sm:$0xff]  ;;  %v5173_v52 = vld [vmem:[%s7092_s8 + $0xa0] sm:$0xff] }
0x1125   :  { %6078 = vrsqrt.f32 %v2544_v21 }
0x1130   :  { %v6077_v24 = vpop.eup %6076 }
0x1131   :  { %v2549_v37 = vmul.f32 %v6077_v24, %v2533_v30  ;;  %v5211_v30 = vld [vmem:[%s7091_s7 + $0x5] ss:$0 sm:$0xff] }
0x1132   :  { %v6079_v53 = vpop.eup %6078 }
0x1133   :  { %v2548_v54 = vmul.f32 %v6079_v53, %v2532_v32  ;;  %v2557_v55 = vmul.f32 %v5127_v36, %v2549_v37  ;;  %v5208_v37 = vld [vmem:[%s7089_s5 + $0x5] ss:$0 sm:$0xff] }
0x1135   :  { %v2556_v57 = vmul.f32 %v5127_v36, %v2548_v54  ;;  %v6711_v59 = vadd.f32 %v5128_v56, %v2557_v55 }
0x1137   :  { %v6709_v58 = vadd.f32 %v5128_v56, %v2556_v57  ;;  %v5214_v56 = vld [vmem:[%s7093_s9 + $0x5] ss:$0 sm:$0xff] }
0x1139   :  { %5801 = vmatprep.mubr.msk.f32.mxu0 %vm74_vm0, %v6709_v58  ;;  %5823 = vmatprep.mubr.msk.f32.mxu1 %vm74_vm0, %v6709_v58 }
0x113a   :  { %5802 = vmatmul.mubr.msk.f32.vlgmr.msra.gmra.mxu0 %vm74_vm0, %v6711_v59  ;;  %5824 = vmatmul.mubr.msk.f32.vlgmr.msra.gmra.mxu1 %vm74_vm0, %v6711_v59 }
0x113b   :  { %5805 = vmatpush3.msra.mxu0 %v5152_v47  ;;  %5812 = vmatprep.mubr.msk.f32.mxu0 %vm74_vm0, %v6709_v58  ;;  %v5134_v47 = vld [vmem:[%s7114_s26 + $0xa8] sm:$0xff] }
0x113c   :  { %5806 = vmatprep.subr.mxu0 %v5151_v60 }
0x113d   :  { %5807 = vmatpush3.msra.mxu0 %v5151_v60 }
0x113e   :  { %5808 = vmatprep.subr.mxu0 %v5150_v61 }
0x113f   :  { %5809 = vmatpush3.msra.mxu0 %v5150_v61 }
0x1140   :  { %5810 = vmatprep.subr.mxu0 %v5149_v62 }
0x1141   :  { %5811 = vmatpush3.msra.mxu0 %v5149_v62 }
0x1142   :  { %5813 = vmatmul.mubr.msk.f32.vlgmr.msra.gmra.mxu0 %vm74_vm0, %v6711_v59 }
0x11fa   :  { %v5803_v0 = vpop.f32.mrf.mxu0  ;;  %v5825_v3 = vpop.f32.mrf.mxu1 }
0x11fb   :  { %v2883_v4 = vadd.f32 %v5825_v3, %v5199_v63  ;;  %v2721_v16 = vadd.f32 %v5803_v0, %v5193_v5 }
0x11fc   :  { %v2715_v6 = vpop.f32.mrf.mxu0  ;;  %v2877_v7 = vpop.f32.mrf.mxu1 }
0x11fd   :  { %v2716_v8 = vadd.f32 %v5193_v5, %v2715_v6  ;;  %v2878_v9 = vadd.f32 %v5199_v63, %v2877_v7  ;;  %5833 = vmatprep.subr.mxu1 %v2883_v4 }
0x11fe   :  { %5834 = vmatpush3.msra.mxu1 %v2883_v4 }
0x11ff   :  { %5830 = vmatprep.mubr.msk.f32.mxu0 %vm431_vm1, %v2716_v8  ;;  %5835 = vmatprep.subr.mxu1 %v2878_v9 }
0x1200   :  { %5836 = vmatpush3.msra.mxu1 %v2878_v9 }
0x1201   :  { %5840 = vmatprep.subr.mxu1 %v5136_v34 }
0x1202   :  { %v5814_v11 = vpop.f32.mrf.mxu0 }
0x1203   :  { %v2802_v12 = vadd.f32 %v5814_v11, %v5196_v10  ;;  %v5189_v11 = vld [vmem:[%s7094_s10 + $0x20] sm:$0xff] }
0x1204   :  { %v2796_v13 = vpop.f32.mrf.mxu0 }
0x1205   :  { %v2797_v14 = vadd.f32 %v5196_v10, %v2796_v13  ;;  %5826 = vmatprep.subr.msk.mxu0 %vm431_vm1, %v2802_v12 }
0x1206   :  { %5827 = vmatpush3.xpose.msk.msra.mxu0 %vm431_vm1, %v2802_v12 }
0x1207   :  { %5828 = vmatprep.subr.msk.mxu0 %vm431_vm1, %v2797_v14 }
0x120a   :  { %5829 = vmatpush3.xpose.msk.msra.mxu0 %vm431_vm1, %v2797_v14 }
0x120b   :  { %5851 = vmatprep.subr.mxu0 %v5156_v15 }
0x120d   :  { %5831 = vmatmul.mubr.msk.f32.vlgmr.msra.gmra.mxu0 %vm431_vm1, %v2721_v16 }
0x120e   :  { %5852 = vmatpush3.msra.mxu0 %v5156_v15  ;;  %5859 = vmatprep.mubr.msk.f32.mxu0 %vm74_vm0, %v6709_v58 }
0x120f   :  { %5853 = vmatprep.subr.mxu0 %v5155_v17 }
0x1210   :  { %5854 = vmatpush3.msra.mxu0 %v5155_v17 }
0x1211   :  { %5855 = vmatprep.subr.mxu0 %v5154_v18 }
0x1212   :  { %5856 = vmatpush3.msra.mxu0 %v5154_v18 }
0x1213   :  { %5857 = vmatprep.subr.mxu0 %v5153_v19 }
0x1214   :  { %5858 = vmatpush3.msra.mxu0 %v5153_v19 }
0x1215   :  { %5860 = vmatmul.mubr.msk.f32.vlgmr.msra.gmra.mxu0 %vm74_vm0, %v6711_v59 }
0x12cd   :  { %v5832_v20 = vpop.f32.mrf.mxu0 }
0x12ce   :  { %v2974_v22 = vmul.f32 0.35355338, %v5832_v20 }
0x12cf   :  { %v2964_v23 = vpop.f32.mrf.mxu0 }
0x12d0   :  { %v2973_v25 = vmul.f32 0.35355338, %v2964_v23  ;;  %v2976_v26 = vsel %vm69_vm2, %v2974_v22, -3.4028235e+38 }
0x12d1   :  { %v2980_v27 = vsel %vm523_vm3, %v2976_v26, -inf }
0x12d2   :  { %2981 = vmax.xlane.f32.xlu1 %v2980_v27  ;;  %v2975_v28 = vsel %vm68_vm4, %v2973_v25, -3.4028235e+38 }
0x12d3   :  { %v2977_v29 = vsel %vm523_vm3, %v2975_v28, -inf }
0x12d4   :  { %2978 = vmax.xlane.f32.xlu0 %v2977_v29 }
0x12d5   :  { %v5861_v31 = vpop.f32.mrf.mxu0 }
0x12d6   :  { %v3239_v32 = vadd.f32 %v5861_v31, %v5211_v30  ;;  %v5159_v31 = vld [vmem:[%s7090_s6 + $0xd0] sm:$0xff] }
0x12d7   :  { %v3233_v33 = vpop.f32.mrf.mxu0 }
0x12d8   :  { %v3234_v38 = vadd.f32 %v5211_v30, %v3233_v33  ;;  %5873 = vmatprep.subr.msk.mxu0 %vm431_vm1, %v3239_v32  ;;  %v5157_v33 = vld [vmem:[%s7090_s6 + $0xc0] sm:$0xff] }
0x12d9   :  { %5874 = vmatpush3.xpose.msk.msra.mxu0 %vm431_vm1, %v3239_v32  ;;  %v5158_v32 = vld [vmem:[%s7090_s6 + $0xc8] sm:$0xff] }
0x12da   :  { %5875 = vmatprep.subr.msk.mxu0 %vm431_vm1, %v3234_v38 }
0x12dd   :  { %5876 = vmatpush3.xpose.msk.msra.mxu0 %vm431_vm1, %v3234_v38  ;;  %v5190_v38 = vld [vmem:[%s7094_s10 + $0x28] sm:$0xff] }
0x12de   :  { %5887 = vmatprep.subr.mxu0 %v5190_v38 }
0x135b   :  { %v2982_v35 = vpop.xlane.xlu1 %2981 }
0x135c   :  { %v2984_v39 = vsub.f32 %v2976_v26, %v2982_v35 }
0x135d   :  { %v2979_v40 = vpop.xlane.xlu0 %2978 }
0x135e   :  { %v2983_v41 = vsub.f32 %v2975_v28, %v2979_v40  ;;  %v2987_v42 = vmul.f32 1.442695, %v2984_v39  ;;  %v5160_v28 = vld [vmem:[%s7090_s6 + $0xd8] sm:$0xff] }
0x1360   :  { %v2985_v43 = vmul.f32 1.442695, %v2983_v41 }
0x1362   :  { %6080 = vpow2.f32 %v2985_v43 }
0x1363   :  { %6082 = vpow2.f32 %v2987_v42 }
0x136f   :  { %v6081_v44 = vpop.eup %6080 }
0x1370   :  { %v6083_v45 = vpop.eup %6082  ;;  %5837 = vmatprep.mubr.msk.f32.mxu1 %vm523_vm3, %v6081_v44  ;;  %v2989_v10 = vsel %vm523_vm3, %v6081_v44, 0.0 }
0x1371   :  { %5838 = vmatmul.mubr.msk.f32.vlgmr.msra.gmra.mxu1 %vm523_vm3, %v6083_v45  ;;  %v2992_v9 = vsel %vm523_vm3, %v6083_v45, 0.0 }
0x1372   :  { %5841 = vmatpush3.msra.mxu1 %v5136_v34  ;;  %5848 = vmatprep.mubr.msk.f32.mxu1 %vm74_vm0, %v6709_v58  ;;  %v5140_v34 = vld [vmem:[%s7114_s26 + $0xd8] sm:$0xff] }
0x1373   :  { %5842 = vmatprep.subr.mxu1 %v5135_v46 }
0x1374   :  { %5843 = vmatpush3.msra.mxu1 %v5135_v46  ;;  %v5139_v46 = vld [vmem:[%s7114_s26 + $0xd0] sm:$0xff] }
0x1375   :  { %5844 = vmatprep.subr.mxu1 %v5134_v47 }
0x1376   :  { %5845 = vmatpush3.msra.mxu1 %v5134_v47 }
0x1377   :  { %5846 = vmatprep.subr.mxu1 %v5133_v48 }
0x1378   :  { %5847 = vmatpush3.msra.mxu1 %v5133_v48  ;;  %v5138_v48 = vld [vmem:[%s7114_s26 + $0xc8] sm:$0xff] }
0x1379   :  { %5849 = vmatmul.mubr.msk.f32.vlgmr.msra.gmra.mxu1 %vm74_vm0, %v6711_v59  ;;  %5862 = vmatprep.subr.mxu1 %v5176_v49 }
0x137a   :  { %5863 = vmatpush3.msra.mxu1 %v5176_v49  ;;  %5870 = vmatprep.mubr.msk.f32.mxu1 %vm74_vm0, %v6709_v58  ;;  %v5137_v49 = vld [vmem:[%s7114_s26 + $0xc0] sm:$0xff] }
0x137b   :  { %5864 = vmatprep.subr.mxu1 %v5175_v50 }
0x137c   :  { %5865 = vmatpush3.msra.mxu1 %v5175_v50 }
0x137d   :  { %5866 = vmatprep.subr.mxu1 %v5174_v51 }
0x137e   :  { %5867 = vmatpush3.msra.mxu1 %v5174_v51  ;;  %v5230_v51 = vld [vmem:[%s7091_s7 + $0x6] ss:$0 sm:$0xff] }
0x137f   :  { %5868 = vmatprep.subr.mxu1 %v5173_v52 }
0x1380   :  { %5869 = vmatpush3.msra.mxu1 %v5173_v52  ;;  %v5180_v52 = vld [vmem:[%s7092_s8 + $0xd8] sm:$0xff] }
0x1381   :  { %5871 = vmatmul.mubr.msk.f32.vlgmr.msra.gmra.mxu1 %vm74_vm0, %v6711_v59 }
0x1431   :  { %v5839_v21 = vpop.f32.mrf.mxu1 }
0x1433   :  { %v3069_v24 = vpop.f32.mrf.mxu1 }
0x1439   :  { %v5850_v36 = vpop.f32.mrf.mxu1 }
0x143a   :  { %v3158_v55 = vadd.f32 %v5850_v36, %v5208_v37  ;;  %v5179_v36 = vld [vmem:[%s7092_s8 + $0xd0] sm:$0xff] }
0x143b   :  { %v3152_v53 = vpop.f32.mrf.mxu1 }
0x143c   :  { %v3153_v54 = vadd.f32 %v5208_v37, %v3152_v53 }
0x143e   :  { %5877 = vmatprep.mubr.msk.f32.mxu0 %vm431_vm1, %v3153_v54  ;;  %v5178_v54 = vld [vmem:[%s7092_s8 + $0xc8] sm:$0xff] }
0x143f   :  { %5878 = vmatmul.mubr.msk.f32.vlgmr.msra.gmra.mxu0 %vm431_vm1, %v3158_v55  ;;  %v5177_v55 = vld [vmem:[%s7092_s8 + $0xc0] sm:$0xff] }
0x1440   :  { %5888 = vmatpush3.msra.mxu0 %v5190_v38  ;;  %v5182_v38 = vld [vmem:[%s7092_s8 + $0xe8] sm:$0xff] }
0x1441   :  { %v5872_v57 = vpop.f32.mrf.mxu1  ;;  %5897 = vmatprep.subr.mxu0 %v5140_v34 }
0x1442   :  { %v3320_v60 = vadd.f32 %v5872_v57, %v5214_v56 }
0x1443   :  { %v3314_v61 = vpop.f32.mrf.mxu1 }
0x1444   :  { %v3315_v62 = vadd.f32 %v5214_v56, %v3314_v61  ;;  %5880 = vmatprep.subr.mxu1 %v3320_v60  ;;  %v5227_v61 = vld [vmem:[%s7089_s5 + $0x6] ss:$0 sm:$0xff] }
0x1445   :  { %5881 = vmatpush3.msra.mxu1 %v3320_v60 }
0x1446   :  { %5882 = vmatprep.subr.mxu1 %v3315_v62 }
0x1447   :  { %5883 = vmatpush3.msra.mxu1 %v3315_v62 }
0x1448   :  { %5892 = vmatprep.subr.mxu1 %v5189_v11 }
0x14ff   :  { %v5879_v63 = vpop.f32.mrf.mxu0 }
0x1500   :  { %v3411_v0 = vmul.f32 0.35355338, %v5879_v63 }
0x1501   :  { %v3401_v3 = vpop.f32.mrf.mxu0 }
0x1502   :  { %v3410_v4 = vmul.f32 0.35355338, %v3401_v3  ;;  %v3413_v5 = vsel %vm69_vm2, %v3411_v0, -3.4028235e+38  ;;  %v5233_v3 = vld [vmem:[%s7093_s9 + $0x6] ss:$0 sm:$0xff] }
0x1503   :  { %v3417_v6 = vsel %vm523_vm3, %v3413_v5, -inf }
0x1504   :  { %3418 = vmax.xlane.f32.xlu1 %v3417_v6  ;;  %v3412_v7 = vsel %vm68_vm4, %v3410_v4, -3.4028235e+38 }
0x1505   :  { %v3414_v8 = vsel %vm523_vm3, %v3412_v7, -inf }
0x1506   :  { %3415 = vmax.xlane.f32.xlu0 %v3414_v8 }
0x1508   :  { %2993 = vadd.xlane.f32.xlu1 %v2992_v9 }
0x150a   :  { %2990 = vadd.xlane.f32.xlu0 %v2989_v10 }
0x158d   :  { %v3419_v12 = vpop.xlane.xlu1 %3418 }
0x158e   :  { %v3421_v13 = vsub.f32 %v3413_v5, %v3419_v12 }
0x158f   :  { %v3416_v14 = vpop.xlane.xlu0 %3415 }
0x1590   :  { %v3424_v15 = vmul.f32 1.442695, %v3421_v13  ;;  %v3420_v16 = vsub.f32 %v3412_v7, %v3416_v14 }
0x1591   :  { %v2994_v17 = vpop.xlane.xlu1 %2993 }
0x1592   :  { %6084 = vpow2.f32 %v3424_v15  ;;  %v3422_v18 = vmul.f32 1.442695, %v3420_v16  ;;  %v5144_v16 = vld [vmem:[%s7114_s26 + $0xf8] sm:$0xff] }
0x1593   :  { %6086 = vrcp.f32 %v2994_v17  ;;  %v2991_v19 = vpop.xlane.xlu0 %2990 }
0x1594   :  { %6088 = vpow2.f32 %v3422_v18 }
0x1595   :  { %6090 = vrcp.f32 %v2991_v19 }
0x159f   :  { %v6085_v20 = vpop.eup %6084 }
0x15a0   :  { %v6087_v22 = vpop.eup %6086  ;;  %v3429_v23 = vsel %vm523_vm3, %v6085_v20, 0.0 }
0x15a1   :  { %v6089_v25 = vpop.eup %6088  ;;  %3430 = vadd.xlane.f32.xlu1 %v3429_v23  ;;  %v3079_v30 = vmul.f32 %v6087_v22, %v5839_v21 }
0x15a2   :  { %v6091_v26 = vpop.eup %6090  ;;  %5884 = vmatprep.mubr.msk.f32.mxu1 %vm523_vm3, %v6089_v25  ;;  %v3426_v27 = vsel %vm523_vm3, %v6089_v25, 0.0 }
0x15a3   :  { %5885 = vmatmul.mubr.msk.f32.vlgmr.msra.gmra.mxu1 %vm523_vm3, %v6085_v20  ;;  %3427 = vadd.xlane.f32.xlu0 %v3426_v27  ;;  %v3078_v29 = vmul.f32 %v6091_v26, %v3069_v24 }
0x15a4   :  { %5893 = vmatpush3.msra.mxu1 %v5189_v11 }
0x15a5   :  { %5894 = vmatprep.mubr.msk.f32.mxu1 %vm431_vm1, %v3078_v29  ;;  %5908 = vmatprep.subr.mxu1 %v5160_v28  ;;  %v5143_v29 = vld [vmem:[%s7114_s26 + $0xf0] sm:$0xff] }
0x15a7   :  { %5895 = vmatmul.mubr.msk.f32.vlgmr.msra.gmra.mxu1 %vm431_vm1, %v3079_v30  ;;  %v5142_v30 = vld [vmem:[%s7114_s26 + $0xe8] sm:$0xff] }
0x15a8   :  { %5909 = vmatpush3.msra.mxu1 %v5160_v28  ;;  %5916 = vmatprep.mubr.msk.f32.mxu1 %vm74_vm0, %v6709_v58 }
0x15a9   :  { %5910 = vmatprep.subr.mxu1 %v5159_v31 }
0x15aa   :  { %5911 = vmatpush3.msra.mxu1 %v5159_v31  ;;  %v5141_v31 = vld [vmem:[%s7114_s26 + $0xe0] sm:$0xff] }
0x15ab   :  { %5912 = vmatprep.subr.mxu1 %v5158_v32 }
0x15ac   :  { %5913 = vmatpush3.msra.mxu1 %v5158_v32  ;;  %v5184_v32 = vld [vmem:[%s7092_s8 + $0xf8] sm:$0xff] }
0x15ad   :  { %5914 = vmatprep.subr.mxu1 %v5157_v33 }
0x15ae   :  { %5915 = vmatpush3.msra.mxu1 %v5157_v33  ;;  %v5183_v33 = vld [vmem:[%s7092_s8 + $0xf0] sm:$0xff] }
0x15af   :  { %5917 = vmatmul.mubr.msk.f32.vlgmr.msra.gmra.mxu1 %vm74_vm0, %v6711_v59 }
0x162a   :  { %v3431_v39 = vpop.xlane.xlu1 %3430 }
0x162c   :  { %v3428_v35 = vpop.xlane.xlu0 %3427 }
0x162d   :  { %6092 = vrcp.f32 %v3428_v35  ;;  %v5191_v35 = vld [vmem:[%s7094_s10 + $0x30] sm:$0xff] }
0x162e   :  { %6094 = vrcp.f32 %v3431_v39  ;;  %v5164_v39 = vld [vmem:[%s7090_s6 + $0xf8] sm:$0xff] }
0x163a   :  { %v6093_v41 = vpop.eup %6092 }
0x163b   :  { %v6095_v43 = vpop.eup %6094 }
0x1663   :  { %v5886_v40 = vpop.f32.mrf.mxu1 }
0x1664   :  { %v3516_v45 = vmul.f32 %v6095_v43, %v5886_v40 }
0x1665   :  { %v3506_v42 = vpop.f32.mrf.mxu1 }
0x1666   :  { %v3515_v44 = vmul.f32 %v6093_v41, %v3506_v42 }
0x1667   :  { %v6863_v47 = vpop.f32.mrf.mxu1 }
0x1668   :  { %5889 = vmatprep.mubr.msk.f32.mxu0 %vm431_vm1, %v3515_v44 }
0x1669   :  { %5890 = vmatmul.mubr.msk.f32.vlgmr.msra.gmra.mxu0 %vm431_vm1, %v3516_v45  ;;  %v6874_v50 = vpop.f32.mrf.mxu1 }
0x166a   :  { %5898 = vmatpush3.msra.mxu0 %v5140_v34  ;;  %5905 = vmatprep.mubr.msk.f32.mxu0 %vm74_vm0, %v6709_v58  ;;  %v5181_v34 = vld [vmem:[%s7092_s8 + $0xe0] sm:$0xff] }
0x166b   :  { %5899 = vmatprep.subr.mxu0 %v5139_v46 }
0x166c   :  { %5900 = vmatpush3.msra.mxu0 %v5139_v46 }
0x166d   :  { %5901 = vmatprep.subr.mxu0 %v5138_v48 }
0x166e   :  { %5902 = vmatpush3.msra.mxu0 %v5138_v48 }
0x166f   :  { %5903 = vmatprep.subr.mxu0 %v5137_v49  ;;  %v5918_v21 = vpop.f32.mrf.mxu1 }
0x1670   :  { %v3838_v24 = vadd.f32 %v5918_v21, %v5230_v51  ;;  %5904 = vmatpush3.msra.mxu0 %v5137_v49  ;;  %v5163_v49 = vld [vmem:[%s7090_s6 + $0xf0] sm:$0xff] }
0x1671   :  { %5906 = vmatmul.mubr.msk.f32.vlgmr.msra.gmra.mxu0 %vm74_vm0, %v6711_v59  ;;  %v3832_v37 = vpop.f32.mrf.mxu1  ;;  %5919 = vmatprep.subr.mxu0 %v5180_v52 }
0x1672   :  { %v3833_v53 = vadd.f32 %v5230_v51, %v3832_v37  ;;  %5920 = vmatpush3.msra.mxu0 %v5180_v52  ;;  %5927 = vmatprep.mubr.msk.f32.mxu0 %vm74_vm0, %v6709_v58  ;;  %v5244_v51 = vld [vmem:[%s7089_s5 + $0x7] ss:$0 sm:$0xff]  ;;  %v5162_v52 = vld [vmem:[%s7090_s6 + $0xe8] sm:$0xff] }
0x1673   :  { %5930 = vmatprep.subr.msk.mxu1 %vm431_vm1, %v3838_v24  ;;  %5921 = vmatprep.subr.mxu0 %v5179_v36 }
0x1674   :  { %5931 = vmatpush3.xpose.msk.msra.mxu1 %vm431_vm1, %v3838_v24  ;;  %5922 = vmatpush3.msra.mxu0 %v5179_v36  ;;  %v5161_v36 = vld [vmem:[%s7090_s6 + $0xe0] sm:$0xff] }
0x1675   :  { %5932 = vmatprep.subr.msk.mxu1 %vm431_vm1, %v3833_v53  ;;  %5923 = vmatprep.subr.mxu0 %v5178_v54 }
0x1676   :  { %5924 = vmatpush3.msra.mxu0 %v5178_v54  ;;  %v5250_v54 = vld [vmem:[%s7093_s9 + $0x7] ss:$0 sm:$0xff] }
0x1677   :  { %5925 = vmatprep.subr.mxu0 %v5177_v55 }
0x1678   :  { %5933 = vmatpush3.xpose.msk.msra.mxu1 %vm431_vm1, %v3833_v53  ;;  %5926 = vmatpush3.msra.mxu0 %v5177_v55 }
0x1679   :  { %5928 = vmatmul.mubr.msk.f32.vlgmr.msra.gmra.mxu0 %vm74_vm0, %v6711_v59  ;;  %5944 = vmatprep.subr.mxu1 %v5191_v35 }
0x1729   :  { %v6901_v56 = vpop.f32.mrf.mxu0 }
0x172b   :  { %v6903_v57 = vpop.f32.mrf.mxu0 }
0x1731   :  { %v5907_v60 = vpop.f32.mrf.mxu0 }
0x1732   :  { %v3757_v0 = vadd.f32 %v5907_v60, %v5227_v61 }
0x1733   :  { %v3751_v62 = vpop.f32.mrf.mxu0 }
0x1734   :  { %v3752_v63 = vadd.f32 %v5227_v61, %v3751_v62 }
0x1736   :  { %5934 = vmatprep.mubr.msk.f32.mxu1 %vm431_vm1, %v3752_v63  ;;  %v3676_v63 = vadd.f32 %v6863_v47, %v6901_v56 }
0x1737   :  { %5935 = vmatmul.mubr.msk.f32.vlgmr.msra.gmra.mxu1 %vm431_vm1, %v3757_v0 }
0x1738   :  { %5945 = vmatpush3.msra.mxu1 %v5191_v35 }
0x1739   :  { %v5929_v4 = vpop.f32.mrf.mxu0  ;;  %5960 = vmatprep.subr.mxu1 %v5164_v39 }
0x173a   :  { %v3919_v5 = vadd.f32 %v5929_v4, %v5233_v3 }
0x173b   :  { %v3913_v6 = vpop.f32.mrf.mxu0 }
0x173c   :  { %v3914_v7 = vadd.f32 %v5233_v3, %v3913_v6  ;;  %5937 = vmatprep.subr.mxu0 %v3919_v5  ;;  %v3671_v3 = vadd.f32 %v6874_v50, %v6903_v57 }
0x173d   :  { %5938 = vmatpush3.msra.mxu0 %v3919_v5 }
0x173e   :  { %5939 = vmatprep.subr.mxu0 %v3914_v7 }
0x173f   :  { %5940 = vmatpush3.msra.mxu0 %v3914_v7  ;;  %v5247_v7 = vld [vmem:[%s7091_s7 + $0x7] ss:$0 sm:$0xff] }
0x1740   :  { %5949 = vmatprep.subr.mxu0 %v5144_v16 }
0x17f7   :  { %v5936_v8 = vpop.f32.mrf.mxu1 }
0x17f8   :  { %v4010_v9 = vmul.f32 0.35355338, %v5936_v8 }
0x17f9   :  { %v4000_v10 = vpop.f32.mrf.mxu1 }
0x17fa   :  { %v4009_v11 = vmul.f32 0.35355338, %v4000_v10  ;;  %v4012_v12 = vsel %vm69_vm2, %v4010_v9, -3.4028235e+38 }
0x17fb   :  { %v4016_v13 = vsel %vm523_vm3, %v4012_v12, -inf }
0x17fc   :  { %4017 = vmax.xlane.f32.xlu1 %v4016_v13  ;;  %v4011_v14 = vsel %vm68_vm4, %v4009_v11, -3.4028235e+38 }
0x17fd   :  { %v4013_v15 = vsel %vm523_vm3, %v4011_v14, -inf }
0x17fe   :  { %4014 = vmax.xlane.f32.xlu0 %v4013_v15 }
0x1885   :  { %v4018_v17 = vpop.xlane.xlu1 %4017 }
0x1886   :  { %v4020_v18 = vsub.f32 %v4012_v12, %v4018_v17 }
0x1887   :  { %v4015_v19 = vpop.xlane.xlu0 %4014 }
0x1888   :  { %v4023_v20 = vmul.f32 1.442695, %v4020_v18  ;;  %v4019_v22 = vsub.f32 %v4011_v14, %v4015_v19 }
0x188a   :  { %6096 = vpow2.f32 %v4023_v20  ;;  %v4021_v23 = vmul.f32 1.442695, %v4019_v22 }
0x188c   :  { %6098 = vpow2.f32 %v4021_v23 }
0x1897   :  { %v6097_v25 = vpop.eup %6096 }
0x1898   :  { %v4028_v26 = vsel %vm523_vm3, %v6097_v25, 0.0 }
0x1899   :  { %v6099_v27 = vpop.eup %6098  ;;  %4029 = vadd.xlane.f32.xlu1 %v4028_v26  ;;  %v5192_v26 = vld [vmem:[%s7094_s10 + $0x38] sm:$0xff] }
0x189a   :  { %5941 = vmatprep.mubr.msk.f32.mxu0 %vm523_vm3, %v6099_v27  ;;  %v4025_v28 = vsel %vm523_vm3, %v6099_v27, 0.0 }
0x189b   :  { %5942 = vmatmul.mubr.msk.f32.vlgmr.msra.gmra.mxu0 %vm523_vm3, %v6097_v25  ;;  %4026 = vadd.xlane.f32.xlu0 %v4025_v28 }
0x189c   :  { %5950 = vmatpush3.msra.mxu0 %v5144_v16  ;;  %5957 = vmatprep.mubr.msk.f32.mxu0 %vm74_vm0, %v6709_v58 }
0x189d   :  { %5951 = vmatprep.subr.mxu0 %v5143_v29 }
0x189e   :  { %5952 = vmatpush3.msra.mxu0 %v5143_v29 }
0x189f   :  { %5953 = vmatprep.subr.mxu0 %v5142_v30 }
0x18a0   :  { %5954 = vmatpush3.msra.mxu0 %v5142_v30 }
0x18a1   :  { %5955 = vmatprep.subr.mxu0 %v5141_v31 }
0x18a2   :  { %5956 = vmatpush3.msra.mxu0 %v5141_v31 }
0x18a3   :  { %5958 = vmatmul.mubr.msk.f32.vlgmr.msra.gmra.mxu0 %vm74_vm0, %v6711_v59  ;;  %5971 = vmatprep.subr.mxu0 %v5184_v32 }
0x18a4   :  { %5972 = vmatpush3.msra.mxu0 %v5184_v32  ;;  %5979 = vmatprep.mubr.msk.f32.mxu0 %vm74_vm0, %v6709_v58 }
0x18a5   :  { %5973 = vmatprep.subr.mxu0 %v5183_v33 }
0x18a6   :  { %5974 = vmatpush3.msra.mxu0 %v5183_v33 }
0x18a7   :  { %5975 = vmatprep.subr.mxu0 %v5182_v38 }
0x18a8   :  { %5976 = vmatpush3.msra.mxu0 %v5182_v38 }
0x18a9   :  { %5977 = vmatprep.subr.mxu0 %v5181_v34 }
0x18aa   :  { %5978 = vmatpush3.msra.mxu0 %v5181_v34 }
0x18ab   :  { %5980 = vmatmul.mubr.msk.f32.vlgmr.msra.gmra.mxu0 %vm74_vm0, %v6711_v59 }
0x1922   :  { %v4030_v41 = vpop.xlane.xlu1 %4029 }
0x1924   :  { %v4027_v40 = vpop.xlane.xlu0 %4026 }
0x1925   :  { %6100 = vrcp.f32 %v4027_v40  ;;  %v5262_v40 = vld [vmem:[%s7095_s11 + $0x1] ss:$0 sm:$0xff] }
0x1926   :  { %6102 = vrcp.f32 %v4030_v41 }
0x1932   :  { %v6101_v43 = vpop.eup %6100 }
0x1933   :  { %v6103_v45 = vpop.eup %6102 }
0x195b   :  { %v5943_v42 = vpop.f32.mrf.mxu0 }
0x195c   :  { %v4115_v48 = vmul.f32 %v6103_v45, %v5943_v42 }
0x195d   :  { %v4105_v44 = vpop.f32.mrf.mxu0 }
0x195e   :  { %v4114_v46 = vmul.f32 %v6101_v43, %v4105_v44 }
0x1960   :  { %5946 = vmatprep.mubr.msk.f32.mxu1 %vm431_vm1, %v4114_v46 }
0x1961   :  { %5947 = vmatmul.mubr.msk.f32.vlgmr.msra.gmra.mxu1 %vm431_vm1, %v4115_v48 }
0x1962   :  { %5961 = vmatpush3.msra.mxu1 %v5164_v39  ;;  %5968 = vmatprep.mubr.msk.f32.mxu1 %vm74_vm0, %v6709_v58 }
0x1963   :  { %v5959_v21 = vpop.f32.mrf.mxu0  ;;  %5962 = vmatprep.subr.mxu1 %v5163_v49 }
0x1964   :  { %v4277_v24 = vadd.f32 %v5959_v21, %v5244_v51  ;;  %5963 = vmatpush3.msra.mxu1 %v5163_v49 }
0x1965   :  { %v4271_v37 = vpop.f32.mrf.mxu0  ;;  %5964 = vmatprep.subr.mxu1 %v5162_v52 }
0x1966   :  { %5965 = vmatpush3.msra.mxu1 %v5162_v52  ;;  %v4272_v53 = vadd.f32 %v5244_v51, %v4271_v37 }
0x1967   :  { %5966 = vmatprep.subr.mxu1 %v5161_v36 }
0x1968   :  { %5967 = vmatpush3.msra.mxu1 %v5161_v36 }
0x1969   :  { %5969 = vmatmul.mubr.msk.f32.vlgmr.msra.gmra.mxu1 %vm74_vm0, %v6711_v59 }
0x196a   :  { %5986 = vmatprep.mubr.msk.f32.mxu1 %vm431_vm1, %v4272_v53 }
0x196b   :  { %v5981_v55 = vpop.f32.mrf.mxu0 }
0x196c   :  { %v4439_v60 = vadd.f32 %v5981_v55, %v5250_v54  ;;  %v5269_v55 = vld [vmem:[%s7098_s14 + $0x30] sm:$0xff] }
0x196d   :  { %v4433_v61 = vpop.f32.mrf.mxu0 }
0x196e   :  { %v4434_v62 = vadd.f32 %v5250_v54, %v4433_v61  ;;  %5989 = vmatprep.subr.mxu0 %v4439_v60  ;;  %v5270_v54 = vld [vmem:[%s7098_s14 + $0x38] sm:$0xff]  ;;  %v5267_v61 = vld [vmem:[%s7098_s14 + $0x20] sm:$0xff] }
0x196f   :  { %5990 = vmatpush3.msra.mxu0 %v4439_v60  ;;  %v5268_v60 = vld [vmem:[%s7098_s14 + $0x28] sm:$0xff] }
0x1970   :  { %5991 = vmatprep.subr.mxu0 %v4434_v62 }
0x1971   :  { %5992 = vmatpush3.msra.mxu0 %v4434_v62 }
0x1972   :  { %6001 = vmatprep.subr.mxu0 %v5270_v54 }
0x1a21   :  { %v5948_v0 = vpop.f32.mrf.mxu1 }
0x1a22   :  { %v4198_v4 = vadd.f32 %v5948_v0, %v3676_v63 }
0x1a23   :  { %v4188_v5 = vpop.f32.mrf.mxu1 }
0x1a24   :  { %v4197_v6 = vadd.f32 %v4188_v5, %v3671_v3 }
0x1a29   :  { %v5970_v8 = vpop.f32.mrf.mxu1 }
0x1a2a   :  { %v4358_v9 = vadd.f32 %v5970_v8, %v5247_v7 }
0x1a2b   :  { %v4352_v10 = vpop.f32.mrf.mxu1 }
0x1a2c   :  { %v4353_v11 = vadd.f32 %v5247_v7, %v4352_v10  ;;  %5982 = vmatprep.subr.msk.mxu1 %vm431_vm1, %v4358_v9  ;;  %v5265_v7 = vld [vmem:[%s7096_s12 + $0x1] ss:$0 sm:$0xff] }
0x1a2d   :  { %5983 = vmatpush3.xpose.msk.msra.mxu1 %vm431_vm1, %v4358_v9 }
0x1a2e   :  { %5984 = vmatprep.subr.msk.mxu1 %vm431_vm1, %v4353_v11 }
0x1a31   :  { %5985 = vmatpush3.xpose.msk.msra.mxu1 %vm431_vm1, %v4353_v11 }
0x1a32   :  { %5996 = vmatprep.subr.mxu1 %v5192_v26 }
0x1a34   :  { %5987 = vmatmul.mubr.msk.f32.vlgmr.msra.gmra.mxu1 %vm431_vm1, %v4277_v24 }
0x1a35   :  { %5997 = vmatpush3.msra.mxu1 %v5192_v26 }
0x1af4   :  { %v5988_v47 = vpop.f32.mrf.mxu1 }
0x1af5   :  { %v4530_v50 = vmul.f32 0.35355338, %v5988_v47  ;;  %v5266_v47 = vld [vmem:[%s7097_s13 + $0x1] ss:$0 sm:$0xff] }
0x1af6   :  { %v4520_v56 = vpop.f32.mrf.mxu1 }
0x1af7   :  { %v4529_v57 = vmul.f32 0.35355338, %v4520_v56  ;;  %v4532_v12 = vsel %vm69_vm2, %v4530_v50, -3.4028235e+38 }
0x1af8   :  { %v4536_v13 = vsel %vm523_vm3, %v4532_v12, -inf }
0x1af9   :  { %4537 = vmax.xlane.f32.xlu1 %v4536_v13  ;;  %v4531_v14 = vsel %vm68_vm4, %v4529_v57, -3.4028235e+38  ;;  %v5281_v13 = vld [vmem:[%s7100_s16 + $0x70] sm:$0xff] }
0x1afa   :  { %v4533_v15 = vsel %vm523_vm3, %v4531_v14, -inf }
0x1afb   :  { %4534 = vmax.xlane.f32.xlu0 %v4533_v15  ;;  %v5279_v15 = vld [vmem:[%s7100_s16 + $0x60] sm:$0xff] }
0x1b82   :  { %v4538_v16 = vpop.xlane.xlu1 %4537 }
0x1b83   :  { %v4540_v17 = vsub.f32 %v4532_v12, %v4538_v16  ;;  %v5282_v12 = vld [vmem:[%s7100_s16 + $0x78] sm:$0xff] }
0x1b84   :  { %v4535_v18 = vpop.xlane.xlu0 %4534  ;;  %6012 = vmatprep.subr.mxu1 %v5282_v12  ;;  %v5278_v16 = vld [vmem:[%s7100_s16 + $0x58] sm:$0xff] }
0x1b85   :  { %v4543_v19 = vmul.f32 1.442695, %v4540_v17  ;;  %v4539_v20 = vsub.f32 %v4531_v14, %v4535_v18  ;;  %v5280_v14 = vld [vmem:[%s7100_s16 + $0x68] sm:$0xff]  ;;  %v5277_v17 = vld [vmem:[%s7100_s16 + $0x50] sm:$0xff] }
0x1b86   :  { %v5276_v18 = vld [vmem:[%s7100_s16 + $0x48] sm:$0xff] }
0x1b87   :  { %6104 = vpow2.f32 %v4543_v19  ;;  %v4541_v22 = vmul.f32 1.442695, %v4539_v20  ;;  %v5275_v19 = vld [vmem:[%s7100_s16 + $0x40] sm:$0xff] }
0x1b88   :  { %v5272_v20 = vld [vmem:[%s7099_s15 + $0x1] ss:$0 sm:$0xff] }
0x1b89   :  { %6106 = vpow2.f32 %v4541_v22 }
0x1b94   :  { %v6105_v23 = vpop.eup %6104 }
0x1b95   :  { %v4548_v1 = vsel %vm523_vm3, %v6105_v23, 0.0 }
0x1b96   :  { %v6107_v25 = vpop.eup %6106  ;;  %4549 = vadd.xlane.f32.xlu1 %v4548_v1 }
0x1b97   :  { %5993 = vmatprep.mubr.msk.f32.mxu0 %vm523_vm3, %v6107_v25  ;;  %v4545_v2 = vsel %vm523_vm3, %v6107_v25, 0.0 }
0x1b98   :  { %5994 = vmatmul.mubr.msk.f32.vlgmr.msra.gmra.mxu0 %vm523_vm3, %v6105_v23  ;;  %4546 = vadd.xlane.f32.xlu0 %v4545_v2 }
0x1b99   :  { %6002 = vmatpush3.msra.mxu0 %v5270_v54 }
0x1b9a   :  { %6003 = vmatprep.subr.mxu0 %v5269_v55 }
0x1b9b   :  { %6004 = vmatpush3.msra.mxu0 %v5269_v55 }
0x1b9c   :  { %6005 = vmatprep.subr.mxu0 %v5268_v60 }
0x1b9d   :  { %6006 = vmatpush3.msra.mxu0 %v5268_v60 }
0x1b9e   :  { %6007 = vmatprep.subr.mxu0 %v5267_v61 }
0x1b9f   :  { %6008 = vmatpush3.msra.mxu0 %v5267_v61 }
0x1c1f   :  { %v4550_v28 = vpop.xlane.xlu1 %4549 }
0x1c21   :  { %v4547_v27 = vpop.xlane.xlu0 %4546 }
0x1c22   :  { %6108 = vrcp.f32 %v4547_v27 }
0x1c23   :  { %6110 = vrcp.f32 %v4550_v28 }
0x1c2f   :  { %v6109_v30 = vpop.eup %6108 }
0x1c30   :  { %v6111_v32 = vpop.eup %6110 }
0x1c58   :  { %v5995_v29 = vpop.f32.mrf.mxu0 }
0x1c59   :  { %v4635_v38 = vmul.f32 %v6111_v32, %v5995_v29 }
0x1c5a   :  { %v4625_v31 = vpop.f32.mrf.mxu0 }
0x1c5b   :  { %v4634_v33 = vmul.f32 %v6109_v30, %v4625_v31 }
0x1c5d   :  { %5998 = vmatprep.mubr.msk.f32.mxu1 %vm431_vm1, %v4634_v33 }
0x1c5e   :  { %5999 = vmatmul.mubr.msk.f32.vlgmr.msra.gmra.mxu1 %vm431_vm1, %v4635_v38 }
0x1c5f   :  { %6013 = vmatpush3.msra.mxu1 %v5282_v12 }
0x1c60   :  { %6014 = vmatprep.subr.mxu1 %v5281_v13 }
0x1c61   :  { %6015 = vmatpush3.msra.mxu1 %v5281_v13 }
0x1c62   :  { %6016 = vmatprep.subr.mxu1 %v5280_v14 }
0x1c63   :  { %6017 = vmatpush3.msra.mxu1 %v5280_v14 }
0x1c64   :  { %6018 = vmatprep.subr.mxu1 %v5279_v15 }
0x1c65   :  { %6019 = vmatpush3.msra.mxu1 %v5279_v15 }
0x1c66   :  { %6020 = vmatprep.subr.mxu1 %v5278_v16 }
0x1c67   :  { %6021 = vmatpush3.msra.mxu1 %v5278_v16 }
0x1c68   :  { %6022 = vmatprep.subr.mxu1 %v5277_v17 }
0x1c69   :  { %6023 = vmatpush3.msra.mxu1 %v5277_v17 }
0x1c6a   :  { %6024 = vmatprep.subr.mxu1 %v5276_v18 }
0x1c6b   :  { %6025 = vmatpush3.msra.mxu1 %v5276_v18 }
0x1c6c   :  { %6026 = vmatprep.subr.mxu1 %v5275_v19 }
0x1c6d   :  { %6027 = vmatpush3.msra.mxu1 %v5275_v19 }
0x1d1e   :  { %v6000_v34 = vpop.f32.mrf.mxu1 }
0x1d1f   :  { %v4718_v35 = vadd.f32 %v6000_v34, %v4198_v4  ;;  %v5284_v34 = vld [vmem:[%s7101_s17 + $0x1] ss:$0 sm:$0xff] }
0x1d20   :  { %v4708_v39 = vpop.f32.mrf.mxu1 }
0x1d21   :  { %v4720_v41 = vadd.f32 %v4718_v35, %v6711_v59  ;;  %v4717_v42 = vadd.f32 %v4708_v39, %v4197_v6 }
0x1d23   :  { %v4719_v43 = vadd.f32 %v4717_v42, %v6709_v58  ;;  %v4730_v44 = vadd.f32 %v5262_v40, %v4720_v41 }
0x1d25   :  { %v4738_v45 = vsel %vm74_vm0, %v4730_v44, 0.0  ;;  %v4729_v46 = vadd.f32 %v5262_v40, %v4719_v43 }
0x1d26   :  { %4739 = vadd.xlane.f32.xlu1 %v4738_v45 }
0x1d27   :  { %v4735_v48 = vsel %vm74_vm0, %v4729_v46, 0.0 }
0x1d28   :  { %4736 = vadd.xlane.f32.xlu0 %v4735_v48 }
0x1daf   :  { %v4740_v49 = vpop.xlane.xlu1 %4739 }
0x1db0   :  { %v4742_v51 = vmul.f32 0.03125, %v4740_v49 }
0x1db1   :  { %v4737_v52 = vpop.xlane.xlu0 %4736 }
0x1db2   :  { %v4744_v21 = vsub.f32 %v4730_v44, %v4742_v51  ;;  %v4741_v24 = vmul.f32 0.03125, %v4737_v52 }
0x1db4   :  { %v4743_v36 = vsub.f32 %v4729_v46, %v4741_v24  ;;  %v4746_v37 = vmul.f32 %v4744_v21, %v4744_v21 }
0x1db6   :  { %v4750_v59 = vsel %vm74_vm0, %v4746_v37, 0.0  ;;  %v4745_v53 = vmul.f32 %v4743_v36, %v4743_v36 }
0x1db7   :  { %4751 = vadd.xlane.f32.xlu1 %v4750_v59 }
0x1db8   :  { %v4747_v58 = vsel %vm74_vm0, %v4745_v53, 0.0 }
0x1db9   :  { %4748 = vadd.xlane.f32.xlu0 %v4747_v58 }
0x1e40   :  { %v4752_v62 = vpop.xlane.xlu1 %4751 }
0x1e41   :  { %v4754_v63 = vmul.f32 0.03125, %v4752_v62 }
0x1e42   :  { %v4749_v0 = vpop.xlane.xlu0 %4748 }
0x1e43   :  { %v4756_v3 = vadd.f32 1e-12, %v4754_v63  ;;  %v4753_v4 = vmul.f32 0.03125, %v4749_v0  ;;  %v5289_v63 = vld [vmem:[%s7102_s18 + $0x1] ss:$0 sm:$0xff]  ;;  %s6124_s18 = scalar_lea.vmem %s5041_s24, 32 }
0x1e44   :  { %p6125_p0 = scmp.ne.s32.totalorder %s5041_s24, %s6124_s18  ;;  %p6130_p2 = scmp.lt.s32.totalorder %s6124_s18, %s6124_s18 }
0x1e45   :  { %6112 = vrsqrt.f32 %v4756_v3  ;;  %v4755_v5 = vadd.f32 1e-12, %v4753_v4  ;;  %v5290_v4 = vld [vmem:[%s7103_s19 + $0x1] ss:$0 sm:$0xff] }
0x1e46   :  { %p6131_p3 = por %p6130_p2, %p6129_p1 }
0x1e47   :  { %6114 = vrsqrt.f32 %v4755_v5 }
0x1e48   :  { %p6132_p4 = pnand %p6131_p3, %p6125_p0 }
0x1e52   :  { %v6113_v6 = vpop.eup %6112 }
0x1e53   :  { %v4760_v8 = vmul.f32 %v6113_v6, %v4744_v21 }
0x1e54   :  { %v6115_v9 = vpop.eup %6114 }
0x1e55   :  { %v4759_v10 = vmul.f32 %v6115_v9, %v4743_v36  ;;  %v4768_v11 = vmul.f32 %v5265_v7, %v4760_v8 }
0x1e57   :  { %v4767_v50 = vmul.f32 %v5265_v7, %v4759_v10  ;;  %v4776_v57 = vadd.f32 %v5266_v47, %v4768_v11 }
0x1e59   :  { %v4775_v56 = vadd.f32 %v5266_v47, %v4767_v50 }
0x1e5b   :  { %6009 = vmatprep.mubr.msk.f32.mxu0 %vm74_vm0, %v4775_v56 }
0x1e5c   :  { %6010 = vmatmul.mubr.msk.f32.vlgmr.msra.gmra.mxu0 %vm74_vm0, %v4776_v57 }
0x1f1c   :  { %v6011_v22 = vpop.f32.mrf.mxu0 }
0x1f1d   :  { %v4868_v23 = vadd.f32 %v6011_v22, %v5272_v20 }
0x1f1e   :  { %v4862_v1 = vpop.f32.mrf.mxu0 }
0x1f1f   :  { %v4874_v25 = vmul.f32 0.70710677, %v4868_v23  ;;  %v4863_v2 = vadd.f32 %v5272_v20, %v4862_v1  ;;  %v4872_v32 = vmul.f32 0.5, %v4868_v23 }
0x1f21   :  { %6116 = verf.f32 %v4874_v25  ;;  %v4873_v26 = vmul.f32 0.70710677, %v4863_v2  ;;  %v4871_v30 = vmul.f32 0.5, %v4863_v2 }
0x1f23   :  { %6118 = verf.f32 %v4873_v26 }
0x1f2e   :  { %v6117_v27 = vpop.eup %6116 }
0x1f2f   :  { %v4878_v29 = vadd.f32 1.0, %v6117_v27 }
0x1f30   :  { %v6119_v28 = vpop.eup %6118 }
0x1f31   :  { %v4877_v31 = vadd.f32 1.0, %v6119_v28  ;;  %v4880_v38 = vmul.f32 %v4878_v29, %v4872_v32 }
0x1f33   :  { %v4879_v33 = vmul.f32 %v4877_v31, %v4871_v30 }
0x1f35   :  { %6028 = vmatprep.mubr.msk.f32.mxu1 %vm2438_vm5, %v4879_v33 }
0x1f36   :  { %6029 = vmatmul.mubr.msk.f32.vlgmr.msra.gmra.mxu1 %vm2438_vm5, %v4880_v38 }
0x1ff6   :  { %v6030_v35 = vpop.f32.mrf.mxu1 }
0x1ff7   :  { %v4976_v39 = vadd.f32 %v6030_v35, %v5284_v34 }
0x1ff8   :  { %v4970_v40 = vpop.f32.mrf.mxu1 }
0x1ff9   :  { %v4971_v41 = vadd.f32 %v5284_v34, %v4970_v40  ;;  %v4980_v42 = vadd.f32 %v4976_v39, %v4776_v57 }
0x1ffb   :  { %v4988_v43 = vsel %vm74_vm0, %v4980_v42, 0.0  ;;  %v4979_v44 = vadd.f32 %v4971_v41, %v4775_v56 }
0x1ffc   :  { %4989 = vadd.xlane.f32.xlu0 %v4988_v43 }
0x1ffd   :  { %v4985_v45 = vsel %vm74_vm0, %v4979_v44, 0.0 }
0x1ffe   :  { %4986 = vadd.xlane.f32.xlu1 %v4985_v45 }
0x2085   :  { %v4990_v46 = vpop.xlane.xlu0 %4989 }
0x2086   :  { %v4992_v48 = vmul.f32 0.03125, %v4990_v46 }
0x2087   :  { %v4987_v49 = vpop.xlane.xlu1 %4986 }
0x2088   :  { %v4994_v51 = vsub.f32 %v4980_v42, %v4992_v48  ;;  %v4991_v52 = vmul.f32 0.03125, %v4987_v49 }
0x208a   :  { %v4993_v21 = vsub.f32 %v4979_v44, %v4991_v52  ;;  %v4996_v24 = vmul.f32 %v4994_v51, %v4994_v51 }
0x208c   :  { %v5000_v36 = vsel %vm74_vm0, %v4996_v24, 0.0  ;;  %v4995_v37 = vmul.f32 %v4993_v21, %v4993_v21 }
0x208d   :  { %5001 = vadd.xlane.f32.xlu0 %v5000_v36 }
0x208e   :  { %v4997_v59 = vsel %vm74_vm0, %v4995_v37, 0.0 }
0x208f   :  { %4998 = vadd.xlane.f32.xlu1 %v4997_v59 }
0x2116   :  { %v5002_v53 = vpop.xlane.xlu0 %5001 }
0x2117   :  { %v5004_v58 = vmul.f32 0.03125, %v5002_v53 }
0x2118   :  { %v4999_v54 = vpop.xlane.xlu1 %4998 }
0x2119   :  { %v5006_v55 = vadd.f32 1e-12, %v5004_v58  ;;  %v5003_v60 = vmul.f32 0.03125, %v4999_v54 }
0x211b   :  { %6120 = vrsqrt.f32 %v5006_v55  ;;  %v5005_v61 = vadd.f32 1e-12, %v5003_v60 }
0x211d   :  { %6122 = vrsqrt.f32 %v5005_v61 }
0x2128   :  { %v6121_v62 = vpop.eup %6120 }
0x2129   :  { %v5010_v0 = vmul.f32 %v6121_v62, %v4994_v51 }
0x212a   :  { %v6123_v3 = vpop.eup %6122 }
0x212b   :  { %v5009_v5 = vmul.f32 %v6123_v3, %v4993_v21  ;;  %v5018_v6 = vmul.f32 %v5289_v63, %v5010_v0 }
0x212d   :  { %v5017_v7 = vmul.f32 %v5289_v63, %v5009_v5  ;;  %v5026_v8 = vadd.f32 %v5290_v4, %v5018_v6 }
0x212f   :  { %v5025_v9 = vadd.f32 %v5290_v4, %v5017_v7  ;;  %v5028_v10 = vrot.slane %v5026_v8, 7 }
0x2131   :  { %v5031_v11 = vsel %vm5030_vm6, %v5025_v9, %v5028_v10 }
0x2132   :  { %5033 = vst.msk [vmem:[#allocation2] sm:$0x3] %vm5032_vm7, %v5031_v11 }
0x2133   :  { %6135 = shalt.err (!%p6132_p4)
}
0x2134   :  { %5043 = dma.vmem_to_hbm [thread:$0]  %s5041_s24, 32, %s7104_s20, [#allocation3]  }
0x2135   :  { %6144 = dma.done.wait [#allocation3], 32  }
0x2136   :  { %6145 = vsyncadd [#allocation3], 4294967264 }
0x2137   :  { %5047 = vsyncpa [#allocation3], 1 }

</bundles_post_ra>
